<compile_context>
chip_gen: v6e
topology: v6e:2x2x1
jax: 0.10.0
libtpu: 0.0.40
codegen_flags: <defaults>
</compile_context>

<pallas_src>
import jax
import jax.numpy as jnp
import numpy as np
from jax import lax
from jax.experimental import pallas as pl
from jax.experimental.pallas import tpu as pltpu

# ---- model hyper-parameters (small, consistent with the module defaults) ----
VOCAB = 32
EMB = 32
HEADS = 4
HEAD_DIM = EMB // HEADS
FF_HIDDEN = 4 * EMB
SEQ = 8
BATCH = 2
N_LAYERS = 2
MASK = False  # task='classification' ; True would correspond to task='autoregressive'
LN_EPS = 1e-5


def _layer_norm(t, gamma, beta):
    mu = jnp.mean(t, axis=-1, keepdims=True)
    var = jnp.mean((t - mu) ** 2, axis=-1, keepdims=True)
    return (t - mu) * lax.rsqrt(var + LN_EPS) * gamma + beta


def encoder_kernel(tok_ref, temb_ref, pemb_ref,
                   wqkv_ref, bqkv_ref, wo_ref, vecs_ref, w1_ref, bf1_ref, w2_ref,
                   o_ref):
    rows = BATCH * SEQ

    # ---- fused token embedding (gather expressed as one-hot matmul) + pos add ----
    lane_ids = lax.broadcasted_iota(jnp.int32, (rows, VOCAB), 1)
    onehot = (lane_ids == tok_ref[...]).astype(jnp.float32)            # (B*S, V)
    x = jnp.dot(onehot, temb_ref[...], preferred_element_type=jnp.float32)
    x = x + jnp.concatenate([pemb_ref[...]] * BATCH, axis=0)           # (B*S, E)

    scale = 1.0 / (HEAD_DIM ** 0.5)

    for l in range(N_LAYERS):                       # static unroll over layers
        wqkv = wqkv_ref[l]                          # (E, 3E)
        bqkv = bqkv_ref[l]                          # (1, 3E)
        wo = wo_ref[l]                              # (E, E)
        vecs = vecs_ref[l]                          # (6, E): bo, g1, be1, g2, be2, bf2
        bo, g1, be1 = vecs[0:1], vecs[1:2], vecs[2:3]
        g2, be2, bf2 = vecs[3:4], vecs[4:5], vecs[5:6]
        w1, bf1, w2 = w1_ref[l], bf1_ref[l], w2_ref[l]

        # ---- multi-head self attention (packed QKV: one matmul) ----
        qkv = jnp.dot(x, wqkv, preferred_element_type=jnp.float32) + bqkv
        q = qkv[:, 0:EMB]
        k = qkv[:, EMB:2 * EMB]
        v = qkv[:, 2 * EMB:3 * EMB]

        attn_rows = []
        for b in range(BATCH):                      # static unroll over batch
            r0 = b * SEQ
            acc = jnp.zeros((SEQ, EMB), jnp.float32)
            for h in range(HEADS):                  # static unroll over heads
                c0 = h * HEAD_DIM
                qh = q[r0:r0 + SEQ, c0:c0 + HEAD_DIM]
                kh = k[r0:r0 + SEQ, c0:c0 + HEAD_DIM]
                vh = v[r0:r0 + SEQ, c0:c0 + HEAD_DIM]
                # q @ k^T via dot_general contracting last dims (no transpose)
                s = lax.dot_general(qh, kh, (((1,), (1,)), ((), ())),
                                    preferred_element_type=jnp.float32) * scale
                if MASK:  # causal path (task='autoregressive'); dead code for classification
                    ri = lax.broadcasted_iota(jnp.int32, (SEQ, SEQ), 0)
                    ci = lax.broadcasted_iota(jnp.int32, (SEQ, SEQ), 1)
                    s = jnp.where(ci <= ri, s, -jnp.inf)
                s = s - jnp.max(s, axis=-1, keepdims=True)
                p = jnp.exp(s)
                denom = jnp.sum(p, axis=-1, keepdims=True)
                inv = pl.reciprocal(denom, approx=True)   # EUP seed (off the VALU path)
                inv = inv * (2.0 - denom * inv)           # one Newton step -> ~f32 accuracy
                p = p * inv
                pv = jnp.dot(p, vh, preferred_element_type=jnp.float32)
                # fold output projection into the head accumulation (no concat, no extra GEMM)
                acc = acc + jnp.dot(pv, wo[c0:c0 + HEAD_DIM, :],
                                    preferred_element_type=jnp.float32)
            attn_rows.append(acc)
        attn = jnp.concatenate(attn_rows, axis=0) + bo      # (B*S, E)

        # ---- residual + LayerNorm 1 ----
        h1 = _layer_norm(attn + x, g1, be1)

        # ---- feed-forward ----
        ff = jnp.dot(h1, w1, preferred_element_type=jnp.float32) + bf1
        ff = jnp.maximum(ff, 0.0)
        ff = jnp.dot(ff, w2, preferred_element_type=jnp.float32) + bf2

        # ---- residual + LayerNorm 2 ----
        x = _layer_norm(ff + h1, g2, be2)

    o_ref[...] = x.astype(o_ref.dtype)


def _full_spec(shape):
    n = len(shape)
    return pl.BlockSpec(shape, lambda i, _n=n: (0,) * _n)


def pack_params(block_params):
    """Pack per-layer params into a few stacked arrays for the fused kernel."""
    def stack(fn):
        return jnp.stack([fn(p) for p in block_params])
    # param order: wq,bq,wk,bk,wv,bv,wo,bo,g1,be1,g2,be2,w1,bf1,w2,bf2
    wqkv = stack(lambda p: jnp.concatenate([p[0], p[2], p[4]], axis=1))   # (L, E, 3E)
    bqkv = stack(lambda p: jnp.concatenate([p[1], p[3], p[5]], axis=1))   # (L, 1, 3E)
    wo = stack(lambda p: p[6])                                            # (L, E, E)
    vecs = stack(lambda p: jnp.concatenate(
        [p[7], p[8], p[9], p[10], p[11], p[15]], axis=0))                 # (L, 6, E)
    w1 = stack(lambda p: p[12])                                           # (L, E, FF)
    bf1 = stack(lambda p: p[13])                                          # (L, 1, FF)
    w2 = stack(lambda p: p[14])                                           # (L, FF, E)
    return wqkv, bqkv, wo, vecs, w1, bf1, w2


def transformer_encoder(tokens, tok_emb, pos_emb, block_params):
    B, S = tokens.shape
    packed = pack_params(block_params)
    tok_col = tokens.reshape(B * S, 1).astype(jnp.int32)
    inputs = (tok_col, tok_emb, pos_emb) + packed
    out = pl.pallas_call(
        encoder_kernel,
        out_shape=jax.ShapeDtypeStruct((B * S, EMB), jnp.float32),
        grid_spec=pltpu.PrefetchScalarGridSpec(
            num_scalar_prefetch=0,
            grid=(1,),  # single step: whole model fused, batch folded into rows
            in_specs=[_full_spec(a.shape) for a in inputs],
            out_specs=_full_spec((B * S, EMB)),
        ),
        compiler_params=pltpu.CompilerParams(dimension_semantics=("arbitrary",)),
    )(*inputs)
    return out.reshape(B, S, EMB)


# ------------------------------ init & reference ------------------------------
def init_block_params(key):
    ks = jax.random.split(key, 8)
    s = 0.1
    wq = jax.random.normal(ks[0], (EMB, EMB), jnp.float32) * s
    wk = jax.random.normal(ks[1], (EMB, EMB), jnp.float32) * s
    wv = jax.random.normal(ks[2], (EMB, EMB), jnp.float32) * s
    wo = jax.random.normal(ks[3], (EMB, EMB), jnp.float32) * s
    bq = jax.random.normal(ks[4], (1, EMB), jnp.float32) * s
    bk = jax.random.normal(ks[5], (1, EMB), jnp.float32) * s
    bv = jax.random.normal(ks[6], (1, EMB), jnp.float32) * s
    bo = jnp.zeros((1, EMB), jnp.float32)
    g1 = jnp.ones((1, EMB), jnp.float32)
    be1 = jnp.zeros((1, EMB), jnp.float32)
    g2 = jnp.ones((1, EMB), jnp.float32)
    be2 = jnp.zeros((1, EMB), jnp.float32)
    k1, k2 = jax.random.split(ks[7])
    w1 = jax.random.normal(k1, (EMB, FF_HIDDEN), jnp.float32) * s
    bf1 = jnp.zeros((1, FF_HIDDEN), jnp.float32)
    w2 = jax.random.normal(k2, (FF_HIDDEN, EMB), jnp.float32) * s
    bf2 = jnp.zeros((1, EMB), jnp.float32)
    return (wq, bq, wk, bk, wv, bv, wo, bo, g1, be1, g2, be2, w1, bf1, w2, bf2)


def transformer_block_ref(x, params):
    (wq, bq, wk, bk, wv, bv, wo, bo, g1, be1, g2, be2, w1, bf1, w2, bf2) = params
    B, S, E = x.shape
    q = x @ wq + bq
    k = x @ wk + bk
    v = x @ wv + bv
    split = lambda t: t.reshape(B, S, HEADS, HEAD_DIM).transpose(0, 2, 1, 3)
    qh, kh, vh = split(q), split(k), split(v)
    scores = jnp.einsum("bhqd,bhkd->bhqk", qh, kh) / (HEAD_DIM ** 0.5)
    if MASK:
        causal = jnp.tril(jnp.ones((S, S), bool))
        scores = jnp.where(causal, scores, -jnp.inf)
    p = jax.nn.softmax(scores, axis=-1)
    attn = jnp.einsum("bhqk,bhkd->bhqd", p, vh).transpose(0, 2, 1, 3).reshape(B, S, E)
    attn = attn @ wo + bo

    def ln(t, g, b):
        mu = jnp.mean(t, axis=-1, keepdims=True)
        var = jnp.mean((t - mu) ** 2, axis=-1, keepdims=True)
        return (t - mu) / jnp.sqrt(var + LN_EPS) * g + b

    h1 = ln(attn + x, g1, be1)
    ff = jnp.maximum(h1 @ w1 + bf1, 0.0) @ w2 + bf2
    return ln(ff + h1, g2, be2)


def transformer_encoder_ref(tokens, tok_emb, pos_emb, block_params):
    S = tokens.shape[1]
    x = jnp.take(tok_emb, tokens, axis=0) + pos_emb[None, :S, :]
    for params in block_params:
        x = transformer_block_ref(x, params)
    return x


if __name__ == "__main__":
    key = jax.random.PRNGKey(0)
    k_tok, k_temb, k_pemb, k_blocks = jax.random.split(key, 4)

    tokens = jax.random.randint(k_tok, (BATCH, SEQ), 0, VOCAB, dtype=jnp.int32)
    tok_emb = jax.random.normal(k_temb, (VOCAB, EMB), jnp.float32) * 0.1
    pos_emb = jax.random.normal(k_pemb, (SEQ, EMB), jnp.float32) * 0.1
    block_params = [init_block_params(k) for k in jax.random.split(k_blocks, N_LAYERS)]

    out = transformer_encoder(tokens, tok_emb, pos_emb, block_params)
    out = jax.block_until_ready(out)

    ref = jax.block_until_ready(
        transformer_encoder_ref(tokens, tok_emb, pos_emb, block_params)
    )
    # Tolerance budget: EUP approx-reciprocal seed + Newton step keeps the softmax
    # normalisation error well below 1e-4; 1e-3 leaves margin across both layers.
    np.testing.assert_allclose(np.asarray(out), np.asarray(ref), rtol=1e-3, atol=1e-3)
    print("KERNEL_OK")
</pallas_src>

<mosaic_0001>
module attributes {stable_mosaic.version = 11 : i64} {
  func.func @encoder_kernel(%arg0: i32, %arg1: memref<16x1xi32, #tpu.memory_space<vmem>>, %arg2: memref<32x32xf32, #tpu.memory_space<vmem>>, %arg3: memref<8x32xf32, #tpu.memory_space<vmem>>, %arg4: memref<2x32x96xf32, #tpu.memory_space<vmem>>, %arg5: memref<2x1x96xf32, #tpu.memory_space<vmem>>, %arg6: memref<2x32x32xf32, #tpu.memory_space<vmem>>, %arg7: memref<2x6x32xf32, #tpu.memory_space<vmem>>, %arg8: memref<2x32x128xf32, #tpu.memory_space<vmem>>, %arg9: memref<2x1x128xf32, #tpu.memory_space<vmem>>, %arg10: memref<2x128x32xf32, #tpu.memory_space<vmem>>, %arg11: memref<16x32xf32, #tpu.memory_space<vmem>>) attributes {dimension_semantics = [#tpu.dimension_semantics<arbitrary>], iteration_bounds = array<i64: 1>, scalar_prefetch = 0 : i64, scratch_operands = 0 : i64, tpu.core_type = #tpu.core_type<tc>, window_params = [{pipeline_mode = #tpu.pipeline_mode<synchronous>, transform_indices = @transform_0, window_bounds = array<i64: 16, 1>}, {pipeline_mode = #tpu.pipeline_mode<synchronous>, transform_indices = @transform_1, window_bounds = array<i64: 32, 32>}, {pipeline_mode = #tpu.pipeline_mode<synchronous>, transform_indices = @transform_2, window_bounds = array<i64: 8, 32>}, {pipeline_mode = #tpu.pipeline_mode<synchronous>, transform_indices = @transform_3, window_bounds = array<i64: 2, 32, 96>}, {pipeline_mode = #tpu.pipeline_mode<synchronous>, transform_indices = @transform_4, window_bounds = array<i64: 2, 1, 96>}, {pipeline_mode = #tpu.pipeline_mode<synchronous>, transform_indices = @transform_5, window_bounds = array<i64: 2, 32, 32>}, {pipeline_mode = #tpu.pipeline_mode<synchronous>, transform_indices = @transform_6, window_bounds = array<i64: 2, 6, 32>}, {pipeline_mode = #tpu.pipeline_mode<synchronous>, transform_indices = @transform_7, window_bounds = array<i64: 2, 32, 128>}, {pipeline_mode = #tpu.pipeline_mode<synchronous>, transform_indices = @transform_8, window_bounds = array<i64: 2, 1, 128>}, {pipeline_mode = #tpu.pipeline_mode<synchronous>, transform_indices = @transform_9, window_bounds = array<i64: 2, 128, 32>}, {pipeline_mode = #tpu.pipeline_mode<synchronous>, transform_indices = @transform_10, window_bounds = array<i64: 16, 32>}]} {
    %0 = tpu.iota {dimensions = array<i32: 1>} : vector<16x32xi32>
    %c0 = arith.constant 0 : index
    %c0_0 = arith.constant 0 : index
    %1 = vector.load %arg1[%c0, %c0_0] : memref<16x1xi32, #tpu.memory_space<vmem>>, vector<16x1xi32>
    %2 = vector.broadcast %1 : vector<16x1xi32> to vector<16x32xi32>
    %3 = arith.cmpi eq, %0, %2 : vector<16x32xi32>
    %4 = arith.extui %3 : vector<16x32xi1> to vector<16x32xi32>
    %5 = arith.sitofp %4 : vector<16x32xi32> to vector<16x32xf32>
    %c0_1 = arith.constant 0 : index
    %c0_2 = arith.constant 0 : index
    %6 = vector.load %arg2[%c0_1, %c0_2] : memref<32x32xf32, #tpu.memory_space<vmem>>, vector<32x32xf32>
    %cst = arith.constant dense<0.000000e+00> : vector<16x32xf32>
    %7 = tpu.matmul %5, %6, %cst {dimension_numbers = #tpu.dot_dimension_numbers<[1], [0], [0], [1], [0, 0, 1, 1], [], []>} : vector<16x32xf32>, vector<32x32xf32>, vector<16x32xf32> -> vector<16x32xf32>
    %c0_3 = arith.constant 0 : index
    %c0_4 = arith.constant 0 : index
    %8 = vector.load %arg3[%c0_3, %c0_4] : memref<8x32xf32, #tpu.memory_space<vmem>>, vector<8x32xf32>
    %9 = tpu.concatenate %8, %8 in 0 : vector<8x32xf32>, vector<8x32xf32> -> vector<16x32xf32>
    %10 = arith.addf %7, %9 : vector<16x32xf32>
    %c0_5 = arith.constant 0 : index
    %c0_6 = arith.constant 0 : index
    %c0_7 = arith.constant 0 : index
    %11 = vector.load %arg4[%c0_5, %c0_6, %c0_7] : memref<2x32x96xf32, #tpu.memory_space<vmem>>, vector<1x32x96xf32>
    %12 = vector.shape_cast %11 : vector<1x32x96xf32> to vector<32x96xf32>
    %c0_8 = arith.constant 0 : index
    %c0_9 = arith.constant 0 : index
    %c0_10 = arith.constant 0 : index
    %13 = vector.load %arg5[%c0_8, %c0_9, %c0_10] : memref<2x1x96xf32, #tpu.memory_space<vmem>>, vector<1x1x96xf32>
    %14 = vector.shape_cast %13 : vector<1x1x96xf32> to vector<1x96xf32>
    %c0_11 = arith.constant 0 : index
    %c0_12 = arith.constant 0 : index
    %c0_13 = arith.constant 0 : index
    %15 = vector.load %arg6[%c0_11, %c0_12, %c0_13] : memref<2x32x32xf32, #tpu.memory_space<vmem>>, vector<1x32x32xf32>
    %16 = vector.shape_cast %15 : vector<1x32x32xf32> to vector<32x32xf32>
    %c0_14 = arith.constant 0 : index
    %c0_15 = arith.constant 0 : index
    %c0_16 = arith.constant 0 : index
    %17 = vector.load %arg7[%c0_14, %c0_15, %c0_16] : memref<2x6x32xf32, #tpu.memory_space<vmem>>, vector<1x6x32xf32>
    %18 = vector.shape_cast %17 : vector<1x6x32xf32> to vector<6x32xf32>
    %19 = vector.extract_strided_slice %18 {offsets = [0, 0], sizes = [1, 32], strides = [1, 1]} : vector<6x32xf32> to vector<1x32xf32>
    %20 = vector.extract_strided_slice %18 {offsets = [1, 0], sizes = [1, 32], strides = [1, 1]} : vector<6x32xf32> to vector<1x32xf32>
    %21 = vector.extract_strided_slice %18 {offsets = [2, 0], sizes = [1, 32], strides = [1, 1]} : vector<6x32xf32> to vector<1x32xf32>
    %22 = vector.extract_strided_slice %18 {offsets = [3, 0], sizes = [1, 32], strides = [1, 1]} : vector<6x32xf32> to vector<1x32xf32>
    %23 = vector.extract_strided_slice %18 {offsets = [4, 0], sizes = [1, 32], strides = [1, 1]} : vector<6x32xf32> to vector<1x32xf32>
    %24 = vector.extract_strided_slice %18 {offsets = [5, 0], sizes = [1, 32], strides = [1, 1]} : vector<6x32xf32> to vector<1x32xf32>
    %c0_17 = arith.constant 0 : index
    %c0_18 = arith.constant 0 : index
    %c0_19 = arith.constant 0 : index
    %25 = vector.load %arg8[%c0_17, %c0_18, %c0_19] : memref<2x32x128xf32, #tpu.memory_space<vmem>>, vector<1x32x128xf32>
    %26 = vector.shape_cast %25 : vector<1x32x128xf32> to vector<32x128xf32>
    %c0_20 = arith.constant 0 : index
    %c0_21 = arith.constant 0 : index
    %c0_22 = arith.constant 0 : index
    %27 = vector.load %arg9[%c0_20, %c0_21, %c0_22] : memref<2x1x128xf32, #tpu.memory_space<vmem>>, vector<1x1x128xf32>
    %28 = vector.shape_cast %27 : vector<1x1x128xf32> to vector<1x128xf32>
    %c0_23 = arith.constant 0 : index
    %c0_24 = arith.constant 0 : index
    %c0_25 = arith.constant 0 : index
    %29 = vector.load %arg10[%c0_23, %c0_24, %c0_25] : memref<2x128x32xf32, #tpu.memory_space<vmem>>, vector<1x128x32xf32>
    %30 = vector.shape_cast %29 : vector<1x128x32xf32> to vector<128x32xf32>
    %cst_26 = arith.constant dense<0.000000e+00> : vector<16x96xf32>
    %31 = tpu.matmul %10, %12, %cst_26 {dimension_numbers = #tpu.dot_dimension_numbers<[1], [0], [0], [1], [0, 0, 1, 1], [], []>} : vector<16x32xf32>, vector<32x96xf32>, vector<16x96xf32> -> vector<16x96xf32>
    %32 = vector.broadcast %14 : vector<1x96xf32> to vector<16x96xf32>
    %33 = arith.addf %31, %32 : vector<16x96xf32>
    %34 = vector.extract_strided_slice %33 {offsets = [0, 0], sizes = [16, 32], strides = [1, 1]} : vector<16x96xf32> to vector<16x32xf32>
    %35 = vector.extract_strided_slice %33 {offsets = [0, 32], sizes = [16, 32], strides = [1, 1]} : vector<16x96xf32> to vector<16x32xf32>
    %36 = vector.extract_strided_slice %33 {offsets = [0, 64], sizes = [16, 32], strides = [1, 1]} : vector<16x96xf32> to vector<16x32xf32>
    %cst_27 = arith.constant 0.000000e+00 : f32
    %37 = vector.broadcast %cst_27 : f32 to vector<8x32xf32>
    %38 = vector.extract_strided_slice %34 {offsets = [0, 0], sizes = [8, 8], strides = [1, 1]} : vector<16x32xf32> to vector<8x8xf32>
    %39 = vector.extract_strided_slice %35 {offsets = [0, 0], sizes = [8, 8], strides = [1, 1]} : vector<16x32xf32> to vector<8x8xf32>
    %40 = vector.extract_strided_slice %36 {offsets = [0, 0], sizes = [8, 8], strides = [1, 1]} : vector<16x32xf32> to vector<8x8xf32>
    %cst_28 = arith.constant dense<0.000000e+00> : vector<8x8xf32>
    %41 = tpu.matmul %38, %39, %cst_28 {dimension_numbers = #tpu.dot_dimension_numbers<[1], [1], [0], [0], [0, 0, 1, 0], [], []>} : vector<8x8xf32>, vector<8x8xf32>, vector<8x8xf32> -> vector<8x8xf32>
    %cst_29 = arith.constant 0.353553385 : f32
    %42 = vector.broadcast %cst_29 : f32 to vector<8x8xf32>
    %43 = arith.mulf %41, %42 : vector<8x8xf32>
    %cst_30 = arith.constant dense<0xFF800000> : vector<8xf32>
    %44 = vector.multi_reduction <maximumf>, %43, %cst_30 [1] : vector<8x8xf32> to vector<8xf32>
    %45 = vector.shape_cast %44 : vector<8xf32> to vector<8x1xf32>
    %46 = vector.broadcast %45 : vector<8x1xf32> to vector<8x8xf32>
    %47 = arith.subf %43, %46 : vector<8x8xf32>
    %48 = math.exp %47 : vector<8x8xf32>
    %cst_31 = arith.constant dense<0.000000e+00> : vector<8xf32>
    %49 = vector.multi_reduction <add>, %48, %cst_31 [1] : vector<8x8xf32> to vector<8xf32>
    %50 = vector.shape_cast %49 : vector<8xf32> to vector<8x1xf32>
    %51 = tpu.reciprocal %50 {approx = true} : vector<8x1xf32> -> vector<8x1xf32>
    %52 = arith.mulf %50, %51 : vector<8x1xf32>
    %cst_32 = arith.constant 2.000000e+00 : f32
    %53 = vector.broadcast %cst_32 : f32 to vector<8x1xf32>
    %54 = arith.subf %53, %52 : vector<8x1xf32>
    %55 = arith.mulf %51, %54 : vector<8x1xf32>
    %56 = vector.broadcast %55 : vector<8x1xf32> to vector<8x8xf32>
    %57 = arith.mulf %48, %56 : vector<8x8xf32>
    %cst_33 = arith.constant dense<0.000000e+00> : vector<8x8xf32>
    %58 = tpu.matmul %57, %40, %cst_33 {dimension_numbers = #tpu.dot_dimension_numbers<[1], [0], [0], [1], [0, 0, 1, 1], [], []>} : vector<8x8xf32>, vector<8x8xf32>, vector<8x8xf32> -> vector<8x8xf32>
    %59 = vector.extract_strided_slice %16 {offsets = [0, 0], sizes = [8, 32], strides = [1, 1]} : vector<32x32xf32> to vector<8x32xf32>
    %cst_34 = arith.constant dense<0.000000e+00> : vector<8x32xf32>
    %60 = tpu.matmul %58, %59, %cst_34 {dimension_numbers = #tpu.dot_dimension_numbers<[1], [0], [0], [1], [0, 0, 1, 1], [], []>} : vector<8x8xf32>, vector<8x32xf32>, vector<8x32xf32> -> vector<8x32xf32>
    %61 = arith.addf %37, %60 : vector<8x32xf32>
    %62 = vector.extract_strided_slice %34 {offsets = [0, 8], sizes = [8, 8], strides = [1, 1]} : vector<16x32xf32> to vector<8x8xf32>
    %63 = vector.extract_strided_slice %35 {offsets = [0, 8], sizes = [8, 8], strides = [1, 1]} : vector<16x32xf32> to vector<8x8xf32>
    %64 = vector.extract_strided_slice %36 {offsets = [0, 8], sizes = [8, 8], strides = [1, 1]} : vector<16x32xf32> to vector<8x8xf32>
    %cst_35 = arith.constant dense<0.000000e+00> : vector<8x8xf32>
    %65 = tpu.matmul %62, %63, %cst_35 {dimension_numbers = #tpu.dot_dimension_numbers<[1], [1], [0], [0], [0, 0, 1, 0], [], []>} : vector<8x8xf32>, vector<8x8xf32>, vector<8x8xf32> -> vector<8x8xf32>
    %cst_36 = arith.constant 0.353553385 : f32
    %66 = vector.broadcast %cst_36 : f32 to vector<8x8xf32>
    %67 = arith.mulf %65, %66 : vector<8x8xf32>
    %cst_37 = arith.constant dense<0xFF800000> : vector<8xf32>
    %68 = vector.multi_reduction <maximumf>, %67, %cst_37 [1] : vector<8x8xf32> to vector<8xf32>
    %69 = vector.shape_cast %68 : vector<8xf32> to vector<8x1xf32>
    %70 = vector.broadcast %69 : vector<8x1xf32> to vector<8x8xf32>
    %71 = arith.subf %67, %70 : vector<8x8xf32>
    %72 = math.exp %71 : vector<8x8xf32>
    %cst_38 = arith.constant dense<0.000000e+00> : vector<8xf32>
    %73 = vector.multi_reduction <add>, %72, %cst_38 [1] : vector<8x8xf32> to vector<8xf32>
    %74 = vector.shape_cast %73 : vector<8xf32> to vector<8x1xf32>
    %75 = tpu.reciprocal %74 {approx = true} : vector<8x1xf32> -> vector<8x1xf32>
    %76 = arith.mulf %74, %75 : vector<8x1xf32>
    %cst_39 = arith.constant 2.000000e+00 : f32
    %77 = vector.broadcast %cst_39 : f32 to vector<8x1xf32>
    %78 = arith.subf %77, %76 : vector<8x1xf32>
    %79 = arith.mulf %75, %78 : vector<8x1xf32>
    %80 = vector.broadcast %79 : vector<8x1xf32> to vector<8x8xf32>
    %81 = arith.mulf %72, %80 : vector<8x8xf32>
    %cst_40 = arith.constant dense<0.000000e+00> : vector<8x8xf32>
    %82 = tpu.matmul %81, %64, %cst_40 {dimension_numbers = #tpu.dot_dimension_numbers<[1], [0], [0], [1], [0, 0, 1, 1], [], []>} : vector<8x8xf32>, vector<8x8xf32>, vector<8x8xf32> -> vector<8x8xf32>
    %83 = vector.extract_strided_slice %16 {offsets = [8, 0], sizes = [8, 32], strides = [1, 1]} : vector<32x32xf32> to vector<8x32xf32>
    %cst_41 = arith.constant dense<0.000000e+00> : vector<8x32xf32>
    %84 = tpu.matmul %82, %83, %cst_41 {dimension_numbers = #tpu.dot_dimension_numbers<[1], [0], [0], [1], [0, 0, 1, 1], [], []>} : vector<8x8xf32>, vector<8x32xf32>, vector<8x32xf32> -> vector<8x32xf32>
    %85 = arith.addf %61, %84 : vector<8x32xf32>
    %86 = vector.extract_strided_slice %34 {offsets = [0, 16], sizes = [8, 8], strides = [1, 1]} : vector<16x32xf32> to vector<8x8xf32>
    %87 = vector.extract_strided_slice %35 {offsets = [0, 16], sizes = [8, 8], strides = [1, 1]} : vector<16x32xf32> to vector<8x8xf32>
    %88 = vector.extract_strided_slice %36 {offsets = [0, 16], sizes = [8, 8], strides = [1, 1]} : vector<16x32xf32> to vector<8x8xf32>
    %cst_42 = arith.constant dense<0.000000e+00> : vector<8x8xf32>
    %89 = tpu.matmul %86, %87, %cst_42 {dimension_numbers = #tpu.dot_dimension_numbers<[1], [1], [0], [0], [0, 0, 1, 0], [], []>} : vector<8x8xf32>, vector<8x8xf32>, vector<8x8xf32> -> vector<8x8xf32>
    %cst_43 = arith.constant 0.353553385 : f32
    %90 = vector.broadcast %cst_43 : f32 to vector<8x8xf32>
    %91 = arith.mulf %89, %90 : vector<8x8xf32>
    %cst_44 = arith.constant dense<0xFF800000> : vector<8xf32>
    %92 = vector.multi_reduction <maximumf>, %91, %cst_44 [1] : vector<8x8xf32> to vector<8xf32>
    %93 = vector.shape_cast %92 : vector<8xf32> to vector<8x1xf32>
    %94 = vector.broadcast %93 : vector<8x1xf32> to vector<8x8xf32>
    %95 = arith.subf %91, %94 : vector<8x8xf32>
    %96 = math.exp %95 : vector<8x8xf32>
    %cst_45 = arith.constant dense<0.000000e+00> : vector<8xf32>
    %97 = vector.multi_reduction <add>, %96, %cst_45 [1] : vector<8x8xf32> to vector<8xf32>
    %98 = vector.shape_cast %97 : vector<8xf32> to vector<8x1xf32>
    %99 = tpu.reciprocal %98 {approx = true} : vector<8x1xf32> -> vector<8x1xf32>
    %100 = arith.mulf %98, %99 : vector<8x1xf32>
    %cst_46 = arith.constant 2.000000e+00 : f32
    %101 = vector.broadcast %cst_46 : f32 to vector<8x1xf32>
    %102 = arith.subf %101, %100 : vector<8x1xf32>
    %103 = arith.mulf %99, %102 : vector<8x1xf32>
    %104 = vector.broadcast %103 : vector<8x1xf32> to vector<8x8xf32>
    %105 = arith.mulf %96, %104 : vector<8x8xf32>
    %cst_47 = arith.constant dense<0.000000e+00> : vector<8x8xf32>
    %106 = tpu.matmul %105, %88, %cst_47 {dimension_numbers = #tpu.dot_dimension_numbers<[1], [0], [0], [1], [0, 0, 1, 1], [], []>} : vector<8x8xf32>, vector<8x8xf32>, vector<8x8xf32> -> vector<8x8xf32>
    %107 = vector.extract_strided_slice %16 {offsets = [16, 0], sizes = [8, 32], strides = [1, 1]} : vector<32x32xf32> to vector<8x32xf32>
    %cst_48 = arith.constant dense<0.000000e+00> : vector<8x32xf32>
    %108 = tpu.matmul %106, %107, %cst_48 {dimension_numbers = #tpu.dot_dimension_numbers<[1], [0], [0], [1], [0, 0, 1, 1], [], []>} : vector<8x8xf32>, vector<8x32xf32>, vector<8x32xf32> -> vector<8x32xf32>
    %109 = arith.addf %85, %108 : vector<8x32xf32>
    %110 = vector.extract_strided_slice %34 {offsets = [0, 24], sizes = [8, 8], strides = [1, 1]} : vector<16x32xf32> to vector<8x8xf32>
    %111 = vector.extract_strided_slice %35 {offsets = [0, 24], sizes = [8, 8], strides = [1, 1]} : vector<16x32xf32> to vector<8x8xf32>
    %112 = vector.extract_strided_slice %36 {offsets = [0, 24], sizes = [8, 8], strides = [1, 1]} : vector<16x32xf32> to vector<8x8xf32>
    %cst_49 = arith.constant dense<0.000000e+00> : vector<8x8xf32>
    %113 = tpu.matmul %110, %111, %cst_49 {dimension_numbers = #tpu.dot_dimension_numbers<[1], [1], [0], [0], [0, 0, 1, 0], [], []>} : vector<8x8xf32>, vector<8x8xf32>, vector<8x8xf32> -> vector<8x8xf32>
    %cst_50 = arith.constant 0.353553385 : f32
    %114 = vector.broadcast %cst_50 : f32 to vector<8x8xf32>
    %115 = arith.mulf %113, %114 : vector<8x8xf32>
    %cst_51 = arith.constant dense<0xFF800000> : vector<8xf32>
    %116 = vector.multi_reduction <maximumf>, %115, %cst_51 [1] : vector<8x8xf32> to vector<8xf32>
    %117 = vector.shape_cast %116 : vector<8xf32> to vector<8x1xf32>
    %118 = vector.broadcast %117 : vector<8x1xf32> to vector<8x8xf32>
    %119 = arith.subf %115, %118 : vector<8x8xf32>
    %120 = math.exp %119 : vector<8x8xf32>
    %cst_52 = arith.constant dense<0.000000e+00> : vector<8xf32>
    %121 = vector.multi_reduction <add>, %120, %cst_52 [1] : vector<8x8xf32> to vector<8xf32>
    %122 = vector.shape_cast %121 : vector<8xf32> to vector<8x1xf32>
    %123 = tpu.reciprocal %122 {approx = true} : vector<8x1xf32> -> vector<8x1xf32>
    %124 = arith.mulf %122, %123 : vector<8x1xf32>
    %cst_53 = arith.constant 2.000000e+00 : f32
    %125 = vector.broadcast %cst_53 : f32 to vector<8x1xf32>
    %126 = arith.subf %125, %124 : vector<8x1xf32>
    %127 = arith.mulf %123, %126 : vector<8x1xf32>
    %128 = vector.broadcast %127 : vector<8x1xf32> to vector<8x8xf32>
    %129 = arith.mulf %120, %128 : vector<8x8xf32>
    %cst_54 = arith.constant dense<0.000000e+00> : vector<8x8xf32>
    %130 = tpu.matmul %129, %112, %cst_54 {dimension_numbers = #tpu.dot_dimension_numbers<[1], [0], [0], [1], [0, 0, 1, 1], [], []>} : vector<8x8xf32>, vector<8x8xf32>, vector<8x8xf32> -> vector<8x8xf32>
    %131 = vector.extract_strided_slice %16 {offsets = [24, 0], sizes = [8, 32], strides = [1, 1]} : vector<32x32xf32> to vector<8x32xf32>
    %cst_55 = arith.constant dense<0.000000e+00> : vector<8x32xf32>
    %132 = tpu.matmul %130, %131, %cst_55 {dimension_numbers = #tpu.dot_dimension_numbers<[1], [0], [0], [1], [0, 0, 1, 1], [], []>} : vector<8x8xf32>, vector<8x32xf32>, vector<8x32xf32> -> vector<8x32xf32>
    %133 = arith.addf %109, %132 : vector<8x32xf32>
    %cst_56 = arith.constant 0.000000e+00 : f32
    %134 = vector.broadcast %cst_56 : f32 to vector<8x32xf32>
    %135 = vector.extract_strided_slice %34 {offsets = [8, 0], sizes = [8, 8], strides = [1, 1]} : vector<16x32xf32> to vector<8x8xf32>
    %136 = vector.extract_strided_slice %35 {offsets = [8, 0], sizes = [8, 8], strides = [1, 1]} : vector<16x32xf32> to vector<8x8xf32>
    %137 = vector.extract_strided_slice %36 {offsets = [8, 0], sizes = [8, 8], strides = [1, 1]} : vector<16x32xf32> to vector<8x8xf32>
    %cst_57 = arith.constant dense<0.000000e+00> : vector<8x8xf32>
    %138 = tpu.matmul %135, %136, %cst_57 {dimension_numbers = #tpu.dot_dimension_numbers<[1], [1], [0], [0], [0, 0, 1, 0], [], []>} : vector<8x8xf32>, vector<8x8xf32>, vector<8x8xf32> -> vector<8x8xf32>
    %cst_58 = arith.constant 0.353553385 : f32
    %139 = vector.broadcast %cst_58 : f32 to vector<8x8xf32>
    %140 = arith.mulf %138, %139 : vector<8x8xf32>
    %cst_59 = arith.constant dense<0xFF800000> : vector<8xf32>
    %141 = vector.multi_reduction <maximumf>, %140, %cst_59 [1] : vector<8x8xf32> to vector<8xf32>
    %142 = vector.shape_cast %141 : vector<8xf32> to vector<8x1xf32>
    %143 = vector.broadcast %142 : vector<8x1xf32> to vector<8x8xf32>
    %144 = arith.subf %140, %143 : vector<8x8xf32>
    %145 = math.exp %144 : vector<8x8xf32>
    %cst_60 = arith.constant dense<0.000000e+00> : vector<8xf32>
    %146 = vector.multi_reduction <add>, %145, %cst_60 [1] : vector<8x8xf32> to vector<8xf32>
    %147 = vector.shape_cast %146 : vector<8xf32> to vector<8x1xf32>
    %148 = tpu.reciprocal %147 {approx = true} : vector<8x1xf32> -> vector<8x1xf32>
    %149 = arith.mulf %147, %148 : vector<8x1xf32>
    %cst_61 = arith.constant 2.000000e+00 : f32
    %150 = vector.broadcast %cst_61 : f32 to vector<8x1xf32>
    %151 = arith.subf %150, %149 : vector<8x1xf32>
    %152 = arith.mulf %148, %151 : vector<8x1xf32>
    %153 = vector.broadcast %152 : vector<8x1xf32> to vector<8x8xf32>
    %154 = arith.mulf %145, %153 : vector<8x8xf32>
    %cst_62 = arith.constant dense<0.000000e+00> : vector<8x8xf32>
    %155 = tpu.matmul %154, %137, %cst_62 {dimension_numbers = #tpu.dot_dimension_numbers<[1], [0], [0], [1], [0, 0, 1, 1], [], []>} : vector<8x8xf32>, vector<8x8xf32>, vector<8x8xf32> -> vector<8x8xf32>
    %156 = vector.extract_strided_slice %16 {offsets = [0, 0], sizes = [8, 32], strides = [1, 1]} : vector<32x32xf32> to vector<8x32xf32>
    %cst_63 = arith.constant dense<0.000000e+00> : vector<8x32xf32>
    %157 = tpu.matmul %155, %156, %cst_63 {dimension_numbers = #tpu.dot_dimension_numbers<[1], [0], [0], [1], [0, 0, 1, 1], [], []>} : vector<8x8xf32>, vector<8x32xf32>, vector<8x32xf32> -> vector<8x32xf32>
    %158 = arith.addf %134, %157 : vector<8x32xf32>
    %159 = vector.extract_strided_slice %34 {offsets = [8, 8], sizes = [8, 8], strides = [1, 1]} : vector<16x32xf32> to vector<8x8xf32>
    %160 = vector.extract_strided_slice %35 {offsets = [8, 8], sizes = [8, 8], strides = [1, 1]} : vector<16x32xf32> to vector<8x8xf32>
    %161 = vector.extract_strided_slice %36 {offsets = [8, 8], sizes = [8, 8], strides = [1, 1]} : vector<16x32xf32> to vector<8x8xf32>
    %cst_64 = arith.constant dense<0.000000e+00> : vector<8x8xf32>
    %162 = tpu.matmul %159, %160, %cst_64 {dimension_numbers = #tpu.dot_dimension_numbers<[1], [1], [0], [0], [0, 0, 1, 0], [], []>} : vector<8x8xf32>, vector<8x8xf32>, vector<8x8xf32> -> vector<8x8xf32>
    %cst_65 = arith.constant 0.353553385 : f32
    %163 = vector.broadcast %cst_65 : f32 to vector<8x8xf32>
    %164 = arith.mulf %162, %163 : vector<8x8xf32>
    %cst_66 = arith.constant dense<0xFF800000> : vector<8xf32>
    %165 = vector.multi_reduction <maximumf>, %164, %cst_66 [1] : vector<8x8xf32> to vector<8xf32>
    %166 = vector.shape_cast %165 : vector<8xf32> to vector<8x1xf32>
    %167 = vector.broadcast %166 : vector<8x1xf32> to vector<8x8xf32>
    %168 = arith.subf %164, %167 : vector<8x8xf32>
    %169 = math.exp %168 : vector<8x8xf32>
    %cst_67 = arith.constant dense<0.000000e+00> : vector<8xf32>
    %170 = vector.multi_reduction <add>, %169, %cst_67 [1] : vector<8x8xf32> to vector<8xf32>
    %171 = vector.shape_cast %170 : vector<8xf32> to vector<8x1xf32>
    %172 = tpu.reciprocal %171 {approx = true} : vector<8x1xf32> -> vector<8x1xf32>
    %173 = arith.mulf %171, %172 : vector<8x1xf32>
    %cst_68 = arith.constant 2.000000e+00 : f32
    %174 = vector.broadcast %cst_68 : f32 to vector<8x1xf32>
    %175 = arith.subf %174, %173 : vector<8x1xf32>
    %176 = arith.mulf %172, %175 : vector<8x1xf32>
    %177 = vector.broadcast %176 : vector<8x1xf32> to vector<8x8xf32>
    %178 = arith.mulf %169, %177 : vector<8x8xf32>
    %cst_69 = arith.constant dense<0.000000e+00> : vector<8x8xf32>
    %179 = tpu.matmul %178, %161, %cst_69 {dimension_numbers = #tpu.dot_dimension_numbers<[1], [0], [0], [1], [0, 0, 1, 1], [], []>} : vector<8x8xf32>, vector<8x8xf32>, vector<8x8xf32> -> vector<8x8xf32>
    %180 = vector.extract_strided_slice %16 {offsets = [8, 0], sizes = [8, 32], strides = [1, 1]} : vector<32x32xf32> to vector<8x32xf32>
    %cst_70 = arith.constant dense<0.000000e+00> : vector<8x32xf32>
    %181 = tpu.matmul %179, %180, %cst_70 {dimension_numbers = #tpu.dot_dimension_numbers<[1], [0], [0], [1], [0, 0, 1, 1], [], []>} : vector<8x8xf32>, vector<8x32xf32>, vector<8x32xf32> -> vector<8x32xf32>
    %182 = arith.addf %158, %181 : vector<8x32xf32>
    %183 = vector.extract_strided_slice %34 {offsets = [8, 16], sizes = [8, 8], strides = [1, 1]} : vector<16x32xf32> to vector<8x8xf32>
    %184 = vector.extract_strided_slice %35 {offsets = [8, 16], sizes = [8, 8], strides = [1, 1]} : vector<16x32xf32> to vector<8x8xf32>
    %185 = vector.extract_strided_slice %36 {offsets = [8, 16], sizes = [8, 8], strides = [1, 1]} : vector<16x32xf32> to vector<8x8xf32>
    %cst_71 = arith.constant dense<0.000000e+00> : vector<8x8xf32>
    %186 = tpu.matmul %183, %184, %cst_71 {dimension_numbers = #tpu.dot_dimension_numbers<[1], [1], [0], [0], [0, 0, 1, 0], [], []>} : vector<8x8xf32>, vector<8x8xf32>, vector<8x8xf32> -> vector<8x8xf32>
    %cst_72 = arith.constant 0.353553385 : f32
    %187 = vector.broadcast %cst_72 : f32 to vector<8x8xf32>
    %188 = arith.mulf %186, %187 : vector<8x8xf32>
    %cst_73 = arith.constant dense<0xFF800000> : vector<8xf32>
    %189 = vector.multi_reduction <maximumf>, %188, %cst_73 [1] : vector<8x8xf32> to vector<8xf32>
    %190 = vector.shape_cast %189 : vector<8xf32> to vector<8x1xf32>
    %191 = vector.broadcast %190 : vector<8x1xf32> to vector<8x8xf32>
    %192 = arith.subf %188, %191 : vector<8x8xf32>
    %193 = math.exp %192 : vector<8x8xf32>
    %cst_74 = arith.constant dense<0.000000e+00> : vector<8xf32>
    %194 = vector.multi_reduction <add>, %193, %cst_74 [1] : vector<8x8xf32> to vector<8xf32>
    %195 = vector.shape_cast %194 : vector<8xf32> to vector<8x1xf32>
    %196 = tpu.reciprocal %195 {approx = true} : vector<8x1xf32> -> vector<8x1xf32>
    %197 = arith.mulf %195, %196 : vector<8x1xf32>
    %cst_75 = arith.constant 2.000000e+00 : f32
    %198 = vector.broadcast %cst_75 : f32 to vector<8x1xf32>
    %199 = arith.subf %198, %197 : vector<8x1xf32>
    %200 = arith.mulf %196, %199 : vector<8x1xf32>
    %201 = vector.broadcast %200 : vector<8x1xf32> to vector<8x8xf32>
    %202 = arith.mulf %193, %201 : vector<8x8xf32>
    %cst_76 = arith.constant dense<0.000000e+00> : vector<8x8xf32>
    %203 = tpu.matmul %202, %185, %cst_76 {dimension_numbers = #tpu.dot_dimension_numbers<[1], [0], [0], [1], [0, 0, 1, 1], [], []>} : vector<8x8xf32>, vector<8x8xf32>, vector<8x8xf32> -> vector<8x8xf32>
    %204 = vector.extract_strided_slice %16 {offsets = [16, 0], sizes = [8, 32], strides = [1, 1]} : vector<32x32xf32> to vector<8x32xf32>
    %cst_77 = arith.constant dense<0.000000e+00> : vector<8x32xf32>
    %205 = tpu.matmul %203, %204, %cst_77 {dimension_numbers = #tpu.dot_dimension_numbers<[1], [0], [0], [1], [0, 0, 1, 1], [], []>} : vector<8x8xf32>, vector<8x32xf32>, vector<8x32xf32> -> vector<8x32xf32>
    %206 = arith.addf %182, %205 : vector<8x32xf32>
    %207 = vector.extract_strided_slice %34 {offsets = [8, 24], sizes = [8, 8], strides = [1, 1]} : vector<16x32xf32> to vector<8x8xf32>
    %208 = vector.extract_strided_slice %35 {offsets = [8, 24], sizes = [8, 8], strides = [1, 1]} : vector<16x32xf32> to vector<8x8xf32>
    %209 = vector.extract_strided_slice %36 {offsets = [8, 24], sizes = [8, 8], strides = [1, 1]} : vector<16x32xf32> to vector<8x8xf32>
    %cst_78 = arith.constant dense<0.000000e+00> : vector<8x8xf32>
    %210 = tpu.matmul %207, %208, %cst_78 {dimension_numbers = #tpu.dot_dimension_numbers<[1], [1], [0], [0], [0, 0, 1, 0], [], []>} : vector<8x8xf32>, vector<8x8xf32>, vector<8x8xf32> -> vector<8x8xf32>
    %cst_79 = arith.constant 0.353553385 : f32
    %211 = vector.broadcast %cst_79 : f32 to vector<8x8xf32>
    %212 = arith.mulf %210, %211 : vector<8x8xf32>
    %cst_80 = arith.constant dense<0xFF800000> : vector<8xf32>
    %213 = vector.multi_reduction <maximumf>, %212, %cst_80 [1] : vector<8x8xf32> to vector<8xf32>
    %214 = vector.shape_cast %213 : vector<8xf32> to vector<8x1xf32>
    %215 = vector.broadcast %214 : vector<8x1xf32> to vector<8x8xf32>
    %216 = arith.subf %212, %215 : vector<8x8xf32>
    %217 = math.exp %216 : vector<8x8xf32>
    %cst_81 = arith.constant dense<0.000000e+00> : vector<8xf32>
    %218 = vector.multi_reduction <add>, %217, %cst_81 [1] : vector<8x8xf32> to vector<8xf32>
    %219 = vector.shape_cast %218 : vector<8xf32> to vector<8x1xf32>
    %220 = tpu.reciprocal %219 {approx = true} : vector<8x1xf32> -> vector<8x1xf32>
    %221 = arith.mulf %219, %220 : vector<8x1xf32>
    %cst_82 = arith.constant 2.000000e+00 : f32
    %222 = vector.broadcast %cst_82 : f32 to vector<8x1xf32>
    %223 = arith.subf %222, %221 : vector<8x1xf32>
    %224 = arith.mulf %220, %223 : vector<8x1xf32>
    %225 = vector.broadcast %224 : vector<8x1xf32> to vector<8x8xf32>
    %226 = arith.mulf %217, %225 : vector<8x8xf32>
    %cst_83 = arith.constant dense<0.000000e+00> : vector<8x8xf32>
    %227 = tpu.matmul %226, %209, %cst_83 {dimension_numbers = #tpu.dot_dimension_numbers<[1], [0], [0], [1], [0, 0, 1, 1], [], []>} : vector<8x8xf32>, vector<8x8xf32>, vector<8x8xf32> -> vector<8x8xf32>
    %228 = vector.extract_strided_slice %16 {offsets = [24, 0], sizes = [8, 32], strides = [1, 1]} : vector<32x32xf32> to vector<8x32xf32>
    %cst_84 = arith.constant dense<0.000000e+00> : vector<8x32xf32>
    %229 = tpu.matmul %227, %228, %cst_84 {dimension_numbers = #tpu.dot_dimension_numbers<[1], [0], [0], [1], [0, 0, 1, 1], [], []>} : vector<8x8xf32>, vector<8x32xf32>, vector<8x32xf32> -> vector<8x32xf32>
    %230 = arith.addf %206, %229 : vector<8x32xf32>
    %231 = tpu.concatenate %133, %230 in 0 : vector<8x32xf32>, vector<8x32xf32> -> vector<16x32xf32>
    %232 = vector.broadcast %19 : vector<1x32xf32> to vector<16x32xf32>
    %233 = arith.addf %231, %232 : vector<16x32xf32>
    %234 = arith.addf %233, %10 : vector<16x32xf32>
    %cst_85 = arith.constant dense<0.000000e+00> : vector<16xf32>
    %235 = vector.multi_reduction <add>, %234, %cst_85 [1] : vector<16x32xf32> to vector<16xf32>
    %236 = vector.shape_cast %235 : vector<16xf32> to vector<16x1xf32>
    %cst_86 = arith.constant 3.200000e+01 : f32
    %237 = vector.broadcast %cst_86 : f32 to vector<16x1xf32>
    %238 = arith.divf %236, %237 : vector<16x1xf32>
    %239 = vector.broadcast %238 : vector<16x1xf32> to vector<16x32xf32>
    %240 = arith.subf %234, %239 : vector<16x32xf32>
    %241 = arith.mulf %240, %240 : vector<16x32xf32>
    %cst_87 = arith.constant dense<0.000000e+00> : vector<16xf32>
    %242 = vector.multi_reduction <add>, %241, %cst_87 [1] : vector<16x32xf32> to vector<16xf32>
    %243 = vector.shape_cast %242 : vector<16xf32> to vector<16x1xf32>
    %cst_88 = arith.constant 3.200000e+01 : f32
    %244 = vector.broadcast %cst_88 : f32 to vector<16x1xf32>
    %245 = arith.divf %243, %244 : vector<16x1xf32>
    %246 = vector.broadcast %238 : vector<16x1xf32> to vector<16x32xf32>
    %247 = arith.subf %234, %246 : vector<16x32xf32>
    %cst_89 = arith.constant 9.99999974E-6 : f32
    %248 = vector.broadcast %cst_89 : f32 to vector<16x1xf32>
    %249 = arith.addf %245, %248 : vector<16x1xf32>
    %250 = math.rsqrt %249 : vector<16x1xf32>
    %251 = vector.broadcast %250 : vector<16x1xf32> to vector<16x32xf32>
    %252 = arith.mulf %247, %251 : vector<16x32xf32>
    %253 = vector.broadcast %20 : vector<1x32xf32> to vector<16x32xf32>
    %254 = arith.mulf %252, %253 : vector<16x32xf32>
    %255 = vector.broadcast %21 : vector<1x32xf32> to vector<16x32xf32>
    %256 = arith.addf %254, %255 : vector<16x32xf32>
    %cst_90 = arith.constant dense<0.000000e+00> : vector<16x128xf32>
    %257 = tpu.matmul %256, %26, %cst_90 {dimension_numbers = #tpu.dot_dimension_numbers<[1], [0], [0], [1], [0, 0, 1, 1], [], []>} : vector<16x32xf32>, vector<32x128xf32>, vector<16x128xf32> -> vector<16x128xf32>
    %258 = vector.broadcast %28 : vector<1x128xf32> to vector<16x128xf32>
    %259 = arith.addf %257, %258 : vector<16x128xf32>
    %cst_91 = arith.constant 0.000000e+00 : f32
    %260 = vector.broadcast %cst_91 : f32 to vector<16x128xf32>
    %261 = arith.maximumf %259, %260 : vector<16x128xf32>
    %cst_92 = arith.constant dense<0.000000e+00> : vector<16x32xf32>
    %262 = tpu.matmul %261, %30, %cst_92 {dimension_numbers = #tpu.dot_dimension_numbers<[1], [0], [0], [1], [0, 0, 1, 1], [], []>} : vector<16x128xf32>, vector<128x32xf32>, vector<16x32xf32> -> vector<16x32xf32>
    %263 = vector.broadcast %24 : vector<1x32xf32> to vector<16x32xf32>
    %264 = arith.addf %262, %263 : vector<16x32xf32>
    %265 = arith.addf %264, %256 : vector<16x32xf32>
    %cst_93 = arith.constant dense<0.000000e+00> : vector<16xf32>
    %266 = vector.multi_reduction <add>, %265, %cst_93 [1] : vector<16x32xf32> to vector<16xf32>
    %267 = vector.shape_cast %266 : vector<16xf32> to vector<16x1xf32>
    %cst_94 = arith.constant 3.200000e+01 : f32
    %268 = vector.broadcast %cst_94 : f32 to vector<16x1xf32>
    %269 = arith.divf %267, %268 : vector<16x1xf32>
    %270 = vector.broadcast %269 : vector<16x1xf32> to vector<16x32xf32>
    %271 = arith.subf %265, %270 : vector<16x32xf32>
    %272 = arith.mulf %271, %271 : vector<16x32xf32>
    %cst_95 = arith.constant dense<0.000000e+00> : vector<16xf32>
    %273 = vector.multi_reduction <add>, %272, %cst_95 [1] : vector<16x32xf32> to vector<16xf32>
    %274 = vector.shape_cast %273 : vector<16xf32> to vector<16x1xf32>
    %cst_96 = arith.constant 3.200000e+01 : f32
    %275 = vector.broadcast %cst_96 : f32 to vector<16x1xf32>
    %276 = arith.divf %274, %275 : vector<16x1xf32>
    %277 = vector.broadcast %269 : vector<16x1xf32> to vector<16x32xf32>
    %278 = arith.subf %265, %277 : vector<16x32xf32>
    %cst_97 = arith.constant 9.99999974E-6 : f32
    %279 = vector.broadcast %cst_97 : f32 to vector<16x1xf32>
    %280 = arith.addf %276, %279 : vector<16x1xf32>
    %281 = math.rsqrt %280 : vector<16x1xf32>
    %282 = vector.broadcast %281 : vector<16x1xf32> to vector<16x32xf32>
    %283 = arith.mulf %278, %282 : vector<16x32xf32>
    %284 = vector.broadcast %22 : vector<1x32xf32> to vector<16x32xf32>
    %285 = arith.mulf %283, %284 : vector<16x32xf32>
    %286 = vector.broadcast %23 : vector<1x32xf32> to vector<16x32xf32>
    %287 = arith.addf %285, %286 : vector<16x32xf32>
    %c1 = arith.constant 1 : index
    %c0_98 = arith.constant 0 : index
    %c0_99 = arith.constant 0 : index
    %288 = vector.load %arg4[%c1, %c0_98, %c0_99] : memref<2x32x96xf32, #tpu.memory_space<vmem>>, vector<1x32x96xf32>
    %289 = vector.shape_cast %288 : vector<1x32x96xf32> to vector<32x96xf32>
    %c1_100 = arith.constant 1 : index
    %c0_101 = arith.constant 0 : index
    %c0_102 = arith.constant 0 : index
    %290 = vector.load %arg5[%c1_100, %c0_101, %c0_102] : memref<2x1x96xf32, #tpu.memory_space<vmem>>, vector<1x1x96xf32>
    %291 = vector.shape_cast %290 : vector<1x1x96xf32> to vector<1x96xf32>
    %c1_103 = arith.constant 1 : index
    %c0_104 = arith.constant 0 : index
    %c0_105 = arith.constant 0 : index
    %292 = vector.load %arg6[%c1_103, %c0_104, %c0_105] : memref<2x32x32xf32, #tpu.memory_space<vmem>>, vector<1x32x32xf32>
    %293 = vector.shape_cast %292 : vector<1x32x32xf32> to vector<32x32xf32>
    %c1_106 = arith.constant 1 : index
    %c0_107 = arith.constant 0 : index
    %c0_108 = arith.constant 0 : index
    %294 = vector.load %arg7[%c1_106, %c0_107, %c0_108] : memref<2x6x32xf32, #tpu.memory_space<vmem>>, vector<1x6x32xf32>
    %295 = vector.shape_cast %294 : vector<1x6x32xf32> to vector<6x32xf32>
    %296 = vector.extract_strided_slice %295 {offsets = [0, 0], sizes = [1, 32], strides = [1, 1]} : vector<6x32xf32> to vector<1x32xf32>
    %297 = vector.extract_strided_slice %295 {offsets = [1, 0], sizes = [1, 32], strides = [1, 1]} : vector<6x32xf32> to vector<1x32xf32>
    %298 = vector.extract_strided_slice %295 {offsets = [2, 0], sizes = [1, 32], strides = [1, 1]} : vector<6x32xf32> to vector<1x32xf32>
    %299 = vector.extract_strided_slice %295 {offsets = [3, 0], sizes = [1, 32], strides = [1, 1]} : vector<6x32xf32> to vector<1x32xf32>
    %300 = vector.extract_strided_slice %295 {offsets = [4, 0], sizes = [1, 32], strides = [1, 1]} : vector<6x32xf32> to vector<1x32xf32>
    %301 = vector.extract_strided_slice %295 {offsets = [5, 0], sizes = [1, 32], strides = [1, 1]} : vector<6x32xf32> to vector<1x32xf32>
    %c1_109 = arith.constant 1 : index
    %c0_110 = arith.constant 0 : index
    %c0_111 = arith.constant 0 : index
    %302 = vector.load %arg8[%c1_109, %c0_110, %c0_111] : memref<2x32x128xf32, #tpu.memory_space<vmem>>, vector<1x32x128xf32>
    %303 = vector.shape_cast %302 : vector<1x32x128xf32> to vector<32x128xf32>
    %c1_112 = arith.constant 1 : index
    %c0_113 = arith.constant 0 : index
    %c0_114 = arith.constant 0 : index
    %304 = vector.load %arg9[%c1_112, %c0_113, %c0_114] : memref<2x1x128xf32, #tpu.memory_space<vmem>>, vector<1x1x128xf32>
    %305 = vector.shape_cast %304 : vector<1x1x128xf32> to vector<1x128xf32>
    %c1_115 = arith.constant 1 : index
    %c0_116 = arith.constant 0 : index
    %c0_117 = arith.constant 0 : index
    %306 = vector.load %arg10[%c1_115, %c0_116, %c0_117] : memref<2x128x32xf32, #tpu.memory_space<vmem>>, vector<1x128x32xf32>
    %307 = vector.shape_cast %306 : vector<1x128x32xf32> to vector<128x32xf32>
    %cst_118 = arith.constant dense<0.000000e+00> : vector<16x96xf32>
    %308 = tpu.matmul %287, %289, %cst_118 {dimension_numbers = #tpu.dot_dimension_numbers<[1], [0], [0], [1], [0, 0, 1, 1], [], []>} : vector<16x32xf32>, vector<32x96xf32>, vector<16x96xf32> -> vector<16x96xf32>
    %309 = vector.broadcast %291 : vector<1x96xf32> to vector<16x96xf32>
    %310 = arith.addf %308, %309 : vector<16x96xf32>
    %311 = vector.extract_strided_slice %310 {offsets = [0, 0], sizes = [16, 32], strides = [1, 1]} : vector<16x96xf32> to vector<16x32xf32>
    %312 = vector.extract_strided_slice %310 {offsets = [0, 32], sizes = [16, 32], strides = [1, 1]} : vector<16x96xf32> to vector<16x32xf32>
    %313 = vector.extract_strided_slice %310 {offsets = [0, 64], sizes = [16, 32], strides = [1, 1]} : vector<16x96xf32> to vector<16x32xf32>
    %cst_119 = arith.constant 0.000000e+00 : f32
    %314 = vector.broadcast %cst_119 : f32 to vector<8x32xf32>
    %315 = vector.extract_strided_slice %311 {offsets = [0, 0], sizes = [8, 8], strides = [1, 1]} : vector<16x32xf32> to vector<8x8xf32>
    %316 = vector.extract_strided_slice %312 {offsets = [0, 0], sizes = [8, 8], strides = [1, 1]} : vector<16x32xf32> to vector<8x8xf32>
    %317 = vector.extract_strided_slice %313 {offsets = [0, 0], sizes = [8, 8], strides = [1, 1]} : vector<16x32xf32> to vector<8x8xf32>
    %cst_120 = arith.constant dense<0.000000e+00> : vector<8x8xf32>
    %318 = tpu.matmul %315, %316, %cst_120 {dimension_numbers = #tpu.dot_dimension_numbers<[1], [1], [0], [0], [0, 0, 1, 0], [], []>} : vector<8x8xf32>, vector<8x8xf32>, vector<8x8xf32> -> vector<8x8xf32>
    %cst_121 = arith.constant 0.353553385 : f32
    %319 = vector.broadcast %cst_121 : f32 to vector<8x8xf32>
    %320 = arith.mulf %318, %319 : vector<8x8xf32>
    %cst_122 = arith.constant dense<0xFF800000> : vector<8xf32>
    %321 = vector.multi_reduction <maximumf>, %320, %cst_122 [1] : vector<8x8xf32> to vector<8xf32>
    %322 = vector.shape_cast %321 : vector<8xf32> to vector<8x1xf32>
    %323 = vector.broadcast %322 : vector<8x1xf32> to vector<8x8xf32>
    %324 = arith.subf %320, %323 : vector<8x8xf32>
    %325 = math.exp %324 : vector<8x8xf32>
    %cst_123 = arith.constant dense<0.000000e+00> : vector<8xf32>
    %326 = vector.multi_reduction <add>, %325, %cst_123 [1] : vector<8x8xf32> to vector<8xf32>
    %327 = vector.shape_cast %326 : vector<8xf32> to vector<8x1xf32>
    %328 = tpu.reciprocal %327 {approx = true} : vector<8x1xf32> -> vector<8x1xf32>
    %329 = arith.mulf %327, %328 : vector<8x1xf32>
    %cst_124 = arith.constant 2.000000e+00 : f32
    %330 = vector.broadcast %cst_124 : f32 to vector<8x1xf32>
    %331 = arith.subf %330, %329 : vector<8x1xf32>
    %332 = arith.mulf %328, %331 : vector<8x1xf32>
    %333 = vector.broadcast %332 : vector<8x1xf32> to vector<8x8xf32>
    %334 = arith.mulf %325, %333 : vector<8x8xf32>
    %cst_125 = arith.constant dense<0.000000e+00> : vector<8x8xf32>
    %335 = tpu.matmul %334, %317, %cst_125 {dimension_numbers = #tpu.dot_dimension_numbers<[1], [0], [0], [1], [0, 0, 1, 1], [], []>} : vector<8x8xf32>, vector<8x8xf32>, vector<8x8xf32> -> vector<8x8xf32>
    %336 = vector.extract_strided_slice %293 {offsets = [0, 0], sizes = [8, 32], strides = [1, 1]} : vector<32x32xf32> to vector<8x32xf32>
    %cst_126 = arith.constant dense<0.000000e+00> : vector<8x32xf32>
    %337 = tpu.matmul %335, %336, %cst_126 {dimension_numbers = #tpu.dot_dimension_numbers<[1], [0], [0], [1], [0, 0, 1, 1], [], []>} : vector<8x8xf32>, vector<8x32xf32>, vector<8x32xf32> -> vector<8x32xf32>
    %338 = arith.addf %314, %337 : vector<8x32xf32>
    %339 = vector.extract_strided_slice %311 {offsets = [0, 8], sizes = [8, 8], strides = [1, 1]} : vector<16x32xf32> to vector<8x8xf32>
    %340 = vector.extract_strided_slice %312 {offsets = [0, 8], sizes = [8, 8], strides = [1, 1]} : vector<16x32xf32> to vector<8x8xf32>
    %341 = vector.extract_strided_slice %313 {offsets = [0, 8], sizes = [8, 8], strides = [1, 1]} : vector<16x32xf32> to vector<8x8xf32>
    %cst_127 = arith.constant dense<0.000000e+00> : vector<8x8xf32>
    %342 = tpu.matmul %339, %340, %cst_127 {dimension_numbers = #tpu.dot_dimension_numbers<[1], [1], [0], [0], [0, 0, 1, 0], [], []>} : vector<8x8xf32>, vector<8x8xf32>, vector<8x8xf32> -> vector<8x8xf32>
    %cst_128 = arith.constant 0.353553385 : f32
    %343 = vector.broadcast %cst_128 : f32 to vector<8x8xf32>
    %344 = arith.mulf %342, %343 : vector<8x8xf32>
    %cst_129 = arith.constant dense<0xFF800000> : vector<8xf32>
    %345 = vector.multi_reduction <maximumf>, %344, %cst_129 [1] : vector<8x8xf32> to vector<8xf32>
    %346 = vector.shape_cast %345 : vector<8xf32> to vector<8x1xf32>
    %347 = vector.broadcast %346 : vector<8x1xf32> to vector<8x8xf32>
    %348 = arith.subf %344, %347 : vector<8x8xf32>
    %349 = math.exp %348 : vector<8x8xf32>
    %cst_130 = arith.constant dense<0.000000e+00> : vector<8xf32>
    %350 = vector.multi_reduction <add>, %349, %cst_130 [1] : vector<8x8xf32> to vector<8xf32>
    %351 = vector.shape_cast %350 : vector<8xf32> to vector<8x1xf32>
    %352 = tpu.reciprocal %351 {approx = true} : vector<8x1xf32> -> vector<8x1xf32>
    %353 = arith.mulf %351, %352 : vector<8x1xf32>
    %cst_131 = arith.constant 2.000000e+00 : f32
    %354 = vector.broadcast %cst_131 : f32 to vector<8x1xf32>
    %355 = arith.subf %354, %353 : vector<8x1xf32>
    %356 = arith.mulf %352, %355 : vector<8x1xf32>
    %357 = vector.broadcast %356 : vector<8x1xf32> to vector<8x8xf32>
    %358 = arith.mulf %349, %357 : vector<8x8xf32>
    %cst_132 = arith.constant dense<0.000000e+00> : vector<8x8xf32>
    %359 = tpu.matmul %358, %341, %cst_132 {dimension_numbers = #tpu.dot_dimension_numbers<[1], [0], [0], [1], [0, 0, 1, 1], [], []>} : vector<8x8xf32>, vector<8x8xf32>, vector<8x8xf32> -> vector<8x8xf32>
    %360 = vector.extract_strided_slice %293 {offsets = [8, 0], sizes = [8, 32], strides = [1, 1]} : vector<32x32xf32> to vector<8x32xf32>
    %cst_133 = arith.constant dense<0.000000e+00> : vector<8x32xf32>
    %361 = tpu.matmul %359, %360, %cst_133 {dimension_numbers = #tpu.dot_dimension_numbers<[1], [0], [0], [1], [0, 0, 1, 1], [], []>} : vector<8x8xf32>, vector<8x32xf32>, vector<8x32xf32> -> vector<8x32xf32>
    %362 = arith.addf %338, %361 : vector<8x32xf32>
    %363 = vector.extract_strided_slice %311 {offsets = [0, 16], sizes = [8, 8], strides = [1, 1]} : vector<16x32xf32> to vector<8x8xf32>
    %364 = vector.extract_strided_slice %312 {offsets = [0, 16], sizes = [8, 8], strides = [1, 1]} : vector<16x32xf32> to vector<8x8xf32>
    %365 = vector.extract_strided_slice %313 {offsets = [0, 16], sizes = [8, 8], strides = [1, 1]} : vector<16x32xf32> to vector<8x8xf32>
    %cst_134 = arith.constant dense<0.000000e+00> : vector<8x8xf32>
    %366 = tpu.matmul %363, %364, %cst_134 {dimension_numbers = #tpu.dot_dimension_numbers<[1], [1], [0], [0], [0, 0, 1, 0], [], []>} : vector<8x8xf32>, vector<8x8xf32>, vector<8x8xf32> -> vector<8x8xf32>
    %cst_135 = arith.constant 0.353553385 : f32
    %367 = vector.broadcast %cst_135 : f32 to vector<8x8xf32>
    %368 = arith.mulf %366, %367 : vector<8x8xf32>
    %cst_136 = arith.constant dense<0xFF800000> : vector<8xf32>
    %369 = vector.multi_reduction <maximumf>, %368, %cst_136 [1] : vector<8x8xf32> to vector<8xf32>
    %370 = vector.shape_cast %369 : vector<8xf32> to vector<8x1xf32>
    %371 = vector.broadcast %370 : vector<8x1xf32> to vector<8x8xf32>
    %372 = arith.subf %368, %371 : vector<8x8xf32>
    %373 = math.exp %372 : vector<8x8xf32>
    %cst_137 = arith.constant dense<0.000000e+00> : vector<8xf32>
    %374 = vector.multi_reduction <add>, %373, %cst_137 [1] : vector<8x8xf32> to vector<8xf32>
    %375 = vector.shape_cast %374 : vector<8xf32> to vector<8x1xf32>
    %376 = tpu.reciprocal %375 {approx = true} : vector<8x1xf32> -> vector<8x1xf32>
    %377 = arith.mulf %375, %376 : vector<8x1xf32>
    %cst_138 = arith.constant 2.000000e+00 : f32
    %378 = vector.broadcast %cst_138 : f32 to vector<8x1xf32>
    %379 = arith.subf %378, %377 : vector<8x1xf32>
    %380 = arith.mulf %376, %379 : vector<8x1xf32>
    %381 = vector.broadcast %380 : vector<8x1xf32> to vector<8x8xf32>
    %382 = arith.mulf %373, %381 : vector<8x8xf32>
    %cst_139 = arith.constant dense<0.000000e+00> : vector<8x8xf32>
    %383 = tpu.matmul %382, %365, %cst_139 {dimension_numbers = #tpu.dot_dimension_numbers<[1], [0], [0], [1], [0, 0, 1, 1], [], []>} : vector<8x8xf32>, vector<8x8xf32>, vector<8x8xf32> -> vector<8x8xf32>
    %384 = vector.extract_strided_slice %293 {offsets = [16, 0], sizes = [8, 32], strides = [1, 1]} : vector<32x32xf32> to vector<8x32xf32>
    %cst_140 = arith.constant dense<0.000000e+00> : vector<8x32xf32>
    %385 = tpu.matmul %383, %384, %cst_140 {dimension_numbers = #tpu.dot_dimension_numbers<[1], [0], [0], [1], [0, 0, 1, 1], [], []>} : vector<8x8xf32>, vector<8x32xf32>, vector<8x32xf32> -> vector<8x32xf32>
    %386 = arith.addf %362, %385 : vector<8x32xf32>
    %387 = vector.extract_strided_slice %311 {offsets = [0, 24], sizes = [8, 8], strides = [1, 1]} : vector<16x32xf32> to vector<8x8xf32>
    %388 = vector.extract_strided_slice %312 {offsets = [0, 24], sizes = [8, 8], strides = [1, 1]} : vector<16x32xf32> to vector<8x8xf32>
    %389 = vector.extract_strided_slice %313 {offsets = [0, 24], sizes = [8, 8], strides = [1, 1]} : vector<16x32xf32> to vector<8x8xf32>
    %cst_141 = arith.constant dense<0.000000e+00> : vector<8x8xf32>
    %390 = tpu.matmul %387, %388, %cst_141 {dimension_numbers = #tpu.dot_dimension_numbers<[1], [1], [0], [0], [0, 0, 1, 0], [], []>} : vector<8x8xf32>, vector<8x8xf32>, vector<8x8xf32> -> vector<8x8xf32>
    %cst_142 = arith.constant 0.353553385 : f32
    %391 = vector.broadcast %cst_142 : f32 to vector<8x8xf32>
    %392 = arith.mulf %390, %391 : vector<8x8xf32>
    %cst_143 = arith.constant dense<0xFF800000> : vector<8xf32>
    %393 = vector.multi_reduction <maximumf>, %392, %cst_143 [1] : vector<8x8xf32> to vector<8xf32>
    %394 = vector.shape_cast %393 : vector<8xf32> to vector<8x1xf32>
    %395 = vector.broadcast %394 : vector<8x1xf32> to vector<8x8xf32>
    %396 = arith.subf %392, %395 : vector<8x8xf32>
    %397 = math.exp %396 : vector<8x8xf32>
    %cst_144 = arith.constant dense<0.000000e+00> : vector<8xf32>
    %398 = vector.multi_reduction <add>, %397, %cst_144 [1] : vector<8x8xf32> to vector<8xf32>
    %399 = vector.shape_cast %398 : vector<8xf32> to vector<8x1xf32>
    %400 = tpu.reciprocal %399 {approx = true} : vector<8x1xf32> -> vector<8x1xf32>
    %401 = arith.mulf %399, %400 : vector<8x1xf32>
    %cst_145 = arith.constant 2.000000e+00 : f32
    %402 = vector.broadcast %cst_145 : f32 to vector<8x1xf32>
    %403 = arith.subf %402, %401 : vector<8x1xf32>
    %404 = arith.mulf %400, %403 : vector<8x1xf32>
    %405 = vector.broadcast %404 : vector<8x1xf32> to vector<8x8xf32>
    %406 = arith.mulf %397, %405 : vector<8x8xf32>
    %cst_146 = arith.constant dense<0.000000e+00> : vector<8x8xf32>
    %407 = tpu.matmul %406, %389, %cst_146 {dimension_numbers = #tpu.dot_dimension_numbers<[1], [0], [0], [1], [0, 0, 1, 1], [], []>} : vector<8x8xf32>, vector<8x8xf32>, vector<8x8xf32> -> vector<8x8xf32>
    %408 = vector.extract_strided_slice %293 {offsets = [24, 0], sizes = [8, 32], strides = [1, 1]} : vector<32x32xf32> to vector<8x32xf32>
    %cst_147 = arith.constant dense<0.000000e+00> : vector<8x32xf32>
    %409 = tpu.matmul %407, %408, %cst_147 {dimension_numbers = #tpu.dot_dimension_numbers<[1], [0], [0], [1], [0, 0, 1, 1], [], []>} : vector<8x8xf32>, vector<8x32xf32>, vector<8x32xf32> -> vector<8x32xf32>
    %410 = arith.addf %386, %409 : vector<8x32xf32>
    %cst_148 = arith.constant 0.000000e+00 : f32
    %411 = vector.broadcast %cst_148 : f32 to vector<8x32xf32>
    %412 = vector.extract_strided_slice %311 {offsets = [8, 0], sizes = [8, 8], strides = [1, 1]} : vector<16x32xf32> to vector<8x8xf32>
    %413 = vector.extract_strided_slice %312 {offsets = [8, 0], sizes = [8, 8], strides = [1, 1]} : vector<16x32xf32> to vector<8x8xf32>
    %414 = vector.extract_strided_slice %313 {offsets = [8, 0], sizes = [8, 8], strides = [1, 1]} : vector<16x32xf32> to vector<8x8xf32>
    %cst_149 = arith.constant dense<0.000000e+00> : vector<8x8xf32>
    %415 = tpu.matmul %412, %413, %cst_149 {dimension_numbers = #tpu.dot_dimension_numbers<[1], [1], [0], [0], [0, 0, 1, 0], [], []>} : vector<8x8xf32>, vector<8x8xf32>, vector<8x8xf32> -> vector<8x8xf32>
    %cst_150 = arith.constant 0.353553385 : f32
    %416 = vector.broadcast %cst_150 : f32 to vector<8x8xf32>
    %417 = arith.mulf %415, %416 : vector<8x8xf32>
    %cst_151 = arith.constant dense<0xFF800000> : vector<8xf32>
    %418 = vector.multi_reduction <maximumf>, %417, %cst_151 [1] : vector<8x8xf32> to vector<8xf32>
    %419 = vector.shape_cast %418 : vector<8xf32> to vector<8x1xf32>
    %420 = vector.broadcast %419 : vector<8x1xf32> to vector<8x8xf32>
    %421 = arith.subf %417, %420 : vector<8x8xf32>
    %422 = math.exp %421 : vector<8x8xf32>
    %cst_152 = arith.constant dense<0.000000e+00> : vector<8xf32>
    %423 = vector.multi_reduction <add>, %422, %cst_152 [1] : vector<8x8xf32> to vector<8xf32>
    %424 = vector.shape_cast %423 : vector<8xf32> to vector<8x1xf32>
    %425 = tpu.reciprocal %424 {approx = true} : vector<8x1xf32> -> vector<8x1xf32>
    %426 = arith.mulf %424, %425 : vector<8x1xf32>
    %cst_153 = arith.constant 2.000000e+00 : f32
    %427 = vector.broadcast %cst_153 : f32 to vector<8x1xf32>
    %428 = arith.subf %427, %426 : vector<8x1xf32>
    %429 = arith.mulf %425, %428 : vector<8x1xf32>
    %430 = vector.broadcast %429 : vector<8x1xf32> to vector<8x8xf32>
    %431 = arith.mulf %422, %430 : vector<8x8xf32>
    %cst_154 = arith.constant dense<0.000000e+00> : vector<8x8xf32>
    %432 = tpu.matmul %431, %414, %cst_154 {dimension_numbers = #tpu.dot_dimension_numbers<[1], [0], [0], [1], [0, 0, 1, 1], [], []>} : vector<8x8xf32>, vector<8x8xf32>, vector<8x8xf32> -> vector<8x8xf32>
    %433 = vector.extract_strided_slice %293 {offsets = [0, 0], sizes = [8, 32], strides = [1, 1]} : vector<32x32xf32> to vector<8x32xf32>
    %cst_155 = arith.constant dense<0.000000e+00> : vector<8x32xf32>
    %434 = tpu.matmul %432, %433, %cst_155 {dimension_numbers = #tpu.dot_dimension_numbers<[1], [0], [0], [1], [0, 0, 1, 1], [], []>} : vector<8x8xf32>, vector<8x32xf32>, vector<8x32xf32> -> vector<8x32xf32>
    %435 = arith.addf %411, %434 : vector<8x32xf32>
    %436 = vector.extract_strided_slice %311 {offsets = [8, 8], sizes = [8, 8], strides = [1, 1]} : vector<16x32xf32> to vector<8x8xf32>
    %437 = vector.extract_strided_slice %312 {offsets = [8, 8], sizes = [8, 8], strides = [1, 1]} : vector<16x32xf32> to vector<8x8xf32>
    %438 = vector.extract_strided_slice %313 {offsets = [8, 8], sizes = [8, 8], strides = [1, 1]} : vector<16x32xf32> to vector<8x8xf32>
    %cst_156 = arith.constant dense<0.000000e+00> : vector<8x8xf32>
    %439 = tpu.matmul %436, %437, %cst_156 {dimension_numbers = #tpu.dot_dimension_numbers<[1], [1], [0], [0], [0, 0, 1, 0], [], []>} : vector<8x8xf32>, vector<8x8xf32>, vector<8x8xf32> -> vector<8x8xf32>
    %cst_157 = arith.constant 0.353553385 : f32
    %440 = vector.broadcast %cst_157 : f32 to vector<8x8xf32>
    %441 = arith.mulf %439, %440 : vector<8x8xf32>
    %cst_158 = arith.constant dense<0xFF800000> : vector<8xf32>
    %442 = vector.multi_reduction <maximumf>, %441, %cst_158 [1] : vector<8x8xf32> to vector<8xf32>
    %443 = vector.shape_cast %442 : vector<8xf32> to vector<8x1xf32>
    %444 = vector.broadcast %443 : vector<8x1xf32> to vector<8x8xf32>
    %445 = arith.subf %441, %444 : vector<8x8xf32>
    %446 = math.exp %445 : vector<8x8xf32>
    %cst_159 = arith.constant dense<0.000000e+00> : vector<8xf32>
    %447 = vector.multi_reduction <add>, %446, %cst_159 [1] : vector<8x8xf32> to vector<8xf32>
    %448 = vector.shape_cast %447 : vector<8xf32> to vector<8x1xf32>
    %449 = tpu.reciprocal %448 {approx = true} : vector<8x1xf32> -> vector<8x1xf32>
    %450 = arith.mulf %448, %449 : vector<8x1xf32>
    %cst_160 = arith.constant 2.000000e+00 : f32
    %451 = vector.broadcast %cst_160 : f32 to vector<8x1xf32>
    %452 = arith.subf %451, %450 : vector<8x1xf32>
    %453 = arith.mulf %449, %452 : vector<8x1xf32>
    %454 = vector.broadcast %453 : vector<8x1xf32> to vector<8x8xf32>
    %455 = arith.mulf %446, %454 : vector<8x8xf32>
    %cst_161 = arith.constant dense<0.000000e+00> : vector<8x8xf32>
    %456 = tpu.matmul %455, %438, %cst_161 {dimension_numbers = #tpu.dot_dimension_numbers<[1], [0], [0], [1], [0, 0, 1, 1], [], []>} : vector<8x8xf32>, vector<8x8xf32>, vector<8x8xf32> -> vector<8x8xf32>
    %457 = vector.extract_strided_slice %293 {offsets = [8, 0], sizes = [8, 32], strides = [1, 1]} : vector<32x32xf32> to vector<8x32xf32>
    %cst_162 = arith.constant dense<0.000000e+00> : vector<8x32xf32>
    %458 = tpu.matmul %456, %457, %cst_162 {dimension_numbers = #tpu.dot_dimension_numbers<[1], [0], [0], [1], [0, 0, 1, 1], [], []>} : vector<8x8xf32>, vector<8x32xf32>, vector<8x32xf32> -> vector<8x32xf32>
    %459 = arith.addf %435, %458 : vector<8x32xf32>
    %460 = vector.extract_strided_slice %311 {offsets = [8, 16], sizes = [8, 8], strides = [1, 1]} : vector<16x32xf32> to vector<8x8xf32>
    %461 = vector.extract_strided_slice %312 {offsets = [8, 16], sizes = [8, 8], strides = [1, 1]} : vector<16x32xf32> to vector<8x8xf32>
    %462 = vector.extract_strided_slice %313 {offsets = [8, 16], sizes = [8, 8], strides = [1, 1]} : vector<16x32xf32> to vector<8x8xf32>
    %cst_163 = arith.constant dense<0.000000e+00> : vector<8x8xf32>
    %463 = tpu.matmul %460, %461, %cst_163 {dimension_numbers = #tpu.dot_dimension_numbers<[1], [1], [0], [0], [0, 0, 1, 0], [], []>} : vector<8x8xf32>, vector<8x8xf32>, vector<8x8xf32> -> vector<8x8xf32>
    %cst_164 = arith.constant 0.353553385 : f32
    %464 = vector.broadcast %cst_164 : f32 to vector<8x8xf32>
    %465 = arith.mulf %463, %464 : vector<8x8xf32>
    %cst_165 = arith.constant dense<0xFF800000> : vector<8xf32>
    %466 = vector.multi_reduction <maximumf>, %465, %cst_165 [1] : vector<8x8xf32> to vector<8xf32>
    %467 = vector.shape_cast %466 : vector<8xf32> to vector<8x1xf32>
    %468 = vector.broadcast %467 : vector<8x1xf32> to vector<8x8xf32>
    %469 = arith.subf %465, %468 : vector<8x8xf32>
    %470 = math.exp %469 : vector<8x8xf32>
    %cst_166 = arith.constant dense<0.000000e+00> : vector<8xf32>
    %471 = vector.multi_reduction <add>, %470, %cst_166 [1] : vector<8x8xf32> to vector<8xf32>
    %472 = vector.shape_cast %471 : vector<8xf32> to vector<8x1xf32>
    %473 = tpu.reciprocal %472 {approx = true} : vector<8x1xf32> -> vector<8x1xf32>
    %474 = arith.mulf %472, %473 : vector<8x1xf32>
    %cst_167 = arith.constant 2.000000e+00 : f32
    %475 = vector.broadcast %cst_167 : f32 to vector<8x1xf32>
    %476 = arith.subf %475, %474 : vector<8x1xf32>
    %477 = arith.mulf %473, %476 : vector<8x1xf32>
    %478 = vector.broadcast %477 : vector<8x1xf32> to vector<8x8xf32>
    %479 = arith.mulf %470, %478 : vector<8x8xf32>
    %cst_168 = arith.constant dense<0.000000e+00> : vector<8x8xf32>
    %480 = tpu.matmul %479, %462, %cst_168 {dimension_numbers = #tpu.dot_dimension_numbers<[1], [0], [0], [1], [0, 0, 1, 1], [], []>} : vector<8x8xf32>, vector<8x8xf32>, vector<8x8xf32> -> vector<8x8xf32>
    %481 = vector.extract_strided_slice %293 {offsets = [16, 0], sizes = [8, 32], strides = [1, 1]} : vector<32x32xf32> to vector<8x32xf32>
    %cst_169 = arith.constant dense<0.000000e+00> : vector<8x32xf32>
    %482 = tpu.matmul %480, %481, %cst_169 {dimension_numbers = #tpu.dot_dimension_numbers<[1], [0], [0], [1], [0, 0, 1, 1], [], []>} : vector<8x8xf32>, vector<8x32xf32>, vector<8x32xf32> -> vector<8x32xf32>
    %483 = arith.addf %459, %482 : vector<8x32xf32>
    %484 = vector.extract_strided_slice %311 {offsets = [8, 24], sizes = [8, 8], strides = [1, 1]} : vector<16x32xf32> to vector<8x8xf32>
    %485 = vector.extract_strided_slice %312 {offsets = [8, 24], sizes = [8, 8], strides = [1, 1]} : vector<16x32xf32> to vector<8x8xf32>
    %486 = vector.extract_strided_slice %313 {offsets = [8, 24], sizes = [8, 8], strides = [1, 1]} : vector<16x32xf32> to vector<8x8xf32>
    %cst_170 = arith.constant dense<0.000000e+00> : vector<8x8xf32>
    %487 = tpu.matmul %484, %485, %cst_170 {dimension_numbers = #tpu.dot_dimension_numbers<[1], [1], [0], [0], [0, 0, 1, 0], [], []>} : vector<8x8xf32>, vector<8x8xf32>, vector<8x8xf32> -> vector<8x8xf32>
    %cst_171 = arith.constant 0.353553385 : f32
    %488 = vector.broadcast %cst_171 : f32 to vector<8x8xf32>
    %489 = arith.mulf %487, %488 : vector<8x8xf32>
    %cst_172 = arith.constant dense<0xFF800000> : vector<8xf32>
    %490 = vector.multi_reduction <maximumf>, %489, %cst_172 [1] : vector<8x8xf32> to vector<8xf32>
    %491 = vector.shape_cast %490 : vector<8xf32> to vector<8x1xf32>
    %492 = vector.broadcast %491 : vector<8x1xf32> to vector<8x8xf32>
    %493 = arith.subf %489, %492 : vector<8x8xf32>
    %494 = math.exp %493 : vector<8x8xf32>
    %cst_173 = arith.constant dense<0.000000e+00> : vector<8xf32>
    %495 = vector.multi_reduction <add>, %494, %cst_173 [1] : vector<8x8xf32> to vector<8xf32>
    %496 = vector.shape_cast %495 : vector<8xf32> to vector<8x1xf32>
    %497 = tpu.reciprocal %496 {approx = true} : vector<8x1xf32> -> vector<8x1xf32>
    %498 = arith.mulf %496, %497 : vector<8x1xf32>
    %cst_174 = arith.constant 2.000000e+00 : f32
    %499 = vector.broadcast %cst_174 : f32 to vector<8x1xf32>
    %500 = arith.subf %499, %498 : vector<8x1xf32>
    %501 = arith.mulf %497, %500 : vector<8x1xf32>
    %502 = vector.broadcast %501 : vector<8x1xf32> to vector<8x8xf32>
    %503 = arith.mulf %494, %502 : vector<8x8xf32>
    %cst_175 = arith.constant dense<0.000000e+00> : vector<8x8xf32>
    %504 = tpu.matmul %503, %486, %cst_175 {dimension_numbers = #tpu.dot_dimension_numbers<[1], [0], [0], [1], [0, 0, 1, 1], [], []>} : vector<8x8xf32>, vector<8x8xf32>, vector<8x8xf32> -> vector<8x8xf32>
    %505 = vector.extract_strided_slice %293 {offsets = [24, 0], sizes = [8, 32], strides = [1, 1]} : vector<32x32xf32> to vector<8x32xf32>
    %cst_176 = arith.constant dense<0.000000e+00> : vector<8x32xf32>
    %506 = tpu.matmul %504, %505, %cst_176 {dimension_numbers = #tpu.dot_dimension_numbers<[1], [0], [0], [1], [0, 0, 1, 1], [], []>} : vector<8x8xf32>, vector<8x32xf32>, vector<8x32xf32> -> vector<8x32xf32>
    %507 = arith.addf %483, %506 : vector<8x32xf32>
    %508 = tpu.concatenate %410, %507 in 0 : vector<8x32xf32>, vector<8x32xf32> -> vector<16x32xf32>
    %509 = vector.broadcast %296 : vector<1x32xf32> to vector<16x32xf32>
    %510 = arith.addf %508, %509 : vector<16x32xf32>
    %511 = arith.addf %510, %287 : vector<16x32xf32>
    %cst_177 = arith.constant dense<0.000000e+00> : vector<16xf32>
    %512 = vector.multi_reduction <add>, %511, %cst_177 [1] : vector<16x32xf32> to vector<16xf32>
    %513 = vector.shape_cast %512 : vector<16xf32> to vector<16x1xf32>
    %cst_178 = arith.constant 3.200000e+01 : f32
    %514 = vector.broadcast %cst_178 : f32 to vector<16x1xf32>
    %515 = arith.divf %513, %514 : vector<16x1xf32>
    %516 = vector.broadcast %515 : vector<16x1xf32> to vector<16x32xf32>
    %517 = arith.subf %511, %516 : vector<16x32xf32>
    %518 = arith.mulf %517, %517 : vector<16x32xf32>
    %cst_179 = arith.constant dense<0.000000e+00> : vector<16xf32>
    %519 = vector.multi_reduction <add>, %518, %cst_179 [1] : vector<16x32xf32> to vector<16xf32>
    %520 = vector.shape_cast %519 : vector<16xf32> to vector<16x1xf32>
    %cst_180 = arith.constant 3.200000e+01 : f32
    %521 = vector.broadcast %cst_180 : f32 to vector<16x1xf32>
    %522 = arith.divf %520, %521 : vector<16x1xf32>
    %523 = vector.broadcast %515 : vector<16x1xf32> to vector<16x32xf32>
    %524 = arith.subf %511, %523 : vector<16x32xf32>
    %cst_181 = arith.constant 9.99999974E-6 : f32
    %525 = vector.broadcast %cst_181 : f32 to vector<16x1xf32>
    %526 = arith.addf %522, %525 : vector<16x1xf32>
    %527 = math.rsqrt %526 : vector<16x1xf32>
    %528 = vector.broadcast %527 : vector<16x1xf32> to vector<16x32xf32>
    %529 = arith.mulf %524, %528 : vector<16x32xf32>
    %530 = vector.broadcast %297 : vector<1x32xf32> to vector<16x32xf32>
    %531 = arith.mulf %529, %530 : vector<16x32xf32>
    %532 = vector.broadcast %298 : vector<1x32xf32> to vector<16x32xf32>
    %533 = arith.addf %531, %532 : vector<16x32xf32>
    %cst_182 = arith.constant dense<0.000000e+00> : vector<16x128xf32>
    %534 = tpu.matmul %533, %303, %cst_182 {dimension_numbers = #tpu.dot_dimension_numbers<[1], [0], [0], [1], [0, 0, 1, 1], [], []>} : vector<16x32xf32>, vector<32x128xf32>, vector<16x128xf32> -> vector<16x128xf32>
    %535 = vector.broadcast %305 : vector<1x128xf32> to vector<16x128xf32>
    %536 = arith.addf %534, %535 : vector<16x128xf32>
    %cst_183 = arith.constant 0.000000e+00 : f32
    %537 = vector.broadcast %cst_183 : f32 to vector<16x128xf32>
    %538 = arith.maximumf %536, %537 : vector<16x128xf32>
    %cst_184 = arith.constant dense<0.000000e+00> : vector<16x32xf32>
    %539 = tpu.matmul %538, %307, %cst_184 {dimension_numbers = #tpu.dot_dimension_numbers<[1], [0], [0], [1], [0, 0, 1, 1], [], []>} : vector<16x128xf32>, vector<128x32xf32>, vector<16x32xf32> -> vector<16x32xf32>
    %540 = vector.broadcast %301 : vector<1x32xf32> to vector<16x32xf32>
    %541 = arith.addf %539, %540 : vector<16x32xf32>
    %542 = arith.addf %541, %533 : vector<16x32xf32>
    %cst_185 = arith.constant dense<0.000000e+00> : vector<16xf32>
    %543 = vector.multi_reduction <add>, %542, %cst_185 [1] : vector<16x32xf32> to vector<16xf32>
    %544 = vector.shape_cast %543 : vector<16xf32> to vector<16x1xf32>
    %cst_186 = arith.constant 3.200000e+01 : f32
    %545 = vector.broadcast %cst_186 : f32 to vector<16x1xf32>
    %546 = arith.divf %544, %545 : vector<16x1xf32>
    %547 = vector.broadcast %546 : vector<16x1xf32> to vector<16x32xf32>
    %548 = arith.subf %542, %547 : vector<16x32xf32>
    %549 = arith.mulf %548, %548 : vector<16x32xf32>
    %cst_187 = arith.constant dense<0.000000e+00> : vector<16xf32>
    %550 = vector.multi_reduction <add>, %549, %cst_187 [1] : vector<16x32xf32> to vector<16xf32>
    %551 = vector.shape_cast %550 : vector<16xf32> to vector<16x1xf32>
    %cst_188 = arith.constant 3.200000e+01 : f32
    %552 = vector.broadcast %cst_188 : f32 to vector<16x1xf32>
    %553 = arith.divf %551, %552 : vector<16x1xf32>
    %554 = vector.broadcast %546 : vector<16x1xf32> to vector<16x32xf32>
    %555 = arith.subf %542, %554 : vector<16x32xf32>
    %cst_189 = arith.constant 9.99999974E-6 : f32
    %556 = vector.broadcast %cst_189 : f32 to vector<16x1xf32>
    %557 = arith.addf %553, %556 : vector<16x1xf32>
    %558 = math.rsqrt %557 : vector<16x1xf32>
    %559 = vector.broadcast %558 : vector<16x1xf32> to vector<16x32xf32>
    %560 = arith.mulf %555, %559 : vector<16x32xf32>
    %561 = vector.broadcast %299 : vector<1x32xf32> to vector<16x32xf32>
    %562 = arith.mulf %560, %561 : vector<16x32xf32>
    %563 = vector.broadcast %300 : vector<1x32xf32> to vector<16x32xf32>
    %564 = arith.addf %562, %563 : vector<16x32xf32>
    %c0_190 = arith.constant 0 : index
    %c0_191 = arith.constant 0 : index
    %565 = vector.load %arg11[%c0_190, %c0_191] : memref<16x32xf32, #tpu.memory_space<vmem>>, vector<16x32xf32>
    tpu.vector_store %arg11[%c0_190, %c0_191], %564 {strides = array<i32>} : memref<16x32xf32, #tpu.memory_space<vmem>>, vector<16x32xf32>,
    return
  }
  func.func @transform_0(%arg0: i32) -> (i32, i32) {
    %c0_i32 = arith.constant 0 : i32
    %c0_i32_0 = arith.constant 0 : i32
    %c0_i32_1 = arith.constant 0 : i32
    return %c0_i32, %c0_i32_0 : i32, i32
  }
  func.func @transform_1(%arg0: i32) -> (i32, i32) {
    %c0_i32 = arith.constant 0 : i32
    %c0_i32_0 = arith.constant 0 : i32
    %c0_i32_1 = arith.constant 0 : i32
    return %c0_i32, %c0_i32_0 : i32, i32
  }
  func.func @transform_2(%arg0: i32) -> (i32, i32) {
    %c0_i32 = arith.constant 0 : i32
    %c0_i32_0 = arith.constant 0 : i32
    %c0_i32_1 = arith.constant 0 : i32
    return %c0_i32, %c0_i32_0 : i32, i32
  }
  func.func @transform_3(%arg0: i32) -> (i32, i32, i32) {
    %c0_i32 = arith.constant 0 : i32
    %c0_i32_0 = arith.constant 0 : i32
    %c0_i32_1 = arith.constant 0 : i32
    %c0_i32_2 = arith.constant 0 : i32
    return %c0_i32, %c0_i32_0, %c0_i32_1 : i32, i32, i32
  }
  func.func @transform_4(%arg0: i32) -> (i32, i32, i32) {
    %c0_i32 = arith.constant 0 : i32
    %c0_i32_0 = arith.constant 0 : i32
    %c0_i32_1 = arith.constant 0 : i32
    %c0_i32_2 = arith.constant 0 : i32
    return %c0_i32, %c0_i32_0, %c0_i32_1 : i32, i32, i32
  }
  func.func @transform_5(%arg0: i32) -> (i32, i32, i32) {
    %c0_i32 = arith.constant 0 : i32
    %c0_i32_0 = arith.constant 0 : i32
    %c0_i32_1 = arith.constant 0 : i32
    %c0_i32_2 = arith.constant 0 : i32
    return %c0_i32, %c0_i32_0, %c0_i32_1 : i32, i32, i32
  }
  func.func @transform_6(%arg0: i32) -> (i32, i32, i32) {
    %c0_i32 = arith.constant 0 : i32
    %c0_i32_0 = arith.constant 0 : i32
    %c0_i32_1 = arith.constant 0 : i32
    %c0_i32_2 = arith.constant 0 : i32
    return %c0_i32, %c0_i32_0, %c0_i32_1 : i32, i32, i32
  }
  func.func @transform_7(%arg0: i32) -> (i32, i32, i32) {
    %c0_i32 = arith.constant 0 : i32
    %c0_i32_0 = arith.constant 0 : i32
    %c0_i32_1 = arith.constant 0 : i32
    %c0_i32_2 = arith.constant 0 : i32
    return %c0_i32, %c0_i32_0, %c0_i32_1 : i32, i32, i32
  }
  func.func @transform_8(%arg0: i32) -> (i32, i32, i32) {
    %c0_i32 = arith.constant 0 : i32
    %c0_i32_0 = arith.constant 0 : i32
    %c0_i32_1 = arith.constant 0 : i32
    %c0_i32_2 = arith.constant 0 : i32
    return %c0_i32, %c0_i32_0, %c0_i32_1 : i32, i32, i32
  }
  func.func @transform_9(%arg0: i32) -> (i32, i32, i32) {
    %c0_i32 = arith.constant 0 : i32
    %c0_i32_0 = arith.constant 0 : i32
    %c0_i32_1 = arith.constant 0 : i32
    %c0_i32_2 = arith.constant 0 : i32
    return %c0_i32, %c0_i32_0, %c0_i32_1 : i32, i32, i32
  }
  func.func @transform_10(%arg0: i32) -> (i32, i32) {
    %c0_i32 = arith.constant 0 : i32
    %c0_i32_0 = arith.constant 0 : i32
    %c0_i32_1 = arith.constant 0 : i32
    return %c0_i32, %c0_i32_0 : i32, i32
  }
}

</mosaic_0001>

<bundles_post_ra>
// kernel: tpu_custom_call.1
= control target key start
LH: loop header
LB: loop body
LE: loop exit
PB: predicated region body
PF: predicated region fallthrough
CT: control target
= control target key end

     0   :  { %v5544_v2 = vmov 0   ;;  %s6333_s0 = inlined_call_operand.vmem [shape: s32[16,1], index: 0, kind: input, shape index: {}]   ;;  %s6334_s1 = inlined_call_operand.vmem [shape: f32[32,32], index: 1, kind: input, shape index: {}]   ;;  %s6335_s2 = inlined_call_operand.vmem [shape: f32[8,32], index: 2, kind: input, shape index: {}]   ;;  %s6336_s3 = inlined_call_operand.vmem [shape: f32[2,32,96], index: 3, kind: input, shape index: {}]   ;;  %s6337_s4 = inlined_call_operand.vmem [shape: f32[2,1,96], index: 4, kind: input, shape index: {}]   ;;  %s6338_s5 = inlined_call_operand.vmem [shape: f32[2,32,32], index: 5, kind: input, shape index: {}]   ;;  %s6339_s6 = inlined_call_operand.vmem [shape: f32[2,6,32], index: 6, kind: input, shape index: {}]   ;;  %s6340_s7 = inlined_call_operand.vmem [shape: f32[2,32,128], index: 7, kind: input, shape index: {}]   ;;  %s6341_s8 = inlined_call_operand.vmem [shape: f32[2,1,128], index: 8, kind: input, shape index: {}]   ;;  %s6342_s9 = inlined_call_operand.vmem [shape: f32[2,128,32], index: 9, kind: input, shape index: {}]   ;;  %s6343_s10 = inlined_call_operand.hbm [shape: f32[16,32], index: 10, kind: output, shape index: {}]  }
   0x1   :  { %v38_v0 = vld [vmem:[%s6333_s0] sm:$0xff]  ;;  %v55_v1 = vld [vmem:[%s6334_s1 + $0x18] sm:$0xff]  ;;  %5441 = vset.pattern.permute.xlu0 %v5544_v2  ;;  %v54_v3 = vld [vmem:[%s6334_s1 + $0x10] sm:$0xff] }
   0x2   :  { %5059 = vmatprep.subr.mxu0 %v55_v1  ;;  %41 = vperm.xlu0 %5441, %v38_v0   ;;  %v53_v4 = vld [vmem:[%s6334_s1 + $0x8] sm:$0xff] }
   0x3   :  { %5060 = vmatpush3.msra.mxu0 %v55_v1 }
   0x4   :  { %15 = vsyncpa [#allocation3], 0  ;;  %v39_v5 = vld [vmem:[%s6333_s0 + $0x8] sm:$0xff]  ;;  %5061 = vmatprep.subr.mxu0 %v54_v3  ;;  %v5545_v6 = vmov 0.0   ;;  %v52_v7 = vld [vmem:[%s6334_s1] sm:$0xff]  ;;  %v36_v9 = vlaneseq  ;;  %vm57_vm0 = vcmask 261120  }
   0x5   :  { %5096 = vmatprep.subr.mxu1 %v5545_v6  ;;  %5062 = vmatpush3.msra.mxu0 %v54_v3  ;;  %v142_v8 = vld [vmem:[%s6336_s3 + $0x18] sm:$0xff]  ;;  %v141_v15 = vld [vmem:[%s6336_s3 + $0x10] sm:$0xff]  ;;  %v140_v16 = vld [vmem:[%s6336_s3 + $0x8] sm:$0xff]  ;;  %vm5546_vm3 = vmmov 0   ;;  %s5547_s14 = smov 96   ;;  %vm260_vm4 = vcmask 64512  }
   0x6   :  { %5063 = vmatprep.subr.mxu0 %v53_v4  ;;  %44 = vperm.xlu0 %5441, %v39_v5   ;;  %v37_v10 = vand.u32 127, %v36_v9  ;;  %v139_v17 = vld [vmem:[%s6336_s3] sm:$0xff]  ;;  %s5548_s15 = smov 88   ;;  %s5549_s16 = smov 120   ;;  %v5712_v59 = vld [vmem:[%s6338_s5 + $0x8] sm:$0xff] }
   0x7   :  { %5064 = vmatpush3.msra.mxu0 %v53_v4  ;;  %v56_v19 = vld [vmem:[%s6335_s2] sm:$0xff]  ;;  %5098 = vmatprep.mubr.msk.f32.mxu1 %vm5546_vm3, %v5545_v6  ;;  %s5550_s17 = smov 64   ;;  %s5551_s18 = smov 56  }
   0x8   :  { %5065 = vmatprep.subr.mxu0 %v52_v7  ;;  %v4790_v23 = vld [vmem:[%s6337_s4] ss:$0 sm:$0xff]  ;;  %s5552_s19 = smov 112   ;;  %s5553_s20 = smov 80  }
   0x9   :  { %5066 = vmatpush3.msra.mxu0 %v52_v7  ;;  %v5719_v2 = vld [vmem:[%s6338_s5] sm:$0xff]  ;;  %s5554_s25 = smov 72   ;;  %s5555_s26 = smov 104  }
   0xa   :  { %5070 = vmatprep.subr.mxu0 %v142_v8  ;;  %s5556_s0 = smov 48   ;;  %s5557_s28 = smov 40  }
  0x7d   :  { %v42_v11 = vpop.permute.xlu0 %41 }
  0x7e   :  { %vm46_vm1 = vcmp.eq.s32.totalorder %v37_v10, %v42_v11 }
  0x7f   :  { %v4786_v12 = vsel %vm46_vm1, 1.0, %v5545_v6 }
  0x80   :  { %5067 = vmatprep.mubr.msk.f32.mxu0 %vm57_vm0, %v4786_v12 }
  0x81   :  { %v45_v13 = vpop.permute.xlu0 %44 }
  0x82   :  { %vm47_vm2 = vcmp.eq.s32.totalorder %v37_v10, %v45_v13 }
  0x83   :  { %v4787_v14 = vsel %vm47_vm2, 1.0, %v5545_v6 }
  0x84   :  { %5068 = vmatmul.mubr.msk.f32.vlgmr.msra.gmra.mxu0 %vm57_vm0, %v4787_v14 }
  0x85   :  { %5071 = vmatpush3.msra.mxu0 %v142_v8 }
  0x86   :  { %5072 = vmatprep.subr.mxu0 %v141_v15 }
  0x87   :  { %5073 = vmatpush3.msra.mxu0 %v141_v15 }
  0x88   :  { %5074 = vmatprep.subr.mxu0 %v140_v16 }
  0x89   :  { %5075 = vmatpush3.msra.mxu0 %v140_v16 }
  0x8a   :  { %5076 = vmatprep.subr.mxu0 %v139_v17 }
  0x8b   :  { %5077 = vmatpush3.msra.mxu0 %v139_v17 }
  0x8c   :  { %5081 = vmatprep.subr.mxu0 %v5545_v6 }
 0x144   :  { %v5069_v18 = vpop.f32.mrf.mxu0 }
 0x145   :  { %v5658_v22 = vadd.f32 %v5069_v18, %v56_v19 }
 0x146   :  { %v130_v20 = vpop.f32.mrf.mxu0 }
 0x147   :  { %v5656_v21 = vadd.f32 %v130_v20, %v56_v19 }
 0x149   :  { %5078 = vmatprep.mubr.msk.f32.mxu0 %vm57_vm0, %v5656_v21 }
 0x14a   :  { %5079 = vmatmul.mubr.msk.f32.vlgmr.msra.gmra.mxu0 %vm57_vm0, %v5658_v22 }
 0x14b   :  { %5083 = vmatprep.mubr.msk.f32.mxu0 %vm5546_vm3, %v5545_v6 }
 0x20a   :  { %v5080_v24 = vpop.f32.mrf.mxu0 }
 0x20b   :  { %v5671_v25 = vadd.f32 %v5080_v24, %v4790_v23 }
 0x20c   :  { %v248_v26 = vpop.f32.mrf.mxu0 }
 0x20d   :  { %v5673_v27 = vadd.f32 %v4790_v23, %v248_v26 }
 0x20f   :  { %258 = vrot.lane.b32.xlu1 %v5673_v27, %s5547_s14 }
 0x281   :  { %v259_v28 = vpop.permute.xlu1 %258 }
 0x282   :  { %5082 = vmatpush3.xpose.msk.msra.mxu0 %vm260_vm4, %v259_v28 }
 0x283   :  { %5086 = vmatprep.subr.mxu0 %v5545_v6 }
 0x285   :  { %5084 = vmatmul.mubr.msk.f32.vlgmr.msra.gmra.mxu0 %vm260_vm4, %v5673_v27 }
 0x286   :  { %5088 = vmatprep.mubr.msk.f32.mxu0 %vm5546_vm3, %v5545_v6 }
 0x345   :  { %v331_v29 = vpop.f32.mrf.mxu0 }
 0x346   :  { %v335_v30 = vmul.f32 0.35355338, %v331_v29 }
 0x347   :  { %v5085_v31 = vpop.f32.mrf.mxu0 }
 0x348   :  { %v336_v32 = vsel %vm260_vm4, %v335_v30, -inf }
 0x349   :  { %337 = vmax.xlane.f32.xlu1 %v336_v32 }
 0x35a   :  { %428 = vrot.lane.b32.xlu1 %v5673_v27, %s5548_s15 }
 0x35e   :  { %426 = vrot.lane.b32.xlu1 %v5673_v27, %s5549_s16 }
 0x3d2   :  { %v338_v33 = vpop.xlane.xlu1 %337 }
 0x3d3   :  { %v339_v34 = vsub.f32 %v335_v30, %v338_v33 }
 0x3d5   :  { %v340_v35 = vmul.f32 1.442695, %v339_v34 }
 0x3d6   :  { %v429_v44 = vpop.permute.xlu1 %428 }
 0x3d7   :  { %5442 = vpow2.f32 %v340_v35  ;;  %v5761_v35 = vld [vmem:[%s6338_s5 + $0x10] sm:$0xff] }
 0x3da   :  { %v427_v46 = vpop.permute.xlu1 %426 }
 0x3e4   :  { %v5443_v36 = vpop.eup %5442 }
 0x3e5   :  { %v342_v37 = vsel %vm260_vm4, %v5443_v36, 0.0 }
 0x3e6   :  { %343 = vadd.xlane.f32.xlu0 %v342_v37 }
 0x3fc   :  { %350 = vrot.lane.b32.xlu0 %v5673_v27, %s5550_s17 }
 0x46f   :  { %v344_v38 = vpop.xlane.xlu0 %343 }
 0x470   :  { %5444 = vrcp.f32 %v344_v38 }
 0x473   :  { %v351_v39 = vpop.permute.xlu0 %350 }
 0x474   :  { %5087 = vmatpush3.msra.mxu0 %v351_v39 }
 0x475   :  { %5091 = vmatprep.subr.mxu0 %v5545_v6 }
 0x47d   :  { %v5445_v40 = vpop.eup %5444 }
 0x47e   :  { %v346_v41 = vmul.f32 %v5445_v40, %v344_v38 }
 0x480   :  { %v347_v42 = vsub.f32 2.0, %v346_v41 }
 0x482   :  { %v348_v43 = vmul.f32 %v5445_v40, %v347_v42 }
 0x484   :  { %v349_v45 = vmul.f32 %v5443_v36, %v348_v43 }
 0x486   :  { %5089 = vmatmul.mubr.msk.f32.vlgmr.msra.gmra.mxu0 %vm260_vm4, %v349_v45 }
 0x487   :  { %5092 = vmatpush3.xpose.msk.msra.mxu0 %vm260_vm4, %v429_v44  ;;  %5093 = vmatprep.mubr.msk.f32.mxu0 %vm5546_vm3, %v5545_v6 }
 0x488   :  { %5101 = vmatprep.subr.mxu0 %v5545_v6 }
 0x48a   :  { %5094 = vmatmul.mubr.msk.f32.vlgmr.msra.gmra.mxu0 %vm260_vm4, %v427_v46 }
 0x48b   :  { %5103 = vmatprep.mubr.msk.f32.mxu0 %vm5546_vm3, %v5545_v6  ;;  %5102 = vmatpush3.msra.mxu0 %v5712_v59 }
 0x48c   :  { %5111 = vmatprep.subr.mxu0 %v5545_v6 }
 0x546   :  { %v422_v47 = vpop.f32.mrf.mxu0 }
 0x548   :  { %v5090_v48 = vpop.f32.mrf.mxu0 }
 0x54a   :  { %v500_v49 = vpop.f32.mrf.mxu0 }
 0x54b   :  { %v504_v50 = vmul.f32 0.35355338, %v500_v49 }
 0x54c   :  { %v5095_v51 = vpop.f32.mrf.mxu0 }
 0x54d   :  { %v505_v52 = vsel %vm260_vm4, %v504_v50, -inf }
 0x54e   :  { %506 = vmax.xlane.f32.xlu0 %v505_v52 }
 0x564   :  { %519 = vrot.lane.b32.xlu0 %v5673_v27, %s5551_s18 }
 0x568   :  { %741 = vrot.lane.b32.xlu0 %v5673_v27, %s5552_s19 }
 0x5d7   :  { %v507_v53 = vpop.xlane.xlu0 %506 }
 0x5d8   :  { %v508_v54 = vsub.f32 %v504_v50, %v507_v53 }
 0x5da   :  { %v509_v55 = vmul.f32 1.442695, %v508_v54 }
 0x5db   :  { %v520_v56 = vpop.permute.xlu0 %519 }
 0x5dc   :  { %5446 = vpow2.f32 %v509_v55  ;;  %5097 = vmatpush3.msra.mxu1 %v520_v56 }
 0x5dd   :  { %5106 = vmatprep.subr.mxu1 %v5545_v6 }
 0x5df   :  { %v742_v7 = vpop.permute.xlu0 %741 }
 0x5e9   :  { %v5447_v57 = vpop.eup %5446 }
 0x5ea   :  { %v511_v58 = vsel %vm260_vm4, %v5447_v57, 0.0 }
 0x5eb   :  { %512 = vadd.xlane.f32.xlu1 %v511_v58 }
 0x5fc   :  { %743 = vrot.lane.b32.xlu1 %v5673_v27, %s5553_s20 }
 0x674   :  { %v513_v60 = vpop.xlane.xlu1 %512 }
 0x675   :  { %5448 = vrcp.f32 %v513_v60 }
 0x678   :  { %v744_v4 = vpop.permute.xlu1 %743 }
 0x682   :  { %v5449_v61 = vpop.eup %5448 }
 0x683   :  { %v515_v62 = vmul.f32 %v5449_v61, %v513_v60 }
 0x685   :  { %v516_v63 = vsub.f32 2.0, %v515_v62 }
 0x687   :  { %v517_v0 = vmul.f32 %v5449_v61, %v516_v63  ;;  %v5802_v61 = vld [vmem:[%s6338_s5 + $0x18] sm:$0xff] }
 0x689   :  { %v518_v1 = vmul.f32 %v5447_v57, %v517_v0 }
 0x68b   :  { %5099 = vmatmul.mubr.msk.f32.vlgmr.msra.gmra.mxu1 %vm260_vm4, %v518_v1 }
 0x68c   :  { %5107 = vmatpush3.msra.mxu1 %v5719_v2  ;;  %5108 = vmatprep.mubr.msk.f32.mxu1 %vm5546_vm3, %v5545_v6 }
 0x68d   :  { %5116 = vmatprep.subr.mxu1 %v5545_v6 }
 0x68f   :  { %5109 = vmatmul.mubr.msk.f32.vlgmr.msra.gmra.mxu1 %vm260_vm4, %v422_v47 }
 0x690   :  { %5118 = vmatprep.mubr.msk.f32.mxu1 %vm5546_vm3, %v5545_v6 }
 0x74b   :  { %v591_v3 = vpop.f32.mrf.mxu1 }
 0x74c   :  { %5104 = vmatmul.mubr.msk.f32.vlgmr.msra.gmra.mxu0 %vm260_vm4, %v591_v3 }
 0x74d   :  { %5112 = vmatpush3.xpose.msk.msra.mxu0 %vm260_vm4, %v744_v4  ;;  %v5100_v5 = vpop.f32.mrf.mxu1  ;;  %5113 = vmatprep.mubr.msk.f32.mxu0 %vm5546_vm3, %v5545_v6 }
 0x74e   :  { %5121 = vmatprep.subr.mxu0 %v5545_v6 }
 0x74f   :  { %v5734_v8 = vpop.f32.mrf.mxu1 }
 0x750   :  { %5114 = vmatmul.mubr.msk.f32.vlgmr.msra.gmra.mxu0 %vm260_vm4, %v742_v7 }
 0x751   :  { %v5110_v10 = vpop.f32.mrf.mxu1  ;;  %5123 = vmatprep.mubr.msk.f32.mxu0 %vm5546_vm3, %v5545_v6  ;;  %5122 = vmatpush3.msra.mxu0 %v5761_v35 }
 0x752   :  { %5131 = vmatprep.subr.mxu0 %v5545_v6 }
 0x80c   :  { %v5739_v11 = vpop.f32.mrf.mxu0 }
 0x80e   :  { %v5105_v12 = vpop.f32.mrf.mxu0 }
 0x810   :  { %v815_v13 = vpop.f32.mrf.mxu0 }
 0x811   :  { %v819_v14 = vmul.f32 0.35355338, %v815_v13 }
 0x812   :  { %v5115_v15 = vpop.f32.mrf.mxu0 }
 0x813   :  { %v820_v16 = vsel %vm260_vm4, %v819_v14, -inf }
 0x814   :  { %821 = vmax.xlane.f32.xlu1 %v820_v16 }
 0x825   :  { %986 = vrot.lane.b32.xlu1 %v5673_v27, %s5554_s25 }
 0x829   :  { %984 = vrot.lane.b32.xlu1 %v5673_v27, %s5555_s26 }
 0x89d   :  { %v822_v17 = vpop.xlane.xlu1 %821 }
 0x89e   :  { %v823_v18 = vsub.f32 %v819_v14, %v822_v17 }
 0x8a0   :  { %v824_v19 = vmul.f32 1.442695, %v823_v18 }
 0x8a1   :  { %v987_v32 = vpop.permute.xlu1 %986 }
 0x8a2   :  { %5450 = vpow2.f32 %v824_v19 }
 0x8a5   :  { %v985_v34 = vpop.permute.xlu1 %984 }
 0x8af   :  { %v5451_v20 = vpop.eup %5450 }
 0x8b0   :  { %v826_v23 = vsel %vm260_vm4, %v5451_v20, 0.0 }
 0x8b1   :  { %827 = vadd.xlane.f32.xlu0 %v826_v23 }
 0x8c7   :  { %834 = vrot.lane.b32.xlu0 %v5673_v27, %s5556_s0 }
 0x93a   :  { %v828_v24 = vpop.xlane.xlu0 %827 }
 0x93b   :  { %5452 = vrcp.f32 %v828_v24 }
 0x93e   :  { %v835_v26 = vpop.permute.xlu0 %834 }
 0x93f   :  { %5117 = vmatpush3.msra.mxu1 %v835_v26 }
 0x940   :  { %5126 = vmatprep.subr.mxu1 %v5545_v6 }
 0x948   :  { %v5453_v28 = vpop.eup %5452 }
 0x949   :  { %v830_v29 = vmul.f32 %v5453_v28, %v828_v24 }
 0x94b   :  { %v831_v30 = vsub.f32 2.0, %v830_v29 }
 0x94d   :  { %v832_v31 = vmul.f32 %v5453_v28, %v831_v30 }
 0x94f   :  { %v833_v33 = vmul.f32 %v5451_v20, %v832_v31 }
 0x951   :  { %5119 = vmatmul.mubr.msk.f32.vlgmr.msra.gmra.mxu1 %vm260_vm4, %v833_v33 }
 0x952   :  { %5127 = vmatpush3.xpose.msk.msra.mxu1 %vm260_vm4, %v987_v32  ;;  %5128 = vmatprep.mubr.msk.f32.mxu1 %vm5546_vm3, %v5545_v6 }
 0x953   :  { %5136 = vmatprep.subr.mxu1 %v5545_v6 }
 0x955   :  { %5129 = vmatmul.mubr.msk.f32.vlgmr.msra.gmra.mxu1 %vm260_vm4, %v985_v34 }
 0x956   :  { %5138 = vmatprep.mubr.msk.f32.mxu1 %vm5546_vm3, %v5545_v6  ;;  %5137 = vmatpush3.msra.mxu1 %v5802_v61 }
 0x957   :  { %5146 = vmatprep.subr.mxu1 %v5545_v6 }
 0xa11   :  { %v906_v36 = vpop.f32.mrf.mxu1 }
 0xa12   :  { %5124 = vmatmul.mubr.msk.f32.vlgmr.msra.gmra.mxu0 %vm260_vm4, %v906_v36 }
 0xa13   :  { %v5120_v37 = vpop.f32.mrf.mxu1  ;;  %5133 = vmatprep.mubr.msk.f32.mxu0 %vm5546_vm3, %v5545_v6 }
 0xa15   :  { %v1058_v38 = vpop.f32.mrf.mxu1 }
 0xa16   :  { %v1062_v39 = vmul.f32 0.35355338, %v1058_v38 }
 0xa17   :  { %v5130_v40 = vpop.f32.mrf.mxu1 }
 0xa18   :  { %v1063_v41 = vsel %vm260_vm4, %v1062_v39, -inf }
 0xa19   :  { %1064 = vmax.xlane.f32.xlu0 %v1063_v41 }
 0xa2f   :  { %1077 = vrot.lane.b32.xlu0 %v5673_v27, %s5557_s28  ;;  %v738_v27 = vadd.f32 %v5734_v8, %v5739_v11 }
 0xa33   :  { %1397 = vrot.lane.b32.xlu0 %v5671_v25, %s5548_s15 }
 0xaa2   :  { %v1065_v42 = vpop.xlane.xlu0 %1064 }
 0xaa3   :  { %v1066_v43 = vsub.f32 %v1062_v39, %v1065_v42 }
 0xaa5   :  { %v1067_v44 = vmul.f32 1.442695, %v1066_v43 }
 0xaa6   :  { %v1078_v45 = vpop.permute.xlu0 %1077 }
 0xaa7   :  { %5454 = vpow2.f32 %v1067_v44  ;;  %5132 = vmatpush3.msra.mxu0 %v1078_v45 }
 0xaa8   :  { %5141 = vmatprep.subr.mxu0 %v5545_v6 }
 0xaaa   :  { %v1398_v58 = vpop.permute.xlu0 %1397 }
 0xab4   :  { %v5455_v46 = vpop.eup %5454 }
 0xab5   :  { %v1069_v47 = vsel %vm260_vm4, %v5455_v46, 0.0 }
 0xab6   :  { %1070 = vadd.xlane.f32.xlu1 %v1069_v47 }
 0xac7   :  { %1228 = vrot.lane.b32.xlu1 %v5671_v25, %s5547_s14 }
 0xacb   :  { %1395 = vrot.lane.b32.xlu1 %v5671_v25, %s5549_s16 }
 0xad2   :  { %v979_v48 = vpop.f32.mrf.mxu0 }
 0xad3   :  { %v5781_v49 = vadd.f32 %v979_v48, %v738_v27 }
 0xad4   :  { %v5125_v50 = vpop.f32.mrf.mxu0 }
 0xb3f   :  { %v1071_v51 = vpop.xlane.xlu1 %1070 }
 0xb40   :  { %5456 = vrcp.f32 %v1071_v51 }
 0xb43   :  { %v1229_v57 = vpop.permute.xlu1 %1228 }
 0xb47   :  { %v1396_v60 = vpop.permute.xlu1 %1395 }
 0xb4d   :  { %v5457_v52 = vpop.eup %5456 }
 0xb4e   :  { %v1073_v53 = vmul.f32 %v5457_v52, %v1071_v51 }
 0xb50   :  { %v1074_v54 = vsub.f32 2.0, %v1073_v53 }
 0xb52   :  { %v1075_v55 = vmul.f32 %v5457_v52, %v1074_v54 }
 0xb54   :  { %v1076_v56 = vmul.f32 %v5455_v46, %v1075_v55 }
 0xb56   :  { %5134 = vmatmul.mubr.msk.f32.vlgmr.msra.gmra.mxu0 %vm260_vm4, %v1076_v56 }
 0xb57   :  { %5142 = vmatpush3.xpose.msk.msra.mxu0 %vm260_vm4, %v1229_v57  ;;  %5143 = vmatprep.mubr.msk.f32.mxu0 %vm5546_vm3, %v5545_v6 }
 0xb58   :  { %5151 = vmatprep.subr.mxu0 %v5545_v6 }
 0xb5a   :  { %5144 = vmatmul.mubr.msk.f32.vlgmr.msra.gmra.mxu0 %vm260_vm4, %v5671_v25 }
 0xb5b   :  { %5152 = vmatpush3.xpose.msk.msra.mxu0 %vm260_vm4, %v1398_v58  ;;  %5153 = vmatprep.mubr.msk.f32.mxu0 %vm5546_vm3, %v5545_v6 }
 0xb5c   :  { %5161 = vmatprep.subr.mxu0 %v5545_v6 }
 0xb5e   :  { %5154 = vmatmul.mubr.msk.f32.vlgmr.msra.gmra.mxu0 %vm260_vm4, %v1396_v60 }
 0xb5f   :  { %5162 = vmatpush3.msra.mxu0 %v5712_v59  ;;  %5163 = vmatprep.mubr.msk.f32.mxu0 %vm5546_vm3, %v5545_v6 }
 0xb60   :  { %5171 = vmatprep.subr.mxu0 %v5545_v6 }
 0xc16   :  { %v1149_v62 = vpop.f32.mrf.mxu0 }
 0xc17   :  { %5139 = vmatmul.mubr.msk.f32.vlgmr.msra.gmra.mxu1 %vm260_vm4, %v1149_v62 }
 0xc18   :  { %v5135_v63 = vpop.f32.mrf.mxu0  ;;  %5148 = vmatprep.mubr.msk.f32.mxu1 %vm5546_vm3, %v5545_v6 }
 0xc1a   :  { %v1300_v59 = vpop.f32.mrf.mxu0 }
 0xc1b   :  { %v1304_v0 = vmul.f32 0.35355338, %v1300_v59 }
 0xc1c   :  { %v5145_v1 = vpop.f32.mrf.mxu0 }
 0xc1d   :  { %v1305_v3 = vsel %vm260_vm4, %v1304_v0, -inf }
 0xc1e   :  { %1306 = vmax.xlane.f32.xlu0 %v1305_v3  ;;  %v1469_v4 = vpop.f32.mrf.mxu0 }
 0xc1f   :  { %v1473_v5 = vmul.f32 0.35355338, %v1469_v4 }
 0xc20   :  { %v5155_v7 = vpop.f32.mrf.mxu0 }
 0xc21   :  { %v1474_v8 = vsel %vm260_vm4, %v1473_v5, -inf  ;;  %v5866_v7 = vshrl.u32 %v36_v9, 7 }
 0xc22   :  { %1475 = vmax.xlane.f32.xlu1 %v1474_v8 }
 0xc23   :  { %v2198_v8 = vsub.s32 0, %v5866_v7 }
 0xc33   :  { %1319 = vrot.lane.b32.xlu1 %v5671_v25, %s5550_s17 }
 0xc37   :  { %1712 = vrot.lane.b32.xlu1 %v5671_v25, %s5553_s20 }
 0xc3b   :  { %1710 = vrot.lane.b32.xlu1 %v5671_v25, %s5552_s19 }
 0xca7   :  { %v1307_v10 = vpop.xlane.xlu0 %1306 }
 0xca8   :  { %v1308_v11 = vsub.f32 %v1304_v0, %v1307_v10  ;;  %v5872_v10 = vld [vmem:[%s6339_s6] sm:$0x3f] }
 0xcaa   :  { %v1309_v12 = vmul.f32 1.442695, %v1308_v11  ;;  %v2199_v11 = vrot.slane %v5872_v10, %v2198_v8 }
 0xcab   :  { %v1476_v13 = vpop.xlane.xlu1 %1475 }
 0xcac   :  { %5458 = vpow2.f32 %v1309_v12  ;;  %v1477_v14 = vsub.f32 %v1473_v5, %v1476_v13 }
 0xcae   :  { %v1478_v15 = vmul.f32 1.442695, %v1477_v14 }
 0xcaf   :  { %v1320_v16 = vpop.permute.xlu1 %1319 }
 0xcb0   :  { %5460 = vpow2.f32 %v1478_v15  ;;  %5147 = vmatpush3.msra.mxu1 %v1320_v16 }
 0xcb1   :  { %5156 = vmatprep.subr.mxu1 %v5545_v6 }
 0xcb3   :  { %v1713_v43 = vpop.permute.xlu1 %1712 }
 0xcb9   :  { %v5459_v17 = vpop.eup %5458 }
 0xcba   :  { %v1311_v18 = vsel %vm260_vm4, %v5459_v17, 0.0 }
 0xcbb   :  { %1312 = vadd.xlane.f32.xlu0 %v1311_v18 }
 0xcbd   :  { %v5461_v19 = vpop.eup %5460 }
 0xcbe   :  { %v1480_v20 = vsel %vm260_vm4, %v5461_v19, 0.0 }
 0xcbf   :  { %1481 = vadd.xlane.f32.xlu0 %v1480_v20 }
 0xcd5   :  { %1488 = vrot.lane.b32.xlu0 %v5671_v25, %s5551_s18 }
 0xcd7   :  { %v1222_v23 = vpop.f32.mrf.mxu1 }
 0xcd8   :  { %v5823_v24 = vadd.f32 %v1222_v23, %v5781_v49 }
 0xcd9   :  { %v5140_v26 = vpop.f32.mrf.mxu1 }
 0xcda   :  { %v2200_v9 = vadd.f32 %v2199_v11, %v5823_v24 }
 0xd44   :  { %v1313_v28 = vpop.xlane.xlu0 %1312 }
 0xd45   :  { %5462 = vrcp.f32 %v1313_v28 }
 0xd48   :  { %v1482_v29 = vpop.xlane.xlu0 %1481 }
 0xd49   :  { %5464 = vrcp.f32 %v1482_v29 }
 0xd4c   :  { %v1489_v40 = vpop.permute.xlu0 %1488 }
 0xd52   :  { %v5463_v30 = vpop.eup %5462 }
 0xd53   :  { %v1315_v31 = vmul.f32 %v5463_v30, %v1313_v28 }
 0xd55   :  { %v1316_v32 = vsub.f32 2.0, %v1315_v31 }
 0xd56   :  { %v5465_v33 = vpop.eup %5464 }
 0xd57   :  { %v1317_v34 = vmul.f32 %v5463_v30, %v1316_v32  ;;  %v1484_v36 = vmul.f32 %v5465_v33, %v1482_v29 }
 0xd59   :  { %v1318_v37 = vmul.f32 %v5459_v17, %v1317_v34  ;;  %v1485_v38 = vsub.f32 2.0, %v1484_v36  ;;  %v2202_v17 = vadd.f32 %v2200_v9, %v5656_v21  ;;  %v164_v9 = vld [vmem:[%s6342_s9 + $0x50] sm:$0xff] }
 0xd5b   :  { %v1486_v39 = vmul.f32 %v5465_v33, %v1485_v38  ;;  %5149 = vmatmul.mubr.msk.f32.vlgmr.msra.gmra.mxu1 %vm260_vm4, %v1318_v37  ;;  %v2204_v18 = vsel %vm57_vm0, %v2202_v17, 0.0 }
 0xd5c   :  { %5157 = vmatpush3.msra.mxu1 %v1489_v40  ;;  %5158 = vmatprep.mubr.msk.f32.mxu1 %vm5546_vm3, %v5545_v6 }
 0xd5d   :  { %v1487_v41 = vmul.f32 %v5461_v19, %v1486_v39  ;;  %5166 = vmatprep.subr.mxu1 %v5545_v6 }
 0xd5f   :  { %5159 = vmatmul.mubr.msk.f32.vlgmr.msra.gmra.mxu1 %vm260_vm4, %v1487_v41 }
 0xd60   :  { %5167 = vmatpush3.msra.mxu1 %v5719_v2  ;;  %5168 = vmatprep.mubr.msk.f32.mxu1 %vm5546_vm3, %v5545_v6  ;;  %v1711_v2 = vpop.permute.xlu1 %1710 }
 0xd61   :  { %5176 = vmatprep.subr.mxu1 %v5545_v6 }
 0xe1b   :  { %v1391_v42 = vpop.f32.mrf.mxu1 }
 0xe1c   :  { %5169 = vmatmul.mubr.msk.f32.vlgmr.msra.gmra.mxu1 %vm260_vm4, %v1391_v42 }
 0xe1d   :  { %v5150_v44 = vpop.f32.mrf.mxu1  ;;  %5178 = vmatprep.mubr.msk.f32.mxu1 %vm5546_vm3, %v5545_v6 }
 0xe1f   :  { %v1560_v45 = vpop.f32.mrf.mxu1 }
 0xe20   :  { %5164 = vmatmul.mubr.msk.f32.vlgmr.msra.gmra.mxu0 %vm260_vm4, %v1560_v45 }
 0xe21   :  { %5172 = vmatpush3.xpose.msk.msra.mxu0 %vm260_vm4, %v1713_v43  ;;  %v5160_v46 = vpop.f32.mrf.mxu1  ;;  %5173 = vmatprep.mubr.msk.f32.mxu0 %vm5546_vm3, %v5545_v6 }
 0xe22   :  { %5181 = vmatprep.subr.mxu0 %v5545_v6 }
 0xe24   :  { %5174 = vmatmul.mubr.msk.f32.vlgmr.msra.gmra.mxu0 %vm260_vm4, %v1711_v2 }
 0xe25   :  { %5182 = vmatpush3.msra.mxu0 %v5761_v35  ;;  %5183 = vmatprep.mubr.msk.f32.mxu0 %vm5546_vm3, %v5545_v6 }
 0xe26   :  { %5191 = vmatprep.subr.mxu0 %v5545_v6 }
 0xedc   :  { %v1706_v47 = vpop.f32.mrf.mxu1 }
 0xede   :  { %v5170_v27 = vpop.f32.mrf.mxu1 }
 0xee0   :  { %v1633_v48 = vpop.f32.mrf.mxu0 }
 0xee1   :  { %v1707_v49 = vadd.f32 %v1706_v47, %v1633_v48 }
 0xee2   :  { %v5165_v50 = vpop.f32.mrf.mxu0 }
 0xee4   :  { %v1784_v51 = vpop.f32.mrf.mxu0 }
 0xee5   :  { %v1788_v52 = vmul.f32 0.35355338, %v1784_v51 }
 0xee6   :  { %v5175_v53 = vpop.f32.mrf.mxu0 }
 0xee7   :  { %v1789_v54 = vsel %vm260_vm4, %v1788_v52, -inf }
 0xee8   :  { %1790 = vmax.xlane.f32.xlu0 %v1789_v54 }
 0xefe   :  { %1803 = vrot.lane.b32.xlu0 %v5671_v25, %s5556_s0 }
 0xf02   :  { %1953 = vrot.lane.b32.xlu0 %v5671_v25, %s5555_s26 }
 0xf71   :  { %v1791_v35 = vpop.xlane.xlu0 %1790 }
 0xf72   :  { %v1792_v55 = vsub.f32 %v1788_v52, %v1791_v35 }
 0xf74   :  { %v1793_v56 = vmul.f32 1.442695, %v1792_v55  ;;  %v2239_v55 = vsub.s32 2, %v5866_v7 }
 0xf75   :  { %v1804_v57 = vpop.permute.xlu0 %1803 }
 0xf76   :  { %5466 = vpow2.f32 %v1793_v56  ;;  %5177 = vmatpush3.msra.mxu1 %v1804_v57 }
 0xf77   :  { %5186 = vmatprep.subr.mxu1 %v5545_v6 }
 0xf79   :  { %v1954_v5 = vpop.permute.xlu0 %1953 }
 0xf83   :  { %v5467_v58 = vpop.eup %5466 }
 0xf84   :  { %v1795_v60 = vsel %vm260_vm4, %v5467_v58, 0.0 }
 0xf85   :  { %1796 = vadd.xlane.f32.xlu1 %v1795_v60  ;;  %v2240_v60 = vrot.slane %v5872_v10, %v2239_v55 }
 0xf96   :  { %1955 = vrot.lane.b32.xlu1 %v5671_v25, %s5554_s25 }
0x100e   :  { %v1797_v62 = vpop.xlane.xlu1 %1796 }
0x100f   :  { %5468 = vrcp.f32 %v1797_v62 }
0x1012   :  { %v1956_v4 = vpop.permute.xlu1 %1955 }
0x101c   :  { %v5469_v63 = vpop.eup %5468 }
0x101d   :  { %v1799_v59 = vmul.f32 %v5469_v63, %v1797_v62 }
0x101f   :  { %v1800_v0 = vsub.f32 2.0, %v1799_v59  ;;  %v152_v59 = vld [vmem:[%s6340_s7 + $0x18] sm:$0xff] }
0x1021   :  { %v1801_v1 = vmul.f32 %v5469_v63, %v1800_v0  ;;  %v151_v0 = vld [vmem:[%s6340_s7 + $0x10] sm:$0xff] }
0x1023   :  { %v1802_v3 = vmul.f32 %v5467_v58, %v1801_v1  ;;  %v150_v1 = vld [vmem:[%s6340_s7 + $0x8] sm:$0xff] }
0x1025   :  { %5179 = vmatmul.mubr.msk.f32.vlgmr.msra.gmra.mxu1 %vm260_vm4, %v1802_v3  ;;  %v149_v3 = vld [vmem:[%s6340_s7] sm:$0xff] }
0x1026   :  { %5187 = vmatpush3.xpose.msk.msra.mxu1 %vm260_vm4, %v1956_v4  ;;  %5188 = vmatprep.mubr.msk.f32.mxu1 %vm5546_vm3, %v5545_v6  ;;  %v169_v4 = vld [vmem:[%s6342_s9 + $0x78] sm:$0xff] }
0x1027   :  { %5196 = vmatprep.subr.mxu1 %v5545_v6 }
0x1029   :  { %5189 = vmatmul.mubr.msk.f32.vlgmr.msra.gmra.mxu1 %vm260_vm4, %v1954_v5  ;;  %v168_v5 = vld [vmem:[%s6342_s9 + $0x70] sm:$0xff] }
0x102a   :  { %5197 = vmatpush3.msra.mxu1 %v5802_v61  ;;  %5198 = vmatprep.mubr.msk.f32.mxu1 %vm5546_vm3, %v5545_v6 }
0x102b   :  { %5212 = vmatprep.subr.mxu1 %v169_v4 }
0x10e5   :  { %v1875_v12 = vpop.f32.mrf.mxu1 }
0x10e6   :  { %5184 = vmatmul.mubr.msk.f32.vlgmr.msra.gmra.mxu0 %vm260_vm4, %v1875_v12  ;;  %v166_v12 = vld [vmem:[%s6342_s9 + $0x60] sm:$0xff] }
0x10e7   :  { %v5180_v61 = vpop.f32.mrf.mxu1  ;;  %5193 = vmatprep.mubr.msk.f32.mxu0 %vm5546_vm3, %v5545_v6 }
0x10e8   :  { %v165_v61 = vld [vmem:[%s6342_s9 + $0x58] sm:$0xff] }
0x10e9   :  { %v2027_v13 = vpop.f32.mrf.mxu1 }
0x10ea   :  { %v2031_v14 = vmul.f32 0.35355338, %v2027_v13  ;;  %v163_v13 = vld [vmem:[%s6342_s9 + $0x48] sm:$0xff] }
0x10eb   :  { %v5190_v15 = vpop.f32.mrf.mxu1 }
0x10ec   :  { %v2032_v16 = vsel %vm260_vm4, %v2031_v14, -inf  ;;  %v161_v15 = vld [vmem:[%s6342_s9 + $0x38] sm:$0xff] }
0x10ed   :  { %2033 = vmax.xlane.f32.xlu1 %v2032_v16  ;;  %v160_v16 = vld [vmem:[%s6342_s9 + $0x30] sm:$0xff] }
0x10f1   :  { %2205 = vadd.xlane.f32.xlu1 %v2204_v18  ;;  %v158_v18 = vld [vmem:[%s6342_s9 + $0x20] sm:$0xff] }
0x1176   :  { %v2034_v19 = vpop.xlane.xlu1 %2033 }
0x1177   :  { %v2035_v20 = vsub.f32 %v2031_v14, %v2034_v19  ;;  %v162_v14 = vld [vmem:[%s6342_s9 + $0x40] sm:$0xff] }
0x1179   :  { %v2036_v23 = vmul.f32 1.442695, %v2035_v20 }
0x117a   :  { %v2206_v40 = vpop.xlane.xlu1 %2205 }
0x117b   :  { %5470 = vpow2.f32 %v2036_v23 }
0x1188   :  { %v5471_v26 = vpop.eup %5470 }
0x1189   :  { %v2038_v28 = vsel %vm260_vm4, %v5471_v26, 0.0 }
0x118a   :  { %2039 = vadd.xlane.f32.xlu0 %v2038_v28 }
0x11a0   :  { %2046 = vrot.lane.b32.xlu0 %v5671_v25, %s5557_s28  ;;  %v2211_v25 = vmul.f32 0.03125, %v2206_v40 }
0x11a2   :  { %v2213_v44 = vsub.f32 %v2202_v17, %v2211_v25  ;;  %v159_v17 = vld [vmem:[%s6342_s9 + $0x28] sm:$0xff]  ;;  %v2334_v25 = vsub.s32 5, %v5866_v7 }
0x11a4   :  { %v2215_v47 = vmul.f32 %v2213_v44, %v2213_v44 }
0x11a6   :  { %v1948_v24 = vpop.f32.mrf.mxu0  ;;  %v2217_v27 = vsel %vm57_vm0, %v2215_v47, 0.0 }
0x11a7   :  { %v1952_v29 = vadd.f32 %v1948_v24, %v1707_v49 }
0x11a8   :  { %v5185_v30 = vpop.f32.mrf.mxu0 }
0x11a9   :  { %v157_v30 = vld [vmem:[%s6342_s9 + $0x18] sm:$0xff] }
0x1213   :  { %v2040_v31 = vpop.xlane.xlu0 %2039 }
0x1214   :  { %5472 = vrcp.f32 %v2040_v31 }
0x1217   :  { %v2047_v21 = vpop.permute.xlu0 %2046 }
0x1218   :  { %5192 = vmatpush3.msra.mxu0 %v2047_v21  ;;  %v155_v21 = vld [vmem:[%s6342_s9 + $0x8] sm:$0xff] }
0x1219   :  { %5201 = vmatprep.subr.mxu0 %v152_v59 }
0x1221   :  { %v5473_v32 = vpop.eup %5472 }
0x1222   :  { %v2042_v33 = vmul.f32 %v5473_v32, %v2040_v31  ;;  %v156_v31 = vld [vmem:[%s6342_s9 + $0x10] sm:$0xff] }
0x1224   :  { %v2043_v34 = vsub.f32 2.0, %v2042_v33  ;;  %v4825_v33 = vld [vmem:[%s6341_s8] ss:$0 sm:$0xff] }
0x1226   :  { %v2044_v36 = vmul.f32 %v5473_v32, %v2043_v34  ;;  %v154_v32 = vld [vmem:[%s6342_s9] sm:$0xff] }
0x1228   :  { %v2045_v37 = vmul.f32 %v5471_v26, %v2044_v36 }
0x122a   :  { %5194 = vmatmul.mubr.msk.f32.vlgmr.msra.gmra.mxu0 %vm260_vm4, %v2045_v37 }
0x122b   :  { %5202 = vmatpush3.msra.mxu0 %v152_v59 }
0x122c   :  { %5203 = vmatprep.subr.mxu0 %v151_v0 }
0x122d   :  { %5204 = vmatpush3.msra.mxu0 %v151_v0 }
0x122e   :  { %5205 = vmatprep.subr.mxu0 %v150_v1 }
0x122f   :  { %5206 = vmatpush3.msra.mxu0 %v150_v1 }
0x1230   :  { %5207 = vmatprep.subr.mxu0 %v149_v3 }
0x1231   :  { %5208 = vmatpush3.msra.mxu0 %v149_v3 }
0x12ea   :  { %v2118_v38 = vpop.f32.mrf.mxu0 }
0x12eb   :  { %5199 = vmatmul.mubr.msk.f32.vlgmr.msra.gmra.mxu1 %vm260_vm4, %v2118_v38 }
0x12ec   :  { %v5195_v39 = vpop.f32.mrf.mxu0  ;;  %5213 = vmatpush3.msra.mxu1 %v169_v4 }
0x12ed   :  { %5214 = vmatprep.subr.mxu1 %v168_v5 }
0x12ee   :  { %5215 = vmatpush3.msra.mxu1 %v168_v5 }
0x13ab   :  { %v2191_v41 = vpop.f32.mrf.mxu1 }
0x13ac   :  { %v2195_v42 = vadd.f32 %v2191_v41, %v1952_v29  ;;  %v2335_v41 = vrot.slane %v5872_v10, %v2334_v25 }
0x13ad   :  { %v5200_v43 = vpop.f32.mrf.mxu1 }
0x13ae   :  { %v2201_v45 = vadd.f32 %v2199_v11, %v2195_v42  ;;  %v167_v11 = vld [vmem:[%s6342_s9 + $0x68] sm:$0xff] }
0x13af   :  { %5216 = vmatprep.subr.mxu1 %v167_v11 }
0x13b0   :  { %v2203_v46 = vadd.f32 %v2201_v45, %v5658_v22  ;;  %v2233_v22 = vsub.s32 1, %v5866_v7  ;;  %5217 = vmatpush3.msra.mxu1 %v167_v11  ;;  %v2441_v11 = vsub.s32 3, %v5866_v7 }
0x13b1   :  { %5218 = vmatprep.subr.mxu1 %v166_v12 }
0x13b2   :  { %v2207_v2 = vsel %vm57_vm0, %v2203_v46, 0.0  ;;  %v2234_v56 = vrot.slane %v5872_v10, %v2233_v22  ;;  %5219 = vmatpush3.msra.mxu1 %v166_v12  ;;  %v2447_v12 = vsub.s32 4, %v5866_v7 }
0x13b3   :  { %2208 = vadd.xlane.f32.xlu1 %v2207_v2  ;;  %5220 = vmatprep.subr.mxu1 %v165_v61 }
0x13b4   :  { %5221 = vmatpush3.msra.mxu1 %v165_v61  ;;  %v2442_v61 = vrot.slane %v5872_v10, %v2441_v11 }
0x13b5   :  { %5222 = vmatprep.subr.mxu1 %v164_v9 }
0x13b6   :  { %5223 = vmatpush3.msra.mxu1 %v164_v9 }
0x13b7   :  { %2218 = vadd.xlane.f32.xlu1 %v2217_v27  ;;  %5224 = vmatprep.subr.mxu1 %v163_v13 }
0x13b8   :  { %5225 = vmatpush3.msra.mxu1 %v163_v13 }
0x13b9   :  { %5226 = vmatprep.subr.mxu1 %v162_v14 }
0x13ba   :  { %5227 = vmatpush3.msra.mxu1 %v162_v14  ;;  %v2448_v14 = vrot.slane %v5872_v10, %v2447_v12  ;;  %v4859_v10 = vld [vmem:[%s6337_s4 + $0x1] ss:$0 sm:$0xff] }
0x13bb   :  { %5228 = vmatprep.subr.mxu1 %v161_v15 }
0x13bc   :  { %5229 = vmatpush3.msra.mxu1 %v161_v15 }
0x13bd   :  { %5230 = vmatprep.subr.mxu1 %v160_v16 }
0x13be   :  { %5231 = vmatpush3.msra.mxu1 %v160_v16 }
0x13bf   :  { %5232 = vmatprep.subr.mxu1 %v159_v17 }
0x13c0   :  { %5233 = vmatpush3.msra.mxu1 %v159_v17 }
0x13c1   :  { %5234 = vmatprep.subr.mxu1 %v158_v18 }
0x13c2   :  { %5235 = vmatpush3.msra.mxu1 %v158_v18 }
0x13c3   :  { %5236 = vmatprep.subr.mxu1 %v157_v30 }
0x13c4   :  { %5237 = vmatpush3.msra.mxu1 %v157_v30 }
0x13c5   :  { %5238 = vmatprep.subr.mxu1 %v156_v31 }
0x13c6   :  { %5239 = vmatpush3.msra.mxu1 %v156_v31 }
0x13c7   :  { %5240 = vmatprep.subr.mxu1 %v155_v21 }
0x13c8   :  { %5241 = vmatpush3.msra.mxu1 %v155_v21 }
0x13c9   :  { %5242 = vmatprep.subr.mxu1 %v154_v32 }
0x13ca   :  { %5243 = vmatpush3.msra.mxu1 %v154_v32 }
0x13cb   :  { %5283 = vmatprep.subr.mxu1 %v5545_v6 }
0x143c   :  { %v2209_v48 = vpop.xlane.xlu1 %2208 }
0x143d   :  { %v2212_v49 = vmul.f32 0.03125, %v2209_v48 }
0x143f   :  { %v5892_v50 = vsub.f32 %v2203_v46, %v2212_v49 }
0x1440   :  { %v2219_v51 = vpop.xlane.xlu1 %2218 }
0x1441   :  { %v2223_v52 = vmul.f32 0.03125, %v2219_v51  ;;  %v2216_v53 = vmul.f32 %v5892_v50, %v5892_v50 }
0x1443   :  { %v2225_v54 = vadd.f32 1e-05, %v2223_v52  ;;  %v2220_v35 = vsel %vm57_vm0, %v2216_v53, 0.0 }
0x1444   :  { %2221 = vadd.xlane.f32.xlu1 %v2220_v35 }
0x1445   :  { %5474 = vrsqrt.f32 %v2225_v54 }
0x1452   :  { %v5475_v57 = vpop.eup %5474 }
0x1453   :  { %v2229_v58 = vmul.f32 %v5475_v57, %v2213_v44 }
0x1455   :  { %v2235_v62 = vmul.f32 %v2234_v56, %v2229_v58  ;;  %v4831_v58 = vld [vmem:[%s6336_s3 + $0x38] sm:$0xff] }
0x1456   :  { %5247 = vmatprep.subr.mxu0 %v4831_v58 }
0x1457   :  { %v5905_v63 = vadd.f32 %v2240_v60, %v2235_v62  ;;  %v4829_v62 = vld [vmem:[%s6336_s3 + $0x28] sm:$0xff] }
0x1459   :  { %5209 = vmatprep.mubr.msk.f32.mxu0 %vm57_vm0, %v5905_v63 }
0x14cd   :  { %v2222_v19 = vpop.xlane.xlu1 %2221 }
0x14ce   :  { %v2224_v20 = vmul.f32 0.03125, %v2222_v19 }
0x14d0   :  { %v2226_v23 = vadd.f32 1e-05, %v2224_v20 }
0x14d2   :  { %5476 = vrsqrt.f32 %v2226_v23 }
0x14df   :  { %v5477_v26 = vpop.eup %5476 }
0x14e0   :  { %v2230_v28 = vmul.f32 %v5477_v26, %v5892_v50 }
0x14e2   :  { %v2236_v24 = vmul.f32 %v2234_v56, %v2230_v28 }
0x14e4   :  { %v2242_v29 = vadd.f32 %v2240_v60, %v2236_v24  ;;  %v4830_v60 = vld [vmem:[%s6336_s3 + $0x30] sm:$0xff] }
0x14e6   :  { %5210 = vmatmul.mubr.msk.f32.vlgmr.msra.gmra.mxu0 %vm57_vm0, %v2242_v29 }
0x14e7   :  { %5248 = vmatpush3.msra.mxu0 %v4831_v58 }
0x14e8   :  { %5249 = vmatprep.subr.mxu0 %v4830_v60 }
0x14e9   :  { %5250 = vmatpush3.msra.mxu0 %v4830_v60 }
0x14ea   :  { %5251 = vmatprep.subr.mxu0 %v4829_v62 }
0x14eb   :  { %5252 = vmatpush3.msra.mxu0 %v4829_v62 }
0x15a6   :  { %v5211_v34 = vpop.f32.mrf.mxu0 }
0x15a7   :  { %v2327_v36 = vadd.f32 %v5211_v34, %v4825_v33 }
0x15a8   :  { %v2321_v37 = vpop.f32.mrf.mxu0 }
0x15a9   :  { %v2322_v38 = vadd.f32 %v4825_v33, %v2321_v37  ;;  %v2331_v40 = vmax.f32 %v2327_v36, 0.0 }
0x15ab   :  { %v2330_v39 = vmax.f32 %v2322_v38, 0.0 }
0x15ad   :  { %5244 = vmatprep.mubr.f32.mxu1 %v2330_v39 }
0x15ae   :  { %5245 = vmatmul.mubr.f32.vlgmr.msra.gmra.mxu1 %v2331_v40 }
0x15af   :  { %5285 = vmatprep.mubr.msk.f32.mxu1 %vm5546_vm3, %v5545_v6 }
0x166e   :  { %v5246_v42 = vpop.f32.mrf.mxu1 }
0x166f   :  { %v2408_v44 = vadd.f32 %v5246_v42, %v2335_v41 }
0x1670   :  { %v2402_v43 = vpop.f32.mrf.mxu1 }
0x1671   :  { %v2403_v45 = vadd.f32 %v2402_v43, %v2335_v41  ;;  %v2412_v47 = vadd.f32 %v2408_v44, %v2242_v29 }
0x1673   :  { %v2411_v46 = vadd.f32 %v2403_v45, %v5905_v63  ;;  %v2416_v27 = vsel %vm57_vm0, %v2412_v47, 0.0  ;;  %v4828_v63 = vld [vmem:[%s6336_s3 + $0x20] sm:$0xff] }
0x1674   :  { %5253 = vmatprep.subr.mxu0 %v4828_v63 }
0x1675   :  { %v2413_v2 = vsel %vm57_vm0, %v2411_v46, 0.0  ;;  %5254 = vmatpush3.msra.mxu0 %v4828_v63 }
0x1676   :  { %2414 = vadd.xlane.f32.xlu1 %v2413_v2  ;;  %5258 = vmatprep.subr.mxu0 %v5545_v6 }
0x167a   :  { %2417 = vadd.xlane.f32.xlu1 %v2416_v27 }
0x16ff   :  { %v2415_v48 = vpop.xlane.xlu1 %2414 }
0x1700   :  { %v2419_v49 = vmul.f32 0.03125, %v2415_v48 }
0x1702   :  { %v2421_v50 = vsub.f32 %v2411_v46, %v2419_v49 }
0x1703   :  { %v2418_v51 = vpop.xlane.xlu1 %2417 }
0x1704   :  { %v2420_v52 = vmul.f32 0.03125, %v2418_v51  ;;  %v2423_v53 = vmul.f32 %v2421_v50, %v2421_v50 }
0x1706   :  { %v2422_v54 = vsub.f32 %v2412_v47, %v2420_v52  ;;  %v2425_v35 = vsel %vm57_vm0, %v2423_v53, 0.0  ;;  %v6052_v47 = vld [vmem:[%s6338_s5 + $0x20] sm:$0xff] }
0x1707   :  { %2426 = vadd.xlane.f32.xlu0 %v2425_v35  ;;  %5284 = vmatpush3.msra.mxu1 %v6052_v47 }
0x1708   :  { %v2424_v56 = vmul.f32 %v2422_v54, %v2422_v54  ;;  %5293 = vmatprep.subr.mxu1 %v5545_v6 }
0x170a   :  { %v2428_v57 = vsel %vm57_vm0, %v2424_v56, 0.0 }
0x170b   :  { %2429 = vadd.xlane.f32.xlu1 %v2428_v57 }
0x1790   :  { %v2427_v59 = vpop.xlane.xlu0 %2426 }
0x1791   :  { %v2431_v0 = vmul.f32 0.03125, %v2427_v59 }
0x1793   :  { %v2433_v1 = vadd.f32 1e-05, %v2431_v0 }
0x1794   :  { %v2430_v3 = vpop.xlane.xlu1 %2429 }
0x1795   :  { %5478 = vrsqrt.f32 %v2433_v1  ;;  %v2432_v4 = vmul.f32 0.03125, %v2430_v3 }
0x1797   :  { %v2434_v5 = vadd.f32 1e-05, %v2432_v4 }
0x1799   :  { %5480 = vrsqrt.f32 %v2434_v5  ;;  %v6073_v5 = vld [vmem:[%s6338_s5 + $0x28] sm:$0xff] }
0x17a2   :  { %v5479_v9 = vpop.eup %5478 }
0x17a3   :  { %v2437_v13 = vmul.f32 %v5479_v9, %v2421_v50 }
0x17a5   :  { %v2443_v15 = vmul.f32 %v2442_v61, %v2437_v13 }
0x17a6   :  { %v5481_v16 = vpop.eup %5480 }
0x17a7   :  { %v2438_v17 = vmul.f32 %v5481_v16, %v2422_v54  ;;  %v6007_v18 = vadd.f32 %v2448_v14, %v2443_v15 }
0x17a9   :  { %v2444_v19 = vmul.f32 %v2442_v61, %v2438_v17  ;;  %5255 = vmatprep.mubr.msk.f32.mxu0 %vm57_vm0, %v6007_v18 }
0x17ab   :  { %v6011_v20 = vadd.f32 %v2448_v14, %v2444_v19 }
0x17ad   :  { %5256 = vmatmul.mubr.msk.f32.vlgmr.msra.gmra.mxu0 %vm57_vm0, %v6011_v20 }
0x17ae   :  { %5260 = vmatprep.mubr.msk.f32.mxu0 %vm5546_vm3, %v5545_v6 }
0x186d   :  { %v5257_v23 = vpop.f32.mrf.mxu0 }
0x186e   :  { %v6020_v26 = vadd.f32 %v5257_v23, %v4859_v10 }
0x186f   :  { %v2567_v28 = vpop.f32.mrf.mxu0 }
0x1870   :  { %v6022_v24 = vadd.f32 %v4859_v10, %v2567_v28 }
0x1872   :  { %2577 = vrot.lane.b32.xlu1 %v6022_v24, %s5547_s14 }
0x18e4   :  { %v2578_v29 = vpop.permute.xlu1 %2577 }
0x18e5   :  { %5259 = vmatpush3.xpose.msk.msra.mxu0 %vm260_vm4, %v2578_v29 }
0x18e6   :  { %5263 = vmatprep.subr.mxu0 %v5545_v6 }
0x18e8   :  { %5261 = vmatmul.mubr.msk.f32.vlgmr.msra.gmra.mxu0 %vm260_vm4, %v6022_v24 }
0x18e9   :  { %5265 = vmatprep.mubr.msk.f32.mxu0 %vm5546_vm3, %v5545_v6 }
0x19a8   :  { %v2649_v30 = vpop.f32.mrf.mxu0 }
0x19a9   :  { %v2653_v31 = vmul.f32 0.35355338, %v2649_v30 }
0x19aa   :  { %v5262_v21 = vpop.f32.mrf.mxu0 }
0x19ab   :  { %v2654_v32 = vsel %vm260_vm4, %v2653_v31, -inf }
0x19ac   :  { %2655 = vmax.xlane.f32.xlu1 %v2654_v32 }
0x19bd   :  { %2744 = vrot.lane.b32.xlu1 %v6022_v24, %s5549_s16 }
0x1a35   :  { %v2656_v33 = vpop.xlane.xlu1 %2655 }
0x1a36   :  { %v2657_v34 = vsub.f32 %v2653_v31, %v2656_v33 }
0x1a38   :  { %v2658_v36 = vmul.f32 1.442695, %v2657_v34 }
0x1a39   :  { %v2745_v2 = vpop.permute.xlu1 %2744 }
0x1a3a   :  { %5482 = vpow2.f32 %v2658_v36 }
0x1a47   :  { %v5483_v37 = vpop.eup %5482 }
0x1a48   :  { %v2660_v38 = vsel %vm260_vm4, %v5483_v37, 0.0 }
0x1a49   :  { %2661 = vadd.xlane.f32.xlu0 %v2660_v38 }
0x1a5f   :  { %2668 = vrot.lane.b32.xlu0 %v6022_v24, %s5550_s17 }
0x1a63   :  { %2746 = vrot.lane.b32.xlu0 %v6022_v24, %s5548_s15 }
0x1ad2   :  { %v2662_v39 = vpop.xlane.xlu0 %2661 }
0x1ad3   :  { %5484 = vrcp.f32 %v2662_v39 }
0x1ad6   :  { %v2669_v40 = vpop.permute.xlu0 %2668 }
0x1ad7   :  { %5264 = vmatpush3.msra.mxu0 %v2669_v40 }
0x1ad8   :  { %5268 = vmatprep.subr.mxu0 %v5545_v6 }
0x1ada   :  { %v2747_v46 = vpop.permute.xlu0 %2746 }
0x1ae0   :  { %v5485_v41 = vpop.eup %5484 }
0x1ae1   :  { %v2664_v42 = vmul.f32 %v5485_v41, %v2662_v39 }
0x1ae3   :  { %v2665_v43 = vsub.f32 2.0, %v2664_v42  ;;  %v6108_v42 = vld [vmem:[%s6338_s5 + $0x30] sm:$0xff] }
0x1ae5   :  { %v2666_v44 = vmul.f32 %v5485_v41, %v2665_v43 }
0x1ae7   :  { %v2667_v45 = vmul.f32 %v5483_v37, %v2666_v44 }
0x1ae9   :  { %5266 = vmatmul.mubr.msk.f32.vlgmr.msra.gmra.mxu0 %vm260_vm4, %v2667_v45 }
0x1aea   :  { %5269 = vmatpush3.xpose.msk.msra.mxu0 %vm260_vm4, %v2747_v46  ;;  %5270 = vmatprep.mubr.msk.f32.mxu0 %vm5546_vm3, %v5545_v6 }
0x1aeb   :  { %5273 = vmatprep.subr.mxu0 %v5545_v6 }
0x1aed   :  { %5271 = vmatmul.mubr.msk.f32.vlgmr.msra.gmra.mxu0 %vm260_vm4, %v2745_v2 }
0x1aee   :  { %5275 = vmatprep.mubr.msk.f32.mxu0 %vm5546_vm3, %v5545_v6 }
0x1ba9   :  { %v2740_v27 = vpop.f32.mrf.mxu0 }
0x1baa   :  { %5286 = vmatmul.mubr.msk.f32.vlgmr.msra.gmra.mxu1 %vm260_vm4, %v2740_v27 }
0x1bab   :  { %v5267_v48 = vpop.f32.mrf.mxu0  ;;  %5295 = vmatprep.mubr.msk.f32.mxu1 %vm5546_vm3, %v5545_v6 }
0x1bad   :  { %v2818_v49 = vpop.f32.mrf.mxu0 }
0x1bae   :  { %v2822_v50 = vmul.f32 0.35355338, %v2818_v49 }
0x1baf   :  { %v5272_v51 = vpop.f32.mrf.mxu0 }
0x1bb0   :  { %v2823_v52 = vsel %vm260_vm4, %v2822_v50, -inf }
0x1bb1   :  { %2824 = vmax.xlane.f32.xlu0 %v2823_v52 }
0x1bc7   :  { %2837 = vrot.lane.b32.xlu0 %v6022_v24, %s5551_s18 }
0x1bcb   :  { %3059 = vrot.lane.b32.xlu0 %v6022_v24, %s5552_s19 }
0x1c3a   :  { %v2825_v53 = vpop.xlane.xlu0 %2824 }
0x1c3b   :  { %v2826_v54 = vsub.f32 %v2822_v50, %v2825_v53 }
0x1c3d   :  { %v2827_v35 = vmul.f32 1.442695, %v2826_v54 }
0x1c3e   :  { %v2838_v56 = vpop.permute.xlu0 %2837 }
0x1c3f   :  { %5486 = vpow2.f32 %v2827_v35  ;;  %5274 = vmatpush3.msra.mxu0 %v2838_v56 }
0x1c40   :  { %5278 = vmatprep.subr.mxu0 %v5545_v6 }
0x1c42   :  { %v3060_v14 = vpop.permute.xlu0 %3059 }
0x1c4c   :  { %v5487_v57 = vpop.eup %5486 }
0x1c4d   :  { %v2829_v58 = vsel %vm260_vm4, %v5487_v57, 0.0 }
0x1c4e   :  { %2830 = vadd.xlane.f32.xlu1 %v2829_v58 }
0x1c5f   :  { %3061 = vrot.lane.b32.xlu1 %v6022_v24, %s5553_s20 }
0x1c6a   :  { %v6068_v60 = vpop.f32.mrf.mxu1 }
0x1c6c   :  { %v5287_v62 = vpop.f32.mrf.mxu1 }
0x1cd7   :  { %v2831_v63 = vpop.xlane.xlu1 %2830 }
0x1cd8   :  { %5488 = vrcp.f32 %v2831_v63 }
0x1cdb   :  { %v3062_v9 = vpop.permute.xlu1 %3061 }
0x1ce5   :  { %v5489_v59 = vpop.eup %5488 }
0x1ce6   :  { %v2833_v0 = vmul.f32 %v5489_v59, %v2831_v63 }
0x1ce8   :  { %v2834_v1 = vsub.f32 2.0, %v2833_v0 }
0x1cea   :  { %v2835_v3 = vmul.f32 %v5489_v59, %v2834_v1 }
0x1cec   :  { %v2836_v4 = vmul.f32 %v5487_v57, %v2835_v3 }
0x1cee   :  { %5276 = vmatmul.mubr.msk.f32.vlgmr.msra.gmra.mxu0 %vm260_vm4, %v2836_v4  ;;  %v6148_v4 = vld [vmem:[%s6338_s5 + $0x38] sm:$0xff] }
0x1cef   :  { %5279 = vmatpush3.msra.mxu0 %v6073_v5  ;;  %5280 = vmatprep.mubr.msk.f32.mxu0 %vm5546_vm3, %v5545_v6 }
0x1cf0   :  { %5288 = vmatprep.subr.mxu0 %v5545_v6 }
0x1dae   :  { %v2909_v61 = vpop.f32.mrf.mxu0 }
0x1daf   :  { %5281 = vmatmul.mubr.msk.f32.vlgmr.msra.gmra.mxu0 %vm260_vm4, %v2909_v61 }
0x1db0   :  { %5289 = vmatpush3.xpose.msk.msra.mxu0 %vm260_vm4, %v3062_v9  ;;  %v5277_v13 = vpop.f32.mrf.mxu0  ;;  %5290 = vmatprep.mubr.msk.f32.mxu0 %vm5546_vm3, %v5545_v6 }
0x1db1   :  { %5298 = vmatprep.subr.mxu0 %v5545_v6 }
0x1db3   :  { %5291 = vmatmul.mubr.msk.f32.vlgmr.msra.gmra.mxu0 %vm260_vm4, %v3060_v14 }
0x1db4   :  { %5300 = vmatprep.mubr.msk.f32.mxu0 %vm5546_vm3, %v5545_v6  ;;  %5299 = vmatpush3.msra.mxu0 %v6108_v42 }
0x1db5   :  { %5308 = vmatprep.subr.mxu0 %v5545_v6 }
0x1e6f   :  { %v2982_v15 = vpop.f32.mrf.mxu0 }
0x1e71   :  { %v5282_v16 = vpop.f32.mrf.mxu0 }
0x1e73   :  { %v3133_v17 = vpop.f32.mrf.mxu0 }
0x1e74   :  { %v3137_v19 = vmul.f32 0.35355338, %v3133_v17 }
0x1e75   :  { %v5292_v10 = vpop.f32.mrf.mxu0 }
0x1e76   :  { %v3138_v23 = vsel %vm260_vm4, %v3137_v19, -inf }
0x1e77   :  { %3139 = vmax.xlane.f32.xlu0 %v3138_v23 }
0x1e8d   :  { %3152 = vrot.lane.b32.xlu0 %v6022_v24, %s5556_s0 }
0x1e91   :  { %3302 = vrot.lane.b32.xlu0 %v6022_v24, %s5555_s26 }
0x1f00   :  { %v3140_v28 = vpop.xlane.xlu0 %3139 }
0x1f01   :  { %v3141_v29 = vsub.f32 %v3137_v19, %v3140_v28 }
0x1f03   :  { %v3142_v30 = vmul.f32 1.442695, %v3141_v29 }
0x1f04   :  { %v3153_v31 = vpop.permute.xlu0 %3152 }
0x1f05   :  { %5490 = vpow2.f32 %v3142_v30  ;;  %5294 = vmatpush3.msra.mxu1 %v3153_v31 }
0x1f06   :  { %5303 = vmatprep.subr.mxu1 %v5545_v6 }
0x1f08   :  { %v3303_v41 = vpop.permute.xlu0 %3302 }
0x1f12   :  { %v5491_v21 = vpop.eup %5490 }
0x1f13   :  { %v3144_v32 = vsel %vm260_vm4, %v5491_v21, 0.0 }
0x1f14   :  { %3145 = vadd.xlane.f32.xlu1 %v3144_v32 }
0x1f25   :  { %3304 = vrot.lane.b32.xlu1 %v6022_v24, %s5554_s25 }
0x1f9d   :  { %v3146_v33 = vpop.xlane.xlu1 %3145 }
0x1f9e   :  { %5492 = vrcp.f32 %v3146_v33 }
0x1fa1   :  { %v3305_v40 = vpop.permute.xlu1 %3304 }
0x1fab   :  { %v5493_v34 = vpop.eup %5492 }
0x1fac   :  { %v3148_v36 = vmul.f32 %v5493_v34, %v3146_v33 }
0x1fae   :  { %v3149_v37 = vsub.f32 2.0, %v3148_v36 }
0x1fb0   :  { %v3150_v38 = vmul.f32 %v5493_v34, %v3149_v37 }
0x1fb2   :  { %v3151_v39 = vmul.f32 %v5491_v21, %v3150_v38 }
0x1fb4   :  { %5296 = vmatmul.mubr.msk.f32.vlgmr.msra.gmra.mxu1 %vm260_vm4, %v3151_v39 }
0x1fb5   :  { %5304 = vmatpush3.xpose.msk.msra.mxu1 %vm260_vm4, %v3305_v40  ;;  %5305 = vmatprep.mubr.msk.f32.mxu1 %vm5546_vm3, %v5545_v6 }
0x1fb6   :  { %5313 = vmatprep.subr.mxu1 %v5545_v6 }
0x1fb8   :  { %5306 = vmatmul.mubr.msk.f32.vlgmr.msra.gmra.mxu1 %vm260_vm4, %v3303_v41 }
0x1fb9   :  { %5315 = vmatprep.mubr.msk.f32.mxu1 %vm5546_vm3, %v5545_v6  ;;  %5314 = vmatpush3.msra.mxu1 %v6148_v4 }
0x1fba   :  { %5323 = vmatprep.subr.mxu1 %v5545_v6 }
0x2074   :  { %v3224_v43 = vpop.f32.mrf.mxu1 }
0x2075   :  { %5301 = vmatmul.mubr.msk.f32.vlgmr.msra.gmra.mxu0 %vm260_vm4, %v3224_v43 }
0x2076   :  { %v5297_v44 = vpop.f32.mrf.mxu1  ;;  %5310 = vmatprep.mubr.msk.f32.mxu0 %vm5546_vm3, %v5545_v6 }
0x2078   :  { %v3376_v45 = vpop.f32.mrf.mxu1 }
0x2079   :  { %v3380_v46 = vmul.f32 0.35355338, %v3376_v45 }
0x207a   :  { %v5307_v2 = vpop.f32.mrf.mxu1 }
0x207b   :  { %v3381_v27 = vsel %vm260_vm4, %v3380_v46, -inf }
0x207c   :  { %3382 = vmax.xlane.f32.xlu0 %v3381_v27 }
0x2092   :  { %3395 = vrot.lane.b32.xlu0 %v6022_v24, %s5557_s28  ;;  %v3056_v24 = vadd.f32 %v6068_v60, %v2982_v15 }
0x2096   :  { %3715 = vrot.lane.b32.xlu0 %v6020_v26, %s5548_s15 }
0x209a   :  { %3713 = vrot.lane.b32.xlu0 %v6020_v26, %s5549_s16 }
0x2105   :  { %v3383_v48 = vpop.xlane.xlu0 %3382 }
0x2106   :  { %v3384_v49 = vsub.f32 %v3380_v46, %v3383_v48 }
0x2108   :  { %v3385_v50 = vmul.f32 1.442695, %v3384_v49 }
0x2109   :  { %v3396_v51 = vpop.permute.xlu0 %3395 }
0x210a   :  { %5494 = vpow2.f32 %v3385_v50  ;;  %5309 = vmatpush3.msra.mxu0 %v3396_v51 }
0x210b   :  { %5318 = vmatprep.subr.mxu0 %v5545_v6 }
0x210d   :  { %v3716_v3 = vpop.permute.xlu0 %3715 }
0x2111   :  { %v3714_v60 = vpop.permute.xlu0 %3713 }
0x2117   :  { %v5495_v52 = vpop.eup %5494 }
0x2118   :  { %v3387_v53 = vsel %vm260_vm4, %v5495_v52, 0.0 }
0x2119   :  { %3388 = vadd.xlane.f32.xlu1 %v3387_v53 }
0x212a   :  { %3546 = vrot.lane.b32.xlu1 %v6020_v26, %s5547_s14 }
0x2135   :  { %v3297_v54 = vpop.f32.mrf.mxu0 }
0x2136   :  { %v6127_v35 = vadd.f32 %v3297_v54, %v3056_v24 }
0x2137   :  { %v5302_v56 = vpop.f32.mrf.mxu0 }
0x21a2   :  { %v3389_v57 = vpop.xlane.xlu1 %3388 }
0x21a3   :  { %5496 = vrcp.f32 %v3389_v57 }
0x21a6   :  { %v3547_v1 = vpop.permute.xlu1 %3546 }
0x21b0   :  { %v5497_v58 = vpop.eup %5496 }
0x21b1   :  { %v3391_v62 = vmul.f32 %v5497_v58, %v3389_v57 }
0x21b3   :  { %v3392_v63 = vsub.f32 2.0, %v3391_v62 }
0x21b5   :  { %v3393_v59 = vmul.f32 %v5497_v58, %v3392_v63 }
0x21b7   :  { %v3394_v0 = vmul.f32 %v5495_v52, %v3393_v59 }
0x21b9   :  { %5311 = vmatmul.mubr.msk.f32.vlgmr.msra.gmra.mxu0 %vm260_vm4, %v3394_v0 }
0x21ba   :  { %5319 = vmatpush3.xpose.msk.msra.mxu0 %vm260_vm4, %v3547_v1  ;;  %5320 = vmatprep.mubr.msk.f32.mxu0 %vm5546_vm3, %v5545_v6 }
0x21bb   :  { %5328 = vmatprep.subr.mxu0 %v5545_v6 }
0x21bd   :  { %5321 = vmatmul.mubr.msk.f32.vlgmr.msra.gmra.mxu0 %vm260_vm4, %v6020_v26 }
0x21be   :  { %5329 = vmatpush3.xpose.msk.msra.mxu0 %vm260_vm4, %v3716_v3  ;;  %5330 = vmatprep.mubr.msk.f32.mxu0 %vm5546_vm3, %v5545_v6 }
0x21bf   :  { %5338 = vmatprep.subr.mxu0 %v5545_v6 }
0x21c1   :  { %5331 = vmatmul.mubr.msk.f32.vlgmr.msra.gmra.mxu0 %vm260_vm4, %v3714_v60 }
0x21c2   :  { %5339 = vmatpush3.msra.mxu0 %v6073_v5  ;;  %5340 = vmatprep.mubr.msk.f32.mxu0 %vm5546_vm3, %v5545_v6 }
0x21c3   :  { %5348 = vmatprep.subr.mxu0 %v5545_v6 }
0x2279   :  { %v3467_v61 = vpop.f32.mrf.mxu0 }
0x227a   :  { %5316 = vmatmul.mubr.msk.f32.vlgmr.msra.gmra.mxu1 %vm260_vm4, %v3467_v61 }
0x227b   :  { %v5312_v9 = vpop.f32.mrf.mxu0  ;;  %5325 = vmatprep.mubr.msk.f32.mxu1 %vm5546_vm3, %v5545_v6 }
0x227d   :  { %v3618_v5 = vpop.f32.mrf.mxu0 }
0x227e   :  { %v3622_v13 = vmul.f32 0.35355338, %v3618_v5 }
0x227f   :  { %v5322_v14 = vpop.f32.mrf.mxu0 }
0x2280   :  { %v3623_v15 = vsel %vm260_vm4, %v3622_v13, -inf }
0x2281   :  { %3624 = vmax.xlane.f32.xlu0 %v3623_v15  ;;  %v3787_v16 = vpop.f32.mrf.mxu0 }
0x2282   :  { %v3791_v17 = vmul.f32 0.35355338, %v3787_v16 }
0x2283   :  { %v5332_v19 = vpop.f32.mrf.mxu0 }
0x2284   :  { %v3792_v10 = vsel %vm260_vm4, %v3791_v17, -inf }
0x2285   :  { %3793 = vmax.xlane.f32.xlu1 %v3792_v10 }
0x2296   :  { %3637 = vrot.lane.b32.xlu1 %v6020_v26, %s5550_s17 }
0x229a   :  { %4030 = vrot.lane.b32.xlu1 %v6020_v26, %s5553_s20 }
0x229e   :  { %4028 = vrot.lane.b32.xlu1 %v6020_v26, %s5552_s19 }
0x230a   :  { %v3625_v23 = vpop.xlane.xlu0 %3624 }
0x230b   :  { %v3626_v28 = vsub.f32 %v3622_v13, %v3625_v23 }
0x230d   :  { %v3627_v29 = vmul.f32 1.442695, %v3626_v28 }
0x230e   :  { %v3794_v30 = vpop.xlane.xlu1 %3793 }
0x230f   :  { %5498 = vpow2.f32 %v3627_v29  ;;  %v3795_v31 = vsub.f32 %v3791_v17, %v3794_v30 }
0x2311   :  { %v3796_v21 = vmul.f32 1.442695, %v3795_v31  ;;  %v6214_v31 = vld [vmem:[%s6339_s6 + $0x8] sm:$0x3f] }
0x2312   :  { %v3638_v32 = vpop.permute.xlu1 %3637 }
0x2313   :  { %5500 = vpow2.f32 %v3796_v21  ;;  %5324 = vmatpush3.msra.mxu1 %v3638_v32  ;;  %v4517_v21 = vrot.slane %v6214_v31, %v2198_v8 }
0x2314   :  { %5333 = vmatprep.subr.mxu1 %v5545_v6 }
0x2316   :  { %v4031_v54 = vpop.permute.xlu1 %4030 }
0x231c   :  { %v5499_v33 = vpop.eup %5498 }
0x231d   :  { %v3629_v34 = vsel %vm260_vm4, %v5499_v33, 0.0 }
0x231e   :  { %3630 = vadd.xlane.f32.xlu0 %v3629_v34 }
0x2320   :  { %v5501_v36 = vpop.eup %5500 }
0x2321   :  { %v3798_v37 = vsel %vm260_vm4, %v5501_v36, 0.0 }
0x2322   :  { %3799 = vadd.xlane.f32.xlu0 %v3798_v37 }
0x2338   :  { %3806 = vrot.lane.b32.xlu0 %v6020_v26, %s5551_s18 }
0x233a   :  { %v3540_v38 = vpop.f32.mrf.mxu1 }
0x233b   :  { %v6169_v39 = vadd.f32 %v3540_v38, %v6127_v35 }
0x233c   :  { %v5317_v40 = vpop.f32.mrf.mxu1 }
0x23a7   :  { %v3631_v41 = vpop.xlane.xlu0 %3630 }
0x23a8   :  { %5502 = vrcp.f32 %v3631_v41 }
0x23ab   :  { %v3800_v43 = vpop.xlane.xlu0 %3799 }
0x23ac   :  { %5504 = vrcp.f32 %v3800_v43 }
0x23af   :  { %v3807_v52 = vpop.permute.xlu0 %3806 }
0x23b5   :  { %v5503_v44 = vpop.eup %5502 }
0x23b6   :  { %v3633_v45 = vmul.f32 %v5503_v44, %v3631_v41 }
0x23b8   :  { %v3634_v46 = vsub.f32 2.0, %v3633_v45 }
0x23b9   :  { %v5505_v2 = vpop.eup %5504 }
0x23ba   :  { %v3635_v27 = vmul.f32 %v5503_v44, %v3634_v46  ;;  %v3802_v48 = vmul.f32 %v5505_v2, %v3800_v43 }
0x23bc   :  { %v3636_v49 = vmul.f32 %v5499_v33, %v3635_v27  ;;  %v3803_v50 = vsub.f32 2.0, %v3802_v48 }
0x23be   :  { %v3804_v51 = vmul.f32 %v5505_v2, %v3803_v50  ;;  %5326 = vmatmul.mubr.msk.f32.vlgmr.msra.gmra.mxu1 %vm260_vm4, %v3636_v49 }
0x23bf   :  { %5334 = vmatpush3.msra.mxu1 %v3807_v52  ;;  %5335 = vmatprep.mubr.msk.f32.mxu1 %vm5546_vm3, %v5545_v6 }
0x23c0   :  { %v3805_v53 = vmul.f32 %v5501_v36, %v3804_v51  ;;  %5343 = vmatprep.subr.mxu1 %v5545_v6 }
0x23c2   :  { %5336 = vmatmul.mubr.msk.f32.vlgmr.msra.gmra.mxu1 %vm260_vm4, %v3805_v53 }
0x23c3   :  { %5344 = vmatpush3.msra.mxu1 %v6052_v47  ;;  %5345 = vmatprep.mubr.msk.f32.mxu1 %vm5546_vm3, %v5545_v6  ;;  %v4029_v47 = vpop.permute.xlu1 %4028 }
0x23c4   :  { %5353 = vmatprep.subr.mxu1 %v5545_v6 }
0x247e   :  { %v3709_v24 = vpop.f32.mrf.mxu1 }
0x247f   :  { %5346 = vmatmul.mubr.msk.f32.vlgmr.msra.gmra.mxu1 %vm260_vm4, %v3709_v24 }
0x2480   :  { %v5327_v35 = vpop.f32.mrf.mxu1  ;;  %5355 = vmatprep.mubr.msk.f32.mxu1 %vm5546_vm3, %v5545_v6 }
0x2482   :  { %v3878_v56 = vpop.f32.mrf.mxu1 }
0x2483   :  { %5341 = vmatmul.mubr.msk.f32.vlgmr.msra.gmra.mxu0 %vm260_vm4, %v3878_v56 }
0x2484   :  { %5349 = vmatpush3.xpose.msk.msra.mxu0 %vm260_vm4, %v4031_v54  ;;  %v5337_v57 = vpop.f32.mrf.mxu1  ;;  %5350 = vmatprep.mubr.msk.f32.mxu0 %vm5546_vm3, %v5545_v6 }
0x2485   :  { %5358 = vmatprep.subr.mxu0 %v5545_v6 }
0x2487   :  { %5351 = vmatmul.mubr.msk.f32.vlgmr.msra.gmra.mxu0 %vm260_vm4, %v4029_v47 }
0x2488   :  { %5359 = vmatpush3.msra.mxu0 %v6108_v42  ;;  %5360 = vmatprep.mubr.msk.f32.mxu0 %vm5546_vm3, %v5545_v6 }
0x2489   :  { %5368 = vmatprep.subr.mxu0 %v5545_v6 }
0x253f   :  { %v4024_v58 = vpop.f32.mrf.mxu1 }
0x2541   :  { %v5347_v62 = vpop.f32.mrf.mxu1 }
0x2543   :  { %v3951_v63 = vpop.f32.mrf.mxu0 }
0x2544   :  { %v4025_v59 = vadd.f32 %v4024_v58, %v3951_v63 }
0x2545   :  { %v5342_v0 = vpop.f32.mrf.mxu0 }
0x2547   :  { %v4102_v1 = vpop.f32.mrf.mxu0 }
0x2548   :  { %v4106_v3 = vmul.f32 0.35355338, %v4102_v1 }
0x2549   :  { %v5352_v60 = vpop.f32.mrf.mxu0 }
0x254a   :  { %v4107_v61 = vsel %vm260_vm4, %v4106_v3, -inf }
0x254b   :  { %4108 = vmax.xlane.f32.xlu0 %v4107_v61 }
0x2561   :  { %4121 = vrot.lane.b32.xlu0 %v6020_v26, %s5556_s0 }
0x2565   :  { %4271 = vrot.lane.b32.xlu0 %v6020_v26, %s5555_s26 }
0x25d4   :  { %v4109_v42 = vpop.xlane.xlu0 %4108 }
0x25d5   :  { %v4110_v9 = vsub.f32 %v4106_v3, %v4109_v42 }
0x25d7   :  { %v4111_v5 = vmul.f32 1.442695, %v4110_v9 }
0x25d8   :  { %v4122_v13 = vpop.permute.xlu0 %4121 }
0x25d9   :  { %5506 = vpow2.f32 %v4111_v5  ;;  %5354 = vmatpush3.msra.mxu1 %v4122_v13 }
0x25da   :  { %5363 = vmatprep.subr.mxu1 %v5545_v6 }
0x25dc   :  { %v4272_v30 = vpop.permute.xlu0 %4271 }
0x25e6   :  { %v5507_v14 = vpop.eup %5506 }
0x25e7   :  { %v4113_v15 = vsel %vm260_vm4, %v5507_v14, 0.0 }
0x25e8   :  { %4114 = vadd.xlane.f32.xlu1 %v4113_v15 }
0x25f9   :  { %4273 = vrot.lane.b32.xlu1 %v6020_v26, %s5554_s25 }
0x2671   :  { %v4115_v16 = vpop.xlane.xlu1 %4114 }
0x2672   :  { %5508 = vrcp.f32 %v4115_v16 }
0x2675   :  { %v4274_v29 = vpop.permute.xlu1 %4273 }
0x267f   :  { %v5509_v17 = vpop.eup %5508 }
0x2680   :  { %v4117_v19 = vmul.f32 %v5509_v17, %v4115_v16  ;;  %v4557_v16 = vrot.slane %v6214_v31, %v2239_v55  ;;  %v4839_v55 = vld [vmem:[%s6340_s7 + $0x28] sm:$0xff] }
0x2682   :  { %v4118_v10 = vsub.f32 2.0, %v4117_v19 }
0x2684   :  { %v4119_v23 = vmul.f32 %v5509_v17, %v4118_v10  ;;  %v4841_v10 = vld [vmem:[%s6340_s7 + $0x38] sm:$0xff] }
0x2686   :  { %v4120_v28 = vmul.f32 %v5507_v14, %v4119_v23  ;;  %v4838_v23 = vld [vmem:[%s6340_s7 + $0x20] sm:$0xff] }
0x2688   :  { %5356 = vmatmul.mubr.msk.f32.vlgmr.msra.gmra.mxu1 %vm260_vm4, %v4120_v28  ;;  %v4858_v28 = vld [vmem:[%s6342_s9 + $0xf8] sm:$0xff] }
0x2689   :  { %5364 = vmatpush3.xpose.msk.msra.mxu1 %vm260_vm4, %v4274_v29  ;;  %5365 = vmatprep.mubr.msk.f32.mxu1 %vm5546_vm3, %v5545_v6  ;;  %v4857_v29 = vld [vmem:[%s6342_s9 + $0xf0] sm:$0xff] }
0x268a   :  { %5373 = vmatprep.subr.mxu1 %v5545_v6 }
0x268c   :  { %5366 = vmatmul.mubr.msk.f32.vlgmr.msra.gmra.mxu1 %vm260_vm4, %v4272_v30  ;;  %v4856_v30 = vld [vmem:[%s6342_s9 + $0xe8] sm:$0xff] }
0x268d   :  { %5374 = vmatpush3.msra.mxu1 %v6148_v4  ;;  %5375 = vmatprep.mubr.msk.f32.mxu1 %vm5546_vm3, %v5545_v6  ;;  %v4518_v4 = vadd.f32 %v4517_v21, %v6169_v39 }
0x268e   :  { %5389 = vmatprep.subr.mxu1 %v4858_v28 }
0x268f   :  { %v4520_v40 = vadd.f32 %v4518_v4, %v6007_v18  ;;  %v4852_v4 = vld [vmem:[%s6342_s9 + $0xc8] sm:$0xff] }
0x2691   :  { %v4522_v41 = vsel %vm57_vm0, %v4520_v40, 0.0 }
0x2748   :  { %v4193_v32 = vpop.f32.mrf.mxu1 }
0x2749   :  { %5361 = vmatmul.mubr.msk.f32.vlgmr.msra.gmra.mxu0 %vm260_vm4, %v4193_v32  ;;  %v4854_v32 = vld [vmem:[%s6342_s9 + $0xd8] sm:$0xff] }
0x274a   :  { %v5357_v33 = vpop.f32.mrf.mxu1  ;;  %5370 = vmatprep.mubr.msk.f32.mxu0 %vm5546_vm3, %v5545_v6 }
0x274b   :  { %v4853_v33 = vld [vmem:[%s6342_s9 + $0xd0] sm:$0xff] }
0x274c   :  { %v4345_v34 = vpop.f32.mrf.mxu1 }
0x274d   :  { %v4349_v36 = vmul.f32 0.35355338, %v4345_v34  ;;  %v4851_v34 = vld [vmem:[%s6342_s9 + $0xc0] sm:$0xff] }
0x274e   :  { %v5367_v37 = vpop.f32.mrf.mxu1 }
0x274f   :  { %v4350_v38 = vsel %vm260_vm4, %v4349_v36, -inf  ;;  %v4849_v37 = vld [vmem:[%s6342_s9 + $0xb0] sm:$0xff] }
0x2750   :  { %4351 = vmax.xlane.f32.xlu1 %v4350_v38  ;;  %v4848_v38 = vld [vmem:[%s6342_s9 + $0xa8] sm:$0xff] }
0x2754   :  { %4523 = vadd.xlane.f32.xlu1 %v4522_v41 }
0x27d9   :  { %v4352_v8 = vpop.xlane.xlu1 %4351 }
0x27da   :  { %v4353_v43 = vsub.f32 %v4349_v36, %v4352_v8  ;;  %v4850_v36 = vld [vmem:[%s6342_s9 + $0xb8] sm:$0xff] }
0x27dc   :  { %v4354_v44 = vmul.f32 1.442695, %v4353_v43 }
0x27dd   :  { %v4524_v54 = vpop.xlane.xlu1 %4523 }
0x27de   :  { %5510 = vpow2.f32 %v4354_v44 }
0x27eb   :  { %v5511_v45 = vpop.eup %5510 }
0x27ec   :  { %v4356_v6 = vsel %vm260_vm4, %v5511_v45, 0.0 }
0x27ed   :  { %4357 = vadd.xlane.f32.xlu0 %v4356_v6 }
0x2803   :  { %4364 = vrot.lane.b32.xlu0 %v6020_v26, %s5557_s28  ;;  %v4528_v26 = vmul.f32 0.03125, %v4524_v54  ;;  %v4652_v54 = vrot.slane %v6214_v31, %v2334_v25 }
0x2805   :  { %v4530_v47 = vsub.f32 %v4520_v40, %v4528_v26  ;;  %v4847_v40 = vld [vmem:[%s6342_s9 + $0xa0] sm:$0xff] }
0x2809   :  { %v4266_v39 = vpop.f32.mrf.mxu0 }
0x280a   :  { %v4270_v46 = vadd.f32 %v4266_v39, %v4025_v59  ;;  %v4532_v59 = vmul.f32 %v4530_v47, %v4530_v47 }
0x280b   :  { %v5362_v2 = vpop.f32.mrf.mxu0 }
0x280c   :  { %v4534_v0 = vsel %vm57_vm0, %v4532_v59, 0.0  ;;  %v4845_v2 = vld [vmem:[%s6342_s9 + $0x90] sm:$0xff] }
0x2876   :  { %v4358_v27 = vpop.xlane.xlu0 %4357 }
0x2877   :  { %5512 = vrcp.f32 %v4358_v27 }
0x287a   :  { %v4365_v18 = vpop.permute.xlu0 %4364 }
0x287b   :  { %5369 = vmatpush3.msra.mxu0 %v4365_v18  ;;  %v4843_v18 = vld [vmem:[%s6342_s9 + $0x80] sm:$0xff] }
0x287c   :  { %5378 = vmatprep.subr.mxu0 %v4841_v10 }
0x2884   :  { %v5513_v48 = vpop.eup %5512 }
0x2885   :  { %v4360_v49 = vmul.f32 %v5513_v48, %v4358_v27  ;;  %v4844_v27 = vld [vmem:[%s6342_s9 + $0x88] sm:$0xff] }
0x2887   :  { %v4361_v50 = vsub.f32 2.0, %v4360_v49 }
0x2889   :  { %v4362_v51 = vmul.f32 %v5513_v48, %v4361_v50  ;;  %v4894_v48 = vld [vmem:[%s6341_s8 + $0x1] ss:$0 sm:$0xff]  ;;  %s5558_s8 = smov [#allocation2]  }
0x288b   :  { %v4363_v52 = vmul.f32 %v5511_v45, %v4362_v51 }
0x288d   :  { %5371 = vmatmul.mubr.msk.f32.vlgmr.msra.gmra.mxu0 %vm260_vm4, %v4363_v52 }
0x288e   :  { %5379 = vmatpush3.msra.mxu0 %v4841_v10 }
0x294d   :  { %v4436_v53 = vpop.f32.mrf.mxu0 }
0x294e   :  { %5376 = vmatmul.mubr.msk.f32.vlgmr.msra.gmra.mxu1 %vm260_vm4, %v4436_v53 }
0x294f   :  { %v5372_v24 = vpop.f32.mrf.mxu0  ;;  %5390 = vmatpush3.msra.mxu1 %v4858_v28 }
0x2950   :  { %5391 = vmatprep.subr.mxu1 %v4857_v29 }
0x2951   :  { %5392 = vmatpush3.msra.mxu1 %v4857_v29 }
0x2952   :  { %5393 = vmatprep.subr.mxu1 %v4856_v30 }
0x2953   :  { %5394 = vmatpush3.msra.mxu1 %v4856_v30 }
0x2a0e   :  { %v4509_v35 = vpop.f32.mrf.mxu1 }
0x2a0f   :  { %v4513_v56 = vadd.f32 %v4509_v35, %v4270_v46  ;;  %v4846_v46 = vld [vmem:[%s6342_s9 + $0x98] sm:$0xff] }
0x2a10   :  { %v5377_v57 = vpop.f32.mrf.mxu1 }
0x2a11   :  { %v4519_v58 = vadd.f32 %v4517_v21, %v4513_v56  ;;  %v4855_v21 = vld [vmem:[%s6342_s9 + $0xe0] sm:$0xff]  ;;  %s4775_s9 = sshll.u32 %s5558_s8, 4  ;;  %s4776_s9 = int_to_ptr.vmem [resolvable:$true] %s4775_s9 }
0x2a12   :  { %5395 = vmatprep.subr.mxu1 %v4855_v21  ;;  %p5527_p1 = scmp.lt.s32.totalorder %s4776_s9, %s4776_s9 }
0x2a13   :  { %v4521_v62 = vadd.f32 %v4519_v58, %v6011_v20  ;;  %v4551_v20 = vrot.slane %v6214_v31, %v2233_v22  ;;  %v4840_v22 = vld [vmem:[%s6340_s7 + $0x30] sm:$0xff]  ;;  %5396 = vmatpush3.msra.mxu1 %v4855_v21  ;;  %s5522_s7 = scalar_lea.vmem %s4776_s9, 256 }
0x2a14   :  { %5380 = vmatprep.subr.mxu0 %v4840_v22  ;;  %5397 = vmatprep.subr.mxu1 %v4854_v32  ;;  %p5523_p0 = scmp.ne.s32.totalorder %s4776_s9, %s5522_s7  ;;  %p5528_p2 = scmp.lt.s32.totalorder %s5522_s7, %s5522_s7 }
0x2a15   :  { %v4525_v63 = vsel %vm57_vm0, %v4521_v62, 0.0  ;;  %5381 = vmatpush3.msra.mxu0 %v4840_v22  ;;  %5398 = vmatpush3.msra.mxu1 %v4854_v32 }
0x2a16   :  { %4526 = vadd.xlane.f32.xlu1 %v4525_v63  ;;  %5382 = vmatprep.subr.mxu0 %v4839_v55  ;;  %p5529_p3 = por %p5528_p2, %p5527_p1 }
0x2a17   :  { %5383 = vmatpush3.msra.mxu0 %v4839_v55  ;;  %5399 = vmatprep.subr.mxu1 %v4853_v33  ;;  %v4765_v55 = vrot.slane %v6214_v31, %v2447_v12 }
0x2a18   :  { %5384 = vmatprep.subr.mxu0 %v4838_v23  ;;  %5400 = vmatpush3.msra.mxu1 %v4853_v33  ;;  %p5530_p4 = pnand %p5529_p3, %p5523_p0 }
0x2a19   :  { %5385 = vmatpush3.msra.mxu0 %v4838_v23  ;;  %5401 = vmatprep.subr.mxu1 %v4852_v4 }
0x2a1a   :  { %4535 = vadd.xlane.f32.xlu1 %v4534_v0  ;;  %5402 = vmatpush3.msra.mxu1 %v4852_v4 }
0x2a1b   :  { %5403 = vmatprep.subr.mxu1 %v4851_v34 }
0x2a1c   :  { %5404 = vmatpush3.msra.mxu1 %v4851_v34 }
0x2a1d   :  { %5405 = vmatprep.subr.mxu1 %v4850_v36 }
0x2a1e   :  { %5406 = vmatpush3.msra.mxu1 %v4850_v36 }
0x2a1f   :  { %5407 = vmatprep.subr.mxu1 %v4849_v37 }
0x2a20   :  { %5408 = vmatpush3.msra.mxu1 %v4849_v37 }
0x2a21   :  { %5409 = vmatprep.subr.mxu1 %v4848_v38 }
0x2a22   :  { %5410 = vmatpush3.msra.mxu1 %v4848_v38 }
0x2a23   :  { %5411 = vmatprep.subr.mxu1 %v4847_v40 }
0x2a24   :  { %5412 = vmatpush3.msra.mxu1 %v4847_v40 }
0x2a25   :  { %5413 = vmatprep.subr.mxu1 %v4846_v46 }
0x2a26   :  { %5414 = vmatpush3.msra.mxu1 %v4846_v46 }
0x2a27   :  { %5415 = vmatprep.subr.mxu1 %v4845_v2 }
0x2a28   :  { %5416 = vmatpush3.msra.mxu1 %v4845_v2 }
0x2a29   :  { %5417 = vmatprep.subr.mxu1 %v4844_v27 }
0x2a2a   :  { %5418 = vmatpush3.msra.mxu1 %v4844_v27 }
0x2a2b   :  { %5419 = vmatprep.subr.mxu1 %v4843_v18 }
0x2a2c   :  { %5420 = vmatpush3.msra.mxu1 %v4843_v18 }
0x2a9f   :  { %v4527_v1 = vpop.xlane.xlu1 %4526 }
0x2aa0   :  { %v4529_v3 = vmul.f32 0.03125, %v4527_v1 }
0x2aa2   :  { %v6234_v60 = vsub.f32 %v4521_v62, %v4529_v3 }
0x2aa3   :  { %v4536_v61 = vpop.xlane.xlu1 %4535 }
0x2aa4   :  { %v4540_v42 = vmul.f32 0.03125, %v4536_v61  ;;  %v4533_v9 = vmul.f32 %v6234_v60, %v6234_v60 }
0x2aa6   :  { %v4542_v5 = vadd.f32 1e-05, %v4540_v42  ;;  %v4537_v13 = vsel %vm57_vm0, %v4533_v9, 0.0 }
0x2aa7   :  { %4538 = vadd.xlane.f32.xlu1 %v4537_v13 }
0x2aa8   :  { %5514 = vrsqrt.f32 %v4542_v5 }
0x2ab5   :  { %v5515_v14 = vpop.eup %5514 }
0x2ab6   :  { %v4546_v15 = vmul.f32 %v5515_v14, %v4530_v47 }
0x2ab8   :  { %v4552_v17 = vmul.f32 %v4551_v20, %v4546_v15 }
0x2aba   :  { %v6245_v19 = vadd.f32 %v4557_v16, %v4552_v17 }
0x2abc   :  { %5386 = vmatprep.mubr.msk.f32.mxu0 %vm57_vm0, %v6245_v19 }
0x2b30   :  { %v4539_v41 = vpop.xlane.xlu1 %4538 }
0x2b31   :  { %v4541_v8 = vmul.f32 0.03125, %v4539_v41 }
0x2b33   :  { %v4543_v43 = vadd.f32 1e-05, %v4541_v8 }
0x2b35   :  { %5516 = vrsqrt.f32 %v4543_v43 }
0x2b42   :  { %v5517_v44 = vpop.eup %5516 }
0x2b43   :  { %v4547_v45 = vmul.f32 %v5517_v44, %v6234_v60 }
0x2b45   :  { %v4553_v6 = vmul.f32 %v4551_v20, %v4547_v45 }
0x2b47   :  { %v4559_v39 = vadd.f32 %v4557_v16, %v4553_v6 }
0x2b49   :  { %5387 = vmatmul.mubr.msk.f32.vlgmr.msra.gmra.mxu0 %vm57_vm0, %v4559_v39 }
0x2c09   :  { %v5388_v49 = vpop.f32.mrf.mxu0 }
0x2c0a   :  { %v4644_v50 = vadd.f32 %v5388_v49, %v4894_v48 }
0x2c0b   :  { %v4638_v51 = vpop.f32.mrf.mxu0 }
0x2c0c   :  { %v4639_v52 = vadd.f32 %v4894_v48, %v4638_v51  ;;  %v4648_v24 = vmax.f32 %v4644_v50, 0.0 }
0x2c0e   :  { %v4647_v53 = vmax.f32 %v4639_v52, 0.0 }
0x2c10   :  { %5421 = vmatprep.mubr.f32.mxu1 %v4647_v53 }
0x2c11   :  { %5422 = vmatmul.mubr.f32.vlgmr.msra.gmra.mxu1 %v4648_v24 }
0x2cd1   :  { %v5423_v26 = vpop.f32.mrf.mxu1 }
0x2cd2   :  { %v4725_v56 = vadd.f32 %v5423_v26, %v4652_v54 }
0x2cd3   :  { %v4719_v35 = vpop.f32.mrf.mxu1 }
0x2cd4   :  { %v4720_v57 = vadd.f32 %v4719_v35, %v4652_v54  ;;  %v4729_v62 = vadd.f32 %v4725_v56, %v4559_v39 }
0x2cd6   :  { %v4728_v47 = vadd.f32 %v4720_v57, %v6245_v19  ;;  %v4733_v63 = vsel %vm57_vm0, %v4729_v62, 0.0  ;;  %v4759_v19 = vrot.slane %v6214_v31, %v2441_v11 }
0x2cd8   :  { %v4730_v58 = vsel %vm57_vm0, %v4728_v47, 0.0 }
0x2cd9   :  { %4731 = vadd.xlane.f32.xlu1 %v4730_v58 }
0x2cdd   :  { %4734 = vadd.xlane.f32.xlu1 %v4733_v63 }
0x2d62   :  { %v4732_v59 = vpop.xlane.xlu1 %4731 }
0x2d63   :  { %v4736_v0 = vmul.f32 0.03125, %v4732_v59 }
0x2d65   :  { %v4738_v1 = vsub.f32 %v4728_v47, %v4736_v0 }
0x2d66   :  { %v4735_v3 = vpop.xlane.xlu1 %4734 }
0x2d67   :  { %v4737_v60 = vmul.f32 0.03125, %v4735_v3  ;;  %v4740_v61 = vmul.f32 %v4738_v1, %v4738_v1 }
0x2d69   :  { %v4739_v25 = vsub.f32 %v4729_v62, %v4737_v60  ;;  %v4742_v42 = vsel %vm57_vm0, %v4740_v61, 0.0 }
0x2d6a   :  { %4743 = vadd.xlane.f32.xlu0 %v4742_v42 }
0x2d6b   :  { %v4741_v9 = vmul.f32 %v4739_v25, %v4739_v25 }
0x2d6d   :  { %v4745_v5 = vsel %vm57_vm0, %v4741_v9, 0.0 }
0x2d6e   :  { %4746 = vadd.xlane.f32.xlu1 %v4745_v5 }
0x2df3   :  { %v4744_v13 = vpop.xlane.xlu0 %4743 }
0x2df4   :  { %v4748_v20 = vmul.f32 0.03125, %v4744_v13 }
0x2df6   :  { %v4750_v14 = vadd.f32 1e-05, %v4748_v20 }
0x2df7   :  { %v4747_v15 = vpop.xlane.xlu1 %4746 }
0x2df8   :  { %5518 = vrsqrt.f32 %v4750_v14  ;;  %v4749_v16 = vmul.f32 0.03125, %v4747_v15 }
0x2dfa   :  { %v4751_v17 = vadd.f32 1e-05, %v4749_v16 }
0x2dfc   :  { %5520 = vrsqrt.f32 %v4751_v17 }
0x2e05   :  { %v5519_v10 = vpop.eup %5518 }
0x2e06   :  { %v4754_v22 = vmul.f32 %v5519_v10, %v4738_v1 }
0x2e08   :  { %v4760_v23 = vmul.f32 %v4759_v19, %v4754_v22 }
0x2e09   :  { %v5521_v28 = vpop.eup %5520 }
0x2e0a   :  { %v4755_v29 = vmul.f32 %v5521_v28, %v4739_v25  ;;  %v4766_v30 = vadd.f32 %v4765_v55, %v4760_v23 }
0x2e0c   :  { %v4761_v21 = vmul.f32 %v4759_v19, %v4755_v29  ;;  %4768 = vst.msk [vmem:[#allocation2] sm:$0xff] %vm57_vm0, %v4766_v30 }
0x2e0e   :  { %v4767_v32 = vadd.f32 %v4765_v55, %v4761_v21 }
0x2e10   :  { %4769 = vst.msk [vmem:[#allocation2 + $0x8] sm:$0xff] %vm57_vm0, %v4767_v32 }
0x2e11   :  { %5533 = shalt.err (!%p5530_p4)
}
0x2e12   :  { %s5559_s2 = smov 128   ;;  %s5560_s3 = smov 8  }
0x2e13   :  { %4781 = dma.vmem_to_hbm [thread:$0]  %s4776_s9, 256, %s6343_s10, [#allocation3], %s5559_s2, %s5559_s2, %s5560_s3  }
0x2e14   :  { %5542 = dma.done.wait [#allocation3], 256  }
0x2e15   :  { %5543 = vsyncadd [#allocation3], 4294967040 }
0x2e16   :  { %4785 = vsyncpa [#allocation3], 1 }

</bundles_post_ra>
